<compile_context>
chip_gen: v7x
topology: tpu7x:2x2x1
jax: 0.10.0
libtpu: 0.0.40
codegen_flags: <defaults>
</compile_context>

<pallas_src>
import jax
import jax.numpy as jnp
from jax.experimental import pallas as pl
from jax.experimental.pallas import tpu as pltpu


def _round_up(v, m):
    return (v + m - 1) // m * m


def _pick_bb(batch, t_pad):
    """Batch elements per grid step.

    Large blocks amortize the ~0.35us per-grid-step pipeline overhead and give
    the projection matmul a useful M dim; the per-block row count is capped at
    2048 so f32 intermediates stay a few MiB (safe inside the 32 MiB scoped
    VMEM requested, incl. v7x's smaller physical VMEM), and >=2 grid steps are
    kept when the batch allows so both v7x TensorCores stay busy.
    """
    b8 = _round_up(batch, 8)
    bb = max(8, min(128, (2048 // max(t_pad, 1)) // 8 * 8))
    if b8 >= 16:
        bb = min(bb, _round_up(b8, 16) // 2)
    return max(8, min(bb, b8))


# ----------------------------------------------------------------------------
# Pallas kernel: AudioEncoder forward for BB batch elements per grid step.
# All intermediates keep the full N = BB*Tp row resolution; valid positions of
# each stage live on fixed local-row offsets and the adaptive-pool mask selects
# them at the end.  Cross-element / wraparound rows carry finite garbage that
# the mask zeroes exactly.
# ----------------------------------------------------------------------------
def audio_encoder_kernel(x_ref,    # (N, 64)    f32  time-major rows, BB elements x Tp
                         w1_ref,   # (192, 64)  bf16 conv1 weights, 3 taps stacked on K (BN folded)
                         b1_ref,   # (1, 64)    f32  conv1 bias (BN folded)
                         w2_ref,   # (192, 128) bf16 conv2 weights, 3 taps stacked on K (BN folded)
                         b2_ref,   # (1, 128)   f32  conv2 bias (BN folded)
                         m_ref,    # (N, 1)     f32  adaptive-avg-pool mask (1/T3 on valid rows)
                         wp_ref,   # (128, 128) bf16 projection weight (in x out)
                         bp_ref,   # (1, 128)   f32  projection bias
                         o_ref):   # (BB, 128)  f32  output
    n = x_ref.shape[0]
    bb = o_ref.shape[0]
    tp = n // bb

    # ---- Conv1d(64->64, k=3) + folded BN + ReLU: im2col on the contraction
    #      dim.  Taps live at row offsets 0/1/2, gathered with XLU sublane
    #      rotates (shift n-1 == -1, n-2 == -2); one dot with K=192. ----------
    x = x_ref[...]                                                # (N, 64) f32
    x_cat = jnp.concatenate(
        [x,
         pltpu.roll(x, shift=n - 1, axis=0),
         pltpu.roll(x, shift=n - 2, axis=0)],
        axis=1).astype(jnp.bfloat16)                              # (N, 192) bf16
    y1 = jnp.maximum(
        jnp.dot(x_cat, w1_ref[...], preferred_element_type=jnp.float32)
        + b1_ref[...], 0.0)                                       # (N, 64) f32

    # ---- MaxPool1d(2): pooled values live on even local rows. ---------------
    pmax = jnp.maximum(y1, pltpu.roll(y1, shift=n - 1, axis=0))   # (N, 64) f32

    # ---- Conv1d(64->128, k=3) + folded BN + ReLU: taps at row offsets 0/2/4
    #      (pooled sequence lives on even rows); one dot with K=192. ----------
    p_cat = jnp.concatenate(
        [pmax,
         pltpu.roll(pmax, shift=n - 2, axis=0),
         pltpu.roll(pmax, shift=n - 4, axis=0)],
        axis=1).astype(jnp.bfloat16)                              # (N, 192) bf16
    y2 = jnp.maximum(
        jnp.dot(p_cat, w2_ref[...], preferred_element_type=jnp.float32)
        + b2_ref[...], 0.0)                                       # (N, 128) f32

    # ---- AdaptiveAvgPool1d(1): masked per-element mean as a sublane reduce.
    #      mask holds 1/T3 on valid conv2 rows, 0 elsewhere (odd rows, tails,
    #      time padding, cross-element garbage).  Tp % 8 == 0 so the reshape
    #      is a free sublane-group view. ---------------------------------------
    y2m = y2 * m_ref[...]                                         # (N, 128) f32
    feat = jnp.sum(y2m.reshape(bb, tp, 128), axis=1)              # (BB, 128) f32

    # ---- Projection Linear(128,128) + ReLU (Dropout = identity in eval). -----
    out = jnp.maximum(
        jnp.dot(feat.astype(jnp.bfloat16), wp_ref[...],
                preferred_element_type=jnp.float32) + bp_ref[...], 0.0)
    o_ref[...] = out                                              # dense (BB,128) store


# ----------------------------------------------------------------------------
# Wrapper: BN folding, im2col weight stacking, batching/padding, pallas_call.
# ----------------------------------------------------------------------------
def _fold_bn(conv_w, conv_b, gamma, beta, mean, var, eps=1e-5):
    # conv_w (Cout, Cin, K) -> (K*Cin, Cout) with eval-mode BN affine folded in;
    # rows are tap-major to match the kernel's [x, roll1, roll2] lane concat.
    s = gamma * jax.lax.rsqrt(var + eps)
    w = jnp.transpose(conv_w, (2, 1, 0)) * s[None, None, :]       # (K, Cin, Cout)
    b = beta + (conv_b - mean) * s
    return w.reshape(-1, conv_w.shape[0]), b


@jax.jit
def audio_encoder_forward(x, params):
    """x: (B, 1, 64, T) float32  ->  (B, 128) float32 (eval mode)."""
    B, _, c_in, T = x.shape
    assert c_in == 64
    assert T >= 8, "AudioEncoder requires T >= 8 (conv/pool/conv shrinkage)"

    t2 = (T - 2) // 2
    t3 = t2 - 2                       # number of conv2 output positions (>= 1)

    tp = _round_up(T, 8)              # pad time so (N,128)->(BB,Tp,128) is a free view
    bb = _pick_bb(B, tp)
    b_pad = _round_up(B, bb)
    nblk = b_pad // bb
    n = bb * tp

    # Fold eval-mode BatchNorm into conv weights/biases; stack the 3 taps on
    # the contraction dim so each conv is a single K=192 matmul.
    w1, b1 = _fold_bn(params["conv1_w"], params["conv1_b"],
                      params["bn1_gamma"], params["bn1_beta"],
                      params["bn1_mean"], params["bn1_var"])
    w2, b2 = _fold_bn(params["conv2_w"], params["conv2_b"],
                      params["bn2_gamma"], params["bn2_beta"],
                      params["bn2_mean"], params["bn2_var"])
    w1_bf = w1.astype(jnp.bfloat16)                               # (192, 64)
    w2_bf = w2.astype(jnp.bfloat16)                               # (192, 128)
    wp_bf = params["proj_w"].T.astype(jnp.bfloat16)               # (128, 128) in x out
    b1 = b1[None, :]                                              # (1, 64)
    b2 = b2[None, :]                                              # (1, 128)
    bpj = params["proj_b"][None, :]                               # (1, 128)

    # Time-major layout: (B,1,64,T) -> (B,T,64), pad batch/time, flatten rows.
    # TODO(synk): accept a time-major (optionally bf16) feed upstream to drop
    # this XLA relayout (the only extra HBM pass left outside the kernel).
    xt = jnp.transpose(x[:, 0].astype(jnp.float32), (0, 2, 1))    # (B, T, 64)
    xt = jnp.pad(xt, ((0, b_pad - B), (0, tp - T), (0, 0)))
    x_flat = xt.reshape(b_pad * tp, 64)

    # Adaptive-avg-pool mask: within each element, conv2 outputs are valid on
    # even local rows r < 2*t3; everything else (odd rows, tails, time padding,
    # cross-element wraparound rows) is zeroed.  Weight = 1/t3 -> exact mean.
    r = jnp.arange(tp, dtype=jnp.int32)
    row_mask = jnp.where(((r % 2) == 0) & (r < 2 * t3), 1.0 / t3, 0.0)
    mask = jnp.tile(row_mask.astype(jnp.float32), (bb,))[:, None]  # (N, 1)

    flops = nblk * (2 * n * 192 * (64 + 128) + 2 * bb * 128 * 128)
    bytes_accessed = (x_flat.size * 4 + b_pad * 128 * 4           # streamed in/out
                      + w1_bf.size * 2 + w2_bf.size * 2 + wp_bf.size * 2
                      + (b1.size + b2.size + bpj.size + mask.size) * 4)  # resident, once

    out = pl.pallas_call(
        audio_encoder_kernel,
        out_shape=jax.ShapeDtypeStruct((b_pad, 128), jnp.float32),
        grid_spec=pltpu.PrefetchScalarGridSpec(
            num_scalar_prefetch=0,
            grid=(nblk,),
            in_specs=[
                pl.BlockSpec((n, 64), lambda b: (b, 0)),          # x rows (BB elements)
                pl.BlockSpec((192, 64), lambda b: (0, 0)),        # w1 (resident)
                pl.BlockSpec((1, 64), lambda b: (0, 0)),          # b1
                pl.BlockSpec((192, 128), lambda b: (0, 0)),       # w2 (resident)
                pl.BlockSpec((1, 128), lambda b: (0, 0)),         # b2
                pl.BlockSpec((n, 1), lambda b: (0, 0)),           # pool mask (resident)
                pl.BlockSpec((128, 128), lambda b: (0, 0)),       # wp (resident)
                pl.BlockSpec((1, 128), lambda b: (0, 0)),         # bp
            ],
            out_specs=pl.BlockSpec((bb, 128), lambda b: (b, 0)),
        ),
        compiler_params=pltpu.CompilerParams(
            dimension_semantics=("parallel",),
            vmem_limit_bytes=32 * 1024 * 1024),
        cost_estimate=pl.CostEstimate(
            flops=flops, transcendentals=0, bytes_accessed=bytes_accessed),
    )(x_flat, w1_bf, b1, w2_bf, b2, mask, wp_bf, bpj)

    return out[:B]                                                # (B, 128)


# ----------------------------------------------------------------------------
# Pure-JAX reference (NCW layout, mirrors PyTorch eval-mode semantics, f32)
# ----------------------------------------------------------------------------
def audio_encoder_reference(x, params):
    eps = 1e-5

    def conv1d_ncw(x, w, b):  # x (B,Cin,T), w (Cout,Cin,K), b (Cout,)
        K = w.shape[2]
        t_out = x.shape[2] - K + 1
        y = jnp.zeros((x.shape[0], w.shape[0], t_out), jnp.float32)
        for k in range(K):
            y = y + jnp.einsum("bct,oc->bot", x[:, :, k:k + t_out], w[:, :, k])
        return y + b[None, :, None]

    def bn_eval(x, g, be, m, v):
        return g[None, :, None] * (x - m[None, :, None]) \
            * jax.lax.rsqrt(v[None, :, None] + eps) + be[None, :, None]

    h = x[:, 0, :, :]
    h = conv1d_ncw(h, params["conv1_w"], params["conv1_b"])
    h = bn_eval(h, params["bn1_gamma"], params["bn1_beta"],
                params["bn1_mean"], params["bn1_var"])
    h = jnp.maximum(h, 0.0)
    t2 = h.shape[2] // 2
    h = jnp.max(h[:, :, : 2 * t2].reshape(h.shape[0], h.shape[1], t2, 2), axis=-1)
    h = conv1d_ncw(h, params["conv2_w"], params["conv2_b"])
    h = bn_eval(h, params["bn2_gamma"], params["bn2_beta"],
                params["bn2_mean"], params["bn2_var"])
    h = jnp.maximum(h, 0.0)
    h = jnp.mean(h, axis=-1)                                      # (B, 128)
    h = jnp.maximum(h @ params["proj_w"].T + params["proj_b"], 0.0)
    return h


# ----------------------------------------------------------------------------
def make_params(key):
    ks = jax.random.split(key, 12)
    p = {
        "conv1_w": 0.1 * jax.random.normal(ks[0], (64, 64, 3), jnp.float32),
        "conv1_b": 0.1 * jax.random.normal(ks[1], (64,), jnp.float32),
        "bn1_gamma": 1.0 + 0.1 * jax.random.normal(ks[2], (64,), jnp.float32),
        "bn1_beta": 0.1 * jax.random.normal(ks[3], (64,), jnp.float32),
        "bn1_mean": 0.1 * jax.random.normal(ks[4], (64,), jnp.float32),
        "bn1_var": jnp.abs(1.0 + 0.1 * jax.random.normal(ks[5], (64,), jnp.float32)),
        "conv2_w": 0.1 * jax.random.normal(ks[6], (128, 64, 3), jnp.float32),
        "conv2_b": 0.1 * jax.random.normal(ks[7], (128,), jnp.float32),
        "bn2_gamma": 1.0 + 0.1 * jax.random.normal(ks[8], (128,), jnp.float32),
        "bn2_beta": 0.1 * jax.random.normal(ks[9], (128,), jnp.float32),
        "bn2_mean": 0.1 * jax.random.normal(ks[10], (128,), jnp.float32),
        "bn2_var": jnp.abs(1.0 + 0.1 * jax.random.normal(ks[11], (128,), jnp.float32)),
    }
    kp = jax.random.split(jax.random.fold_in(key, 99), 2)
    p["proj_w"] = 0.1 * jax.random.normal(kp[0], (128, 128), jnp.float32)
    p["proj_b"] = 0.1 * jax.random.normal(kp[1], (128,), jnp.float32)
    return p


if __name__ == "__main__":
    key = jax.random.PRNGKey(0)
    kx, kp = jax.random.split(key)
    params = make_params(kp)

    # Main check: B=64, T=16 -> BB=32 elements per grid step, 2 grid steps.
    B, T = 64, 16
    x = jax.random.normal(kx, (B, 1, 64, T), jnp.float32)
    out = jax.block_until_ready(audio_encoder_forward(x, params))
    ref = audio_encoder_reference(x, params)
    assert out.shape == (B, 128), out.shape
    # bf16 MXU operands with f32 accumulation -> small drift vs f32 reference.
    err = float(jnp.max(jnp.abs(out - ref)))
    assert err < 5e-2, err

    # Ragged check: batch not a multiple of the block, odd T (time-padding path).
    B2, T2 = 5, 11
    x2 = jax.random.normal(jax.random.fold_in(kx, 1), (B2, 1, 64, T2), jnp.float32)
    out2 = jax.block_until_ready(audio_encoder_forward(x2, params))
    ref2 = audio_encoder_reference(x2, params)
    assert out2.shape == (B2, 128), out2.shape
    err2 = float(jnp.max(jnp.abs(out2 - ref2)))
    assert err2 < 5e-2, err2

    print("KERNEL_OK")
</pallas_src>

<mosaic_0001>
module attributes {stable_mosaic.version = 11 : i64} {
  func.func @audio_encoder_kernel(%arg0: i32, %arg1: memref<512x64xf32, #tpu.memory_space<vmem>>, %arg2: memref<192x64xbf16, #tpu.memory_space<vmem>>, %arg3: memref<1x64xf32, #tpu.memory_space<vmem>>, %arg4: memref<192x128xbf16, #tpu.memory_space<vmem>>, %arg5: memref<1x128xf32, #tpu.memory_space<vmem>>, %arg6: memref<512x1xf32, #tpu.memory_space<vmem>>, %arg7: memref<128x128xbf16, #tpu.memory_space<vmem>>, %arg8: memref<1x128xf32, #tpu.memory_space<vmem>>, %arg9: memref<32x128xf32, #tpu.memory_space<vmem>>) attributes {dimension_semantics = [#tpu.dimension_semantics<parallel>], iteration_bounds = array<i64: 2>, scalar_prefetch = 0 : i64, scratch_operands = 0 : i64, tpu.core_type = #tpu.core_type<tc>, window_params = [{transform_indices = @transform_0, window_bounds = array<i64: 512, 64>}, {pipeline_mode = #tpu.pipeline_mode<synchronous>, transform_indices = @transform_1, window_bounds = array<i64: 192, 64>}, {pipeline_mode = #tpu.pipeline_mode<synchronous>, transform_indices = @transform_2, window_bounds = array<i64: 1, 64>}, {pipeline_mode = #tpu.pipeline_mode<synchronous>, transform_indices = @transform_3, window_bounds = array<i64: 192, 128>}, {pipeline_mode = #tpu.pipeline_mode<synchronous>, transform_indices = @transform_4, window_bounds = array<i64: 1, 128>}, {pipeline_mode = #tpu.pipeline_mode<synchronous>, transform_indices = @transform_5, window_bounds = array<i64: 512, 1>}, {pipeline_mode = #tpu.pipeline_mode<synchronous>, transform_indices = @transform_6, window_bounds = array<i64: 128, 128>}, {pipeline_mode = #tpu.pipeline_mode<synchronous>, transform_indices = @transform_7, window_bounds = array<i64: 1, 128>}, {transform_indices = @transform_8, window_bounds = array<i64: 32, 128>}]} {
    %c0 = arith.constant 0 : index
    %c0_0 = arith.constant 0 : index
    %0 = vector.load %arg1[%c0, %c0_0] : memref<512x64xf32, #tpu.memory_space<vmem>>, vector<512x64xf32>
    %c511_i32 = arith.constant 511 : i32
    %1 = tpu.dynamic_rotate %0 by %c511_i32 dim 0 : vector<512x64xf32>, i32 -> vector<512x64xf32>
    %c510_i32 = arith.constant 510 : i32
    %2 = tpu.dynamic_rotate %0 by %c510_i32 dim 0 : vector<512x64xf32>, i32 -> vector<512x64xf32>
    %3 = tpu.concatenate %0, %1, %2 in 1 : vector<512x64xf32>, vector<512x64xf32>, vector<512x64xf32> -> vector<512x192xf32>
    %4 = arith.truncf %3 : vector<512x192xf32> to vector<512x192xbf16>
    %c0_1 = arith.constant 0 : index
    %c0_2 = arith.constant 0 : index
    %5 = vector.load %arg2[%c0_1, %c0_2] : memref<192x64xbf16, #tpu.memory_space<vmem>>, vector<192x64xbf16>
    %cst = arith.constant dense<0.000000e+00> : vector<512x64xf32>
    %6 = tpu.matmul %4, %5, %cst {dimension_numbers = #tpu.dot_dimension_numbers<[1], [0], [0], [1], [0, 0, 1, 1], [], []>} : vector<512x192xbf16>, vector<192x64xbf16>, vector<512x64xf32> -> vector<512x64xf32>
    %c0_3 = arith.constant 0 : index
    %c0_4 = arith.constant 0 : index
    %7 = vector.load %arg3[%c0_3, %c0_4] : memref<1x64xf32, #tpu.memory_space<vmem>>, vector<1x64xf32>
    %8 = vector.broadcast %7 : vector<1x64xf32> to vector<512x64xf32>
    %9 = arith.addf %6, %8 : vector<512x64xf32>
    %cst_5 = arith.constant 0.000000e+00 : f32
    %10 = vector.broadcast %cst_5 : f32 to vector<512x64xf32>
    %11 = arith.maximumf %9, %10 : vector<512x64xf32>
    %c511_i32_6 = arith.constant 511 : i32
    %12 = tpu.dynamic_rotate %11 by %c511_i32_6 dim 0 : vector<512x64xf32>, i32 -> vector<512x64xf32>
    %13 = arith.maximumf %11, %12 : vector<512x64xf32>
    %c510_i32_7 = arith.constant 510 : i32
    %14 = tpu.dynamic_rotate %13 by %c510_i32_7 dim 0 : vector<512x64xf32>, i32 -> vector<512x64xf32>
    %c508_i32 = arith.constant 508 : i32
    %15 = tpu.dynamic_rotate %13 by %c508_i32 dim 0 : vector<512x64xf32>, i32 -> vector<512x64xf32>
    %16 = tpu.concatenate %13, %14, %15 in 1 : vector<512x64xf32>, vector<512x64xf32>, vector<512x64xf32> -> vector<512x192xf32>
    %17 = arith.truncf %16 : vector<512x192xf32> to vector<512x192xbf16>
    %c0_8 = arith.constant 0 : index
    %c0_9 = arith.constant 0 : index
    %18 = vector.load %arg4[%c0_8, %c0_9] : memref<192x128xbf16, #tpu.memory_space<vmem>>, vector<192x128xbf16>
    %cst_10 = arith.constant dense<0.000000e+00> : vector<512x128xf32>
    %19 = tpu.matmul %17, %18, %cst_10 {dimension_numbers = #tpu.dot_dimension_numbers<[1], [0], [0], [1], [0, 0, 1, 1], [], []>} : vector<512x192xbf16>, vector<192x128xbf16>, vector<512x128xf32> -> vector<512x128xf32>
    %c0_11 = arith.constant 0 : index
    %c0_12 = arith.constant 0 : index
    %20 = vector.load %arg5[%c0_11, %c0_12] : memref<1x128xf32, #tpu.memory_space<vmem>>, vector<1x128xf32>
    %21 = vector.broadcast %20 : vector<1x128xf32> to vector<512x128xf32>
    %22 = arith.addf %19, %21 : vector<512x128xf32>
    %cst_13 = arith.constant 0.000000e+00 : f32
    %23 = vector.broadcast %cst_13 : f32 to vector<512x128xf32>
    %24 = arith.maximumf %22, %23 : vector<512x128xf32>
    %c0_14 = arith.constant 0 : index
    %c0_15 = arith.constant 0 : index
    %25 = vector.load %arg6[%c0_14, %c0_15] : memref<512x1xf32, #tpu.memory_space<vmem>>, vector<512x1xf32>
    %26 = vector.broadcast %25 : vector<512x1xf32> to vector<512x128xf32>
    %27 = arith.mulf %24, %26 : vector<512x128xf32>
    %28 = vector.shape_cast %27 : vector<512x128xf32> to vector<32x16x128xf32>
    %cst_16 = arith.constant dense<0.000000e+00> : vector<32x128xf32>
    %29 = vector.multi_reduction <add>, %28, %cst_16 [1] : vector<32x16x128xf32> to vector<32x128xf32>
    %30 = arith.truncf %29 : vector<32x128xf32> to vector<32x128xbf16>
    %c0_17 = arith.constant 0 : index
    %c0_18 = arith.constant 0 : index
    %31 = vector.load %arg7[%c0_17, %c0_18] : memref<128x128xbf16, #tpu.memory_space<vmem>>, vector<128x128xbf16>
    %cst_19 = arith.constant dense<0.000000e+00> : vector<32x128xf32>
    %32 = tpu.matmul %30, %31, %cst_19 {dimension_numbers = #tpu.dot_dimension_numbers<[1], [0], [0], [1], [0, 0, 1, 1], [], []>} : vector<32x128xbf16>, vector<128x128xbf16>, vector<32x128xf32> -> vector<32x128xf32>
    %c0_20 = arith.constant 0 : index
    %c0_21 = arith.constant 0 : index
    %33 = vector.load %arg8[%c0_20, %c0_21] : memref<1x128xf32, #tpu.memory_space<vmem>>, vector<1x128xf32>
    %34 = vector.broadcast %33 : vector<1x128xf32> to vector<32x128xf32>
    %35 = arith.addf %32, %34 : vector<32x128xf32>
    %cst_22 = arith.constant 0.000000e+00 : f32
    %36 = vector.broadcast %cst_22 : f32 to vector<32x128xf32>
    %37 = arith.maximumf %35, %36 : vector<32x128xf32>
    %c0_23 = arith.constant 0 : index
    %c0_24 = arith.constant 0 : index
    %38 = vector.load %arg9[%c0_23, %c0_24] : memref<32x128xf32, #tpu.memory_space<vmem>>, vector<32x128xf32>
    tpu.vector_store %arg9[%c0_23, %c0_24], %37 {strides = array<i32>} : memref<32x128xf32, #tpu.memory_space<vmem>>, vector<32x128xf32>,
    return
  }
  func.func @transform_0(%arg0: i32) -> (i32, i32) {
    %c0_i32 = arith.constant 0 : i32
    %c0_i32_0 = arith.constant 0 : i32
    return %arg0, %c0_i32 : i32, i32
  }
  func.func @transform_1(%arg0: i32) -> (i32, i32) {
    %c0_i32 = arith.constant 0 : i32
    %c0_i32_0 = arith.constant 0 : i32
    %c0_i32_1 = arith.constant 0 : i32
    return %c0_i32, %c0_i32_0 : i32, i32
  }
  func.func @transform_2(%arg0: i32) -> (i32, i32) {
    %c0_i32 = arith.constant 0 : i32
    %c0_i32_0 = arith.constant 0 : i32
    %c0_i32_1 = arith.constant 0 : i32
    return %c0_i32, %c0_i32_0 : i32, i32
  }
  func.func @transform_3(%arg0: i32) -> (i32, i32) {
    %c0_i32 = arith.constant 0 : i32
    %c0_i32_0 = arith.constant 0 : i32
    %c0_i32_1 = arith.constant 0 : i32
    return %c0_i32, %c0_i32_0 : i32, i32
  }
  func.func @transform_4(%arg0: i32) -> (i32, i32) {
    %c0_i32 = arith.constant 0 : i32
    %c0_i32_0 = arith.constant 0 : i32
    %c0_i32_1 = arith.constant 0 : i32
    return %c0_i32, %c0_i32_0 : i32, i32
  }
  func.func @transform_5(%arg0: i32) -> (i32, i32) {
    %c0_i32 = arith.constant 0 : i32
    %c0_i32_0 = arith.constant 0 : i32
    %c0_i32_1 = arith.constant 0 : i32
    return %c0_i32, %c0_i32_0 : i32, i32
  }
  func.func @transform_6(%arg0: i32) -> (i32, i32) {
    %c0_i32 = arith.constant 0 : i32
    %c0_i32_0 = arith.constant 0 : i32
    %c0_i32_1 = arith.constant 0 : i32
    return %c0_i32, %c0_i32_0 : i32, i32
  }
  func.func @transform_7(%arg0: i32) -> (i32, i32) {
    %c0_i32 = arith.constant 0 : i32
    %c0_i32_0 = arith.constant 0 : i32
    %c0_i32_1 = arith.constant 0 : i32
    return %c0_i32, %c0_i32_0 : i32, i32
  }
  func.func @transform_8(%arg0: i32) -> (i32, i32) {
    %c0_i32 = arith.constant 0 : i32
    %c0_i32_0 = arith.constant 0 : i32
    return %arg0, %c0_i32 : i32, i32
  }
}

</mosaic_0001>

<bundles_post_ra>
// kernel: tile.8
= control target key start
LH: loop header
LB: loop body
LE: loop exit
PB: predicated region body
PF: predicated region fallthrough
CT: control target
= control target key end

     0   :  { %s40_s0 = inlined_call_operand.vmem [shape: f32[16], index: 0, kind: input, shape index: {}]   ;;  %s41_s1 = inlined_call_operand.vmem [shape: f32[32,16], index: 1, kind: output, shape index: {}]  }
   0x1   :  { %v4_v0 = vld [vmem:[%s40_s0] ss:$0 sm:$0xff] }
   0x2   :  { %5 = vst [vmem:[%s41_s1] sm:$0xff] %v4_v0  ;;  %12 = vst [vmem:[%s41_s1 + $0x8] sm:$0xff] %v4_v0 }
   0x3   :  { %13 = vst [vmem:[%s41_s1 + $0x10] sm:$0xff] %v4_v0  ;;  %14 = vst [vmem:[%s41_s1 + $0x18] sm:$0xff] %v4_v0 }

// kernel: tile.0
= control target key start
LH: loop header
LB: loop body
LE: loop exit
PB: predicated region body
PF: predicated region fallthrough
CT: control target
= control target key end

     0   :  { %vm3_vm0 = vcmask 7168   ;;  %s1121_s12 = smov 127   ;;  %s1123_s17 = smov 125   ;;  %s2266_s0 = inlined_call_operand.vmem [shape: f32[32,16], index: 0, kind: input, shape index: {}]   ;;  %s2267_s1 = inlined_call_operand.vmem [shape: f32[512,1], index: 1, kind: output, shape index: {}]  }
   0x1   :  { %v1149_v0 = vld [vmem:[%s2266_s0 + $0x10] sm:$0xff]   ;;  %v1154_v1 = vld [vmem:[%s2266_s0] sm:$0xff]   ;;  %v1159_v2 = vld [vmem:[%s2266_s0 + $0x18] sm:$0xff]   ;;  %s1124_s18 = smov 124   ;;  %s1125_s19 = smov 123  }
   0x2   :  { %68 = vrot.lane.b32.xlu1 %v1149_v0, %s1121_s12  ;;  %42 = vrot.lane.b32.xlu0 %v1154_v1, %s1121_s12  ;;  %v1166_v3 = vld [vmem:[%s2266_s0 + $0x8] sm:$0xff]   ;;  %4 = vst.msk [vmem:[%s2267_s1] ss:$16 sm:$0x3] %vm3_vm0, %v1154_v1   ;;  %s1126_s20 = smov 122   ;;  %s1127_s21 = smov 121  }
   0x3   :  { %5 = vst.msk [vmem:[%s2267_s1] ss:$16 sm:$0xc] %vm3_vm0, %v1154_v1   ;;  %6 = vst.msk [vmem:[%s2267_s1] ss:$16 sm:$0x30] %vm3_vm0, %v1154_v1  }
   0x4   :  { %7 = vst.msk [vmem:[%s2267_s1] ss:$16 sm:$0xc0] %vm3_vm0, %v1154_v1   ;;  %812 = vst.msk [vmem:[%s2267_s1 + $0x100] ss:$16 sm:$0x3] %vm3_vm0, %v1149_v0  }
   0x5   :  { %813 = vst.msk [vmem:[%s2267_s1 + $0x100] ss:$16 sm:$0xc] %vm3_vm0, %v1149_v0   ;;  %814 = vst.msk [vmem:[%s2267_s1 + $0x100] ss:$16 sm:$0x30] %vm3_vm0, %v1149_v0  }
   0x6   :  { %815 = vst.msk [vmem:[%s2267_s1 + $0x100] ss:$16 sm:$0xc0] %vm3_vm0, %v1149_v0   ;;  %817 = vst.msk [vmem:[%s2267_s1 + $0x180] ss:$16 sm:$0x3] %vm3_vm0, %v1159_v2   ;;  %81 = vrot.lane.b32.xlu1 %v1159_v2, %s1121_s12  ;;  %55 = vrot.lane.b32.xlu0 %v1166_v3, %s1121_s12 }
   0x7   :  { %818 = vst.msk [vmem:[%s2267_s1 + $0x180] ss:$16 sm:$0xc] %vm3_vm0, %v1159_v2   ;;  %819 = vst.msk [vmem:[%s2267_s1 + $0x180] ss:$16 sm:$0x30] %vm3_vm0, %v1159_v2  }
   0x8   :  { %820 = vst.msk [vmem:[%s2267_s1 + $0x180] ss:$16 sm:$0xc0] %vm3_vm0, %v1159_v2   ;;  %807 = vst.msk [vmem:[%s2267_s1 + $0x80] ss:$16 sm:$0x3] %vm3_vm0, %v1166_v3  }
   0x9   :  { %808 = vst.msk [vmem:[%s2267_s1 + $0x80] ss:$16 sm:$0xc] %vm3_vm0, %v1166_v3   ;;  %809 = vst.msk [vmem:[%s2267_s1 + $0x80] ss:$16 sm:$0x30] %vm3_vm0, %v1166_v3  }
   0xa   :  { %810 = vst.msk [vmem:[%s2267_s1 + $0x80] ss:$16 sm:$0xc0] %vm3_vm0, %v1166_v3   ;;  %s1122_s12 = smov 126   ;;  %s1128_s22 = smov 120  }
   0xb   :  { %106 = vrot.lane.b32.xlu1 %v1166_v3, %s1122_s12  ;;  %93 = vrot.lane.b32.xlu0 %v1154_v1, %s1122_s12  ;;  %s1129_s23 = smov 119   ;;  %s1130_s24 = smov 118  }
   0xc   :  { %s1131_s25 = smov 117   ;;  %s1132_s26 = smov 116  }
   0xd   :  { %s1133_s27 = smov 115   ;;  %s1134_s28 = smov 114  }
   0xe   :  { %s1135_s29 = smov 113  }
   0xf   :  { %132 = vrot.lane.b32.xlu1 %v1159_v2, %s1122_s12  ;;  %119 = vrot.lane.b32.xlu0 %v1149_v0, %s1122_s12 }
  0x13   :  { %157 = vrot.lane.b32.xlu1 %v1166_v3, %s1123_s17  ;;  %144 = vrot.lane.b32.xlu0 %v1154_v1, %s1123_s17 }
  0x17   :  { %183 = vrot.lane.b32.xlu1 %v1159_v2, %s1123_s17  ;;  %170 = vrot.lane.b32.xlu0 %v1149_v0, %s1123_s17 }
  0x1b   :  { %208 = vrot.lane.b32.xlu1 %v1166_v3, %s1124_s18  ;;  %195 = vrot.lane.b32.xlu0 %v1154_v1, %s1124_s18 }
  0x1f   :  { %234 = vrot.lane.b32.xlu1 %v1159_v2, %s1124_s18  ;;  %221 = vrot.lane.b32.xlu0 %v1149_v0, %s1124_s18 }
  0x23   :  { %259 = vrot.lane.b32.xlu1 %v1166_v3, %s1125_s19  ;;  %246 = vrot.lane.b32.xlu0 %v1154_v1, %s1125_s19 }
  0x27   :  { %285 = vrot.lane.b32.xlu1 %v1159_v2, %s1125_s19  ;;  %272 = vrot.lane.b32.xlu0 %v1149_v0, %s1125_s19 }
  0x2b   :  { %310 = vrot.lane.b32.xlu1 %v1166_v3, %s1126_s20  ;;  %297 = vrot.lane.b32.xlu0 %v1154_v1, %s1126_s20 }
  0x2f   :  { %336 = vrot.lane.b32.xlu1 %v1159_v2, %s1126_s20  ;;  %323 = vrot.lane.b32.xlu0 %v1149_v0, %s1126_s20 }
  0x33   :  { %361 = vrot.lane.b32.xlu1 %v1166_v3, %s1127_s21  ;;  %348 = vrot.lane.b32.xlu0 %v1154_v1, %s1127_s21 }
  0x37   :  { %387 = vrot.lane.b32.xlu1 %v1159_v2, %s1127_s21  ;;  %374 = vrot.lane.b32.xlu0 %v1149_v0, %s1127_s21 }
  0x3b   :  { %412 = vrot.lane.b32.xlu1 %v1166_v3, %s1128_s22  ;;  %399 = vrot.lane.b32.xlu0 %v1154_v1, %s1128_s22 }
  0x3f   :  { %438 = vrot.lane.b32.xlu1 %v1159_v2, %s1128_s22  ;;  %425 = vrot.lane.b32.xlu0 %v1149_v0, %s1128_s22 }
  0x43   :  { %463 = vrot.lane.b32.xlu1 %v1166_v3, %s1129_s23  ;;  %450 = vrot.lane.b32.xlu0 %v1154_v1, %s1129_s23 }
  0x47   :  { %489 = vrot.lane.b32.xlu1 %v1159_v2, %s1129_s23  ;;  %476 = vrot.lane.b32.xlu0 %v1149_v0, %s1129_s23 }
  0x4b   :  { %514 = vrot.lane.b32.xlu1 %v1166_v3, %s1130_s24  ;;  %501 = vrot.lane.b32.xlu0 %v1154_v1, %s1130_s24 }
  0x4f   :  { %540 = vrot.lane.b32.xlu1 %v1159_v2, %s1130_s24  ;;  %527 = vrot.lane.b32.xlu0 %v1149_v0, %s1130_s24 }
  0x53   :  { %565 = vrot.lane.b32.xlu1 %v1166_v3, %s1131_s25  ;;  %552 = vrot.lane.b32.xlu0 %v1154_v1, %s1131_s25 }
  0x57   :  { %591 = vrot.lane.b32.xlu1 %v1159_v2, %s1131_s25  ;;  %578 = vrot.lane.b32.xlu0 %v1149_v0, %s1131_s25 }
  0x5b   :  { %616 = vrot.lane.b32.xlu1 %v1166_v3, %s1132_s26  ;;  %603 = vrot.lane.b32.xlu0 %v1154_v1, %s1132_s26 }
  0x5f   :  { %642 = vrot.lane.b32.xlu1 %v1159_v2, %s1132_s26  ;;  %629 = vrot.lane.b32.xlu0 %v1149_v0, %s1132_s26 }
  0x63   :  { %667 = vrot.lane.b32.xlu1 %v1166_v3, %s1133_s27  ;;  %654 = vrot.lane.b32.xlu0 %v1154_v1, %s1133_s27 }
  0x67   :  { %693 = vrot.lane.b32.xlu1 %v1159_v2, %s1133_s27  ;;  %680 = vrot.lane.b32.xlu0 %v1149_v0, %s1133_s27 }
  0x6b   :  { %718 = vrot.lane.b32.xlu1 %v1166_v3, %s1134_s28  ;;  %705 = vrot.lane.b32.xlu0 %v1154_v1, %s1134_s28 }
  0x6f   :  { %744 = vrot.lane.b32.xlu1 %v1159_v2, %s1134_s28  ;;  %731 = vrot.lane.b32.xlu0 %v1149_v0, %s1134_s28 }
  0x73   :  { %769 = vrot.lane.b32.xlu1 %v1166_v3, %s1135_s29  ;;  %756 = vrot.lane.b32.xlu0 %v1154_v1, %s1135_s29 }
  0x74   :  { %v69_v4 = vpop.permute.xlu1 %68   ;;  %v43_v5 = vpop.permute.xlu0 %42  }
  0x75   :  { %831 = vst.msk [vmem:[%s2267_s1 + $0x101] ss:$16 sm:$0x3] %vm3_vm0, %v69_v4   ;;  %832 = vst.msk [vmem:[%s2267_s1 + $0x101] ss:$16 sm:$0xc] %vm3_vm0, %v69_v4  }
  0x76   :  { %833 = vst.msk [vmem:[%s2267_s1 + $0x101] ss:$16 sm:$0x30] %vm3_vm0, %v69_v4   ;;  %834 = vst.msk [vmem:[%s2267_s1 + $0x101] ss:$16 sm:$0xc0] %vm3_vm0, %v69_v4  }
  0x77   :  { %821 = vst.msk [vmem:[%s2267_s1 + $0x1] ss:$16 sm:$0x3] %vm3_vm0, %v43_v5   ;;  %822 = vst.msk [vmem:[%s2267_s1 + $0x1] ss:$16 sm:$0xc] %vm3_vm0, %v43_v5   ;;  %795 = vrot.lane.b32.xlu1 %v1159_v2, %s1135_s29  ;;  %782 = vrot.lane.b32.xlu0 %v1149_v0, %s1135_s29 }
  0x78   :  { %823 = vst.msk [vmem:[%s2267_s1 + $0x1] ss:$16 sm:$0x30] %vm3_vm0, %v43_v5   ;;  %824 = vst.msk [vmem:[%s2267_s1 + $0x1] ss:$16 sm:$0xc0] %vm3_vm0, %v43_v5   ;;  %v82_v6 = vpop.permute.xlu1 %81   ;;  %v56_v7 = vpop.permute.xlu0 %55  }
  0x79   :  { %836 = vst.msk [vmem:[%s2267_s1 + $0x181] ss:$16 sm:$0x3] %vm3_vm0, %v82_v6   ;;  %837 = vst.msk [vmem:[%s2267_s1 + $0x181] ss:$16 sm:$0xc] %vm3_vm0, %v82_v6  }
  0x7a   :  { %838 = vst.msk [vmem:[%s2267_s1 + $0x181] ss:$16 sm:$0x30] %vm3_vm0, %v82_v6   ;;  %839 = vst.msk [vmem:[%s2267_s1 + $0x181] ss:$16 sm:$0xc0] %vm3_vm0, %v82_v6  }
  0x7b   :  { %826 = vst.msk [vmem:[%s2267_s1 + $0x81] ss:$16 sm:$0x3] %vm3_vm0, %v56_v7   ;;  %827 = vst.msk [vmem:[%s2267_s1 + $0x81] ss:$16 sm:$0xc] %vm3_vm0, %v56_v7  }
  0x7c   :  { %828 = vst.msk [vmem:[%s2267_s1 + $0x81] ss:$16 sm:$0x30] %vm3_vm0, %v56_v7   ;;  %829 = vst.msk [vmem:[%s2267_s1 + $0x81] ss:$16 sm:$0xc0] %vm3_vm0, %v56_v7  }
  0x7d   :  { %v107_v8 = vpop.permute.xlu1 %106   ;;  %v94_v9 = vpop.permute.xlu0 %93  }
  0x7e   :  { %845 = vst.msk [vmem:[%s2267_s1 + $0x82] ss:$16 sm:$0x3] %vm3_vm0, %v107_v8   ;;  %846 = vst.msk [vmem:[%s2267_s1 + $0x82] ss:$16 sm:$0xc] %vm3_vm0, %v107_v8  }
  0x7f   :  { %847 = vst.msk [vmem:[%s2267_s1 + $0x82] ss:$16 sm:$0x30] %vm3_vm0, %v107_v8   ;;  %848 = vst.msk [vmem:[%s2267_s1 + $0x82] ss:$16 sm:$0xc0] %vm3_vm0, %v107_v8  }
  0x80   :  { %840 = vst.msk [vmem:[%s2267_s1 + $0x2] ss:$16 sm:$0x3] %vm3_vm0, %v94_v9   ;;  %841 = vst.msk [vmem:[%s2267_s1 + $0x2] ss:$16 sm:$0xc] %vm3_vm0, %v94_v9  }
  0x81   :  { %842 = vst.msk [vmem:[%s2267_s1 + $0x2] ss:$16 sm:$0x30] %vm3_vm0, %v94_v9   ;;  %843 = vst.msk [vmem:[%s2267_s1 + $0x2] ss:$16 sm:$0xc0] %vm3_vm0, %v94_v9   ;;  %v133_v10 = vpop.permute.xlu1 %132   ;;  %v120_v11 = vpop.permute.xlu0 %119  }
  0x82   :  { %855 = vst.msk [vmem:[%s2267_s1 + $0x182] ss:$16 sm:$0x3] %vm3_vm0, %v133_v10   ;;  %856 = vst.msk [vmem:[%s2267_s1 + $0x182] ss:$16 sm:$0xc] %vm3_vm0, %v133_v10  }
  0x83   :  { %857 = vst.msk [vmem:[%s2267_s1 + $0x182] ss:$16 sm:$0x30] %vm3_vm0, %v133_v10   ;;  %858 = vst.msk [vmem:[%s2267_s1 + $0x182] ss:$16 sm:$0xc0] %vm3_vm0, %v133_v10  }
  0x84   :  { %850 = vst.msk [vmem:[%s2267_s1 + $0x102] ss:$16 sm:$0x3] %vm3_vm0, %v120_v11   ;;  %851 = vst.msk [vmem:[%s2267_s1 + $0x102] ss:$16 sm:$0xc] %vm3_vm0, %v120_v11  }
  0x85   :  { %852 = vst.msk [vmem:[%s2267_s1 + $0x102] ss:$16 sm:$0x30] %vm3_vm0, %v120_v11   ;;  %853 = vst.msk [vmem:[%s2267_s1 + $0x102] ss:$16 sm:$0xc0] %vm3_vm0, %v120_v11   ;;  %v158_v12 = vpop.permute.xlu1 %157   ;;  %v145_v13 = vpop.permute.xlu0 %144  }
  0x86   :  { %864 = vst.msk [vmem:[%s2267_s1 + $0x83] ss:$16 sm:$0x3] %vm3_vm0, %v158_v12   ;;  %865 = vst.msk [vmem:[%s2267_s1 + $0x83] ss:$16 sm:$0xc] %vm3_vm0, %v158_v12  }
  0x87   :  { %866 = vst.msk [vmem:[%s2267_s1 + $0x83] ss:$16 sm:$0x30] %vm3_vm0, %v158_v12   ;;  %867 = vst.msk [vmem:[%s2267_s1 + $0x83] ss:$16 sm:$0xc0] %vm3_vm0, %v158_v12  }
  0x88   :  { %859 = vst.msk [vmem:[%s2267_s1 + $0x3] ss:$16 sm:$0x3] %vm3_vm0, %v145_v13   ;;  %860 = vst.msk [vmem:[%s2267_s1 + $0x3] ss:$16 sm:$0xc] %vm3_vm0, %v145_v13  }
  0x89   :  { %861 = vst.msk [vmem:[%s2267_s1 + $0x3] ss:$16 sm:$0x30] %vm3_vm0, %v145_v13   ;;  %862 = vst.msk [vmem:[%s2267_s1 + $0x3] ss:$16 sm:$0xc0] %vm3_vm0, %v145_v13   ;;  %v184_v14 = vpop.permute.xlu1 %183   ;;  %v171_v15 = vpop.permute.xlu0 %170  }
  0x8a   :  { %874 = vst.msk [vmem:[%s2267_s1 + $0x183] ss:$16 sm:$0x3] %vm3_vm0, %v184_v14   ;;  %875 = vst.msk [vmem:[%s2267_s1 + $0x183] ss:$16 sm:$0xc] %vm3_vm0, %v184_v14  }
  0x8b   :  { %876 = vst.msk [vmem:[%s2267_s1 + $0x183] ss:$16 sm:$0x30] %vm3_vm0, %v184_v14   ;;  %877 = vst.msk [vmem:[%s2267_s1 + $0x183] ss:$16 sm:$0xc0] %vm3_vm0, %v184_v14  }
  0x8c   :  { %869 = vst.msk [vmem:[%s2267_s1 + $0x103] ss:$16 sm:$0x3] %vm3_vm0, %v171_v15   ;;  %870 = vst.msk [vmem:[%s2267_s1 + $0x103] ss:$16 sm:$0xc] %vm3_vm0, %v171_v15  }
  0x8d   :  { %871 = vst.msk [vmem:[%s2267_s1 + $0x103] ss:$16 sm:$0x30] %vm3_vm0, %v171_v15   ;;  %872 = vst.msk [vmem:[%s2267_s1 + $0x103] ss:$16 sm:$0xc0] %vm3_vm0, %v171_v15   ;;  %v209_v16 = vpop.permute.xlu1 %208   ;;  %v196_v17 = vpop.permute.xlu0 %195  }
  0x8e   :  { %883 = vst.msk [vmem:[%s2267_s1 + $0x84] ss:$16 sm:$0x3] %vm3_vm0, %v209_v16   ;;  %884 = vst.msk [vmem:[%s2267_s1 + $0x84] ss:$16 sm:$0xc] %vm3_vm0, %v209_v16  }
  0x8f   :  { %885 = vst.msk [vmem:[%s2267_s1 + $0x84] ss:$16 sm:$0x30] %vm3_vm0, %v209_v16   ;;  %886 = vst.msk [vmem:[%s2267_s1 + $0x84] ss:$16 sm:$0xc0] %vm3_vm0, %v209_v16  }
  0x90   :  { %878 = vst.msk [vmem:[%s2267_s1 + $0x4] ss:$16 sm:$0x3] %vm3_vm0, %v196_v17   ;;  %879 = vst.msk [vmem:[%s2267_s1 + $0x4] ss:$16 sm:$0xc] %vm3_vm0, %v196_v17  }
  0x91   :  { %880 = vst.msk [vmem:[%s2267_s1 + $0x4] ss:$16 sm:$0x30] %vm3_vm0, %v196_v17   ;;  %881 = vst.msk [vmem:[%s2267_s1 + $0x4] ss:$16 sm:$0xc0] %vm3_vm0, %v196_v17   ;;  %v235_v18 = vpop.permute.xlu1 %234   ;;  %v222_v19 = vpop.permute.xlu0 %221  }
  0x92   :  { %893 = vst.msk [vmem:[%s2267_s1 + $0x184] ss:$16 sm:$0x3] %vm3_vm0, %v235_v18   ;;  %894 = vst.msk [vmem:[%s2267_s1 + $0x184] ss:$16 sm:$0xc] %vm3_vm0, %v235_v18  }
  0x93   :  { %895 = vst.msk [vmem:[%s2267_s1 + $0x184] ss:$16 sm:$0x30] %vm3_vm0, %v235_v18   ;;  %896 = vst.msk [vmem:[%s2267_s1 + $0x184] ss:$16 sm:$0xc0] %vm3_vm0, %v235_v18  }
  0x94   :  { %888 = vst.msk [vmem:[%s2267_s1 + $0x104] ss:$16 sm:$0x3] %vm3_vm0, %v222_v19   ;;  %889 = vst.msk [vmem:[%s2267_s1 + $0x104] ss:$16 sm:$0xc] %vm3_vm0, %v222_v19  }
  0x95   :  { %890 = vst.msk [vmem:[%s2267_s1 + $0x104] ss:$16 sm:$0x30] %vm3_vm0, %v222_v19   ;;  %891 = vst.msk [vmem:[%s2267_s1 + $0x104] ss:$16 sm:$0xc0] %vm3_vm0, %v222_v19   ;;  %v260_v20 = vpop.permute.xlu1 %259   ;;  %v247_v21 = vpop.permute.xlu0 %246  }
  0x96   :  { %902 = vst.msk [vmem:[%s2267_s1 + $0x85] ss:$16 sm:$0x3] %vm3_vm0, %v260_v20   ;;  %903 = vst.msk [vmem:[%s2267_s1 + $0x85] ss:$16 sm:$0xc] %vm3_vm0, %v260_v20  }
  0x97   :  { %904 = vst.msk [vmem:[%s2267_s1 + $0x85] ss:$16 sm:$0x30] %vm3_vm0, %v260_v20   ;;  %905 = vst.msk [vmem:[%s2267_s1 + $0x85] ss:$16 sm:$0xc0] %vm3_vm0, %v260_v20  }
  0x98   :  { %897 = vst.msk [vmem:[%s2267_s1 + $0x5] ss:$16 sm:$0x3] %vm3_vm0, %v247_v21   ;;  %898 = vst.msk [vmem:[%s2267_s1 + $0x5] ss:$16 sm:$0xc] %vm3_vm0, %v247_v21  }
  0x99   :  { %899 = vst.msk [vmem:[%s2267_s1 + $0x5] ss:$16 sm:$0x30] %vm3_vm0, %v247_v21   ;;  %900 = vst.msk [vmem:[%s2267_s1 + $0x5] ss:$16 sm:$0xc0] %vm3_vm0, %v247_v21   ;;  %v286_v22 = vpop.permute.xlu1 %285   ;;  %v273_v23 = vpop.permute.xlu0 %272  }
  0x9a   :  { %912 = vst.msk [vmem:[%s2267_s1 + $0x185] ss:$16 sm:$0x3] %vm3_vm0, %v286_v22   ;;  %913 = vst.msk [vmem:[%s2267_s1 + $0x185] ss:$16 sm:$0xc] %vm3_vm0, %v286_v22  }
  0x9b   :  { %914 = vst.msk [vmem:[%s2267_s1 + $0x185] ss:$16 sm:$0x30] %vm3_vm0, %v286_v22   ;;  %915 = vst.msk [vmem:[%s2267_s1 + $0x185] ss:$16 sm:$0xc0] %vm3_vm0, %v286_v22  }
  0x9c   :  { %907 = vst.msk [vmem:[%s2267_s1 + $0x105] ss:$16 sm:$0x3] %vm3_vm0, %v273_v23   ;;  %908 = vst.msk [vmem:[%s2267_s1 + $0x105] ss:$16 sm:$0xc] %vm3_vm0, %v273_v23  }
  0x9d   :  { %909 = vst.msk [vmem:[%s2267_s1 + $0x105] ss:$16 sm:$0x30] %vm3_vm0, %v273_v23   ;;  %910 = vst.msk [vmem:[%s2267_s1 + $0x105] ss:$16 sm:$0xc0] %vm3_vm0, %v273_v23   ;;  %v311_v24 = vpop.permute.xlu1 %310   ;;  %v298_v25 = vpop.permute.xlu0 %297  }
  0x9e   :  { %921 = vst.msk [vmem:[%s2267_s1 + $0x86] ss:$16 sm:$0x3] %vm3_vm0, %v311_v24   ;;  %922 = vst.msk [vmem:[%s2267_s1 + $0x86] ss:$16 sm:$0xc] %vm3_vm0, %v311_v24  }
  0x9f   :  { %923 = vst.msk [vmem:[%s2267_s1 + $0x86] ss:$16 sm:$0x30] %vm3_vm0, %v311_v24   ;;  %924 = vst.msk [vmem:[%s2267_s1 + $0x86] ss:$16 sm:$0xc0] %vm3_vm0, %v311_v24  }
  0xa0   :  { %916 = vst.msk [vmem:[%s2267_s1 + $0x6] ss:$16 sm:$0x3] %vm3_vm0, %v298_v25   ;;  %917 = vst.msk [vmem:[%s2267_s1 + $0x6] ss:$16 sm:$0xc] %vm3_vm0, %v298_v25  }
  0xa1   :  { %918 = vst.msk [vmem:[%s2267_s1 + $0x6] ss:$16 sm:$0x30] %vm3_vm0, %v298_v25   ;;  %919 = vst.msk [vmem:[%s2267_s1 + $0x6] ss:$16 sm:$0xc0] %vm3_vm0, %v298_v25   ;;  %v337_v26 = vpop.permute.xlu1 %336   ;;  %v324_v27 = vpop.permute.xlu0 %323  }
  0xa2   :  { %931 = vst.msk [vmem:[%s2267_s1 + $0x186] ss:$16 sm:$0x3] %vm3_vm0, %v337_v26   ;;  %932 = vst.msk [vmem:[%s2267_s1 + $0x186] ss:$16 sm:$0xc] %vm3_vm0, %v337_v26  }
  0xa3   :  { %933 = vst.msk [vmem:[%s2267_s1 + $0x186] ss:$16 sm:$0x30] %vm3_vm0, %v337_v26   ;;  %934 = vst.msk [vmem:[%s2267_s1 + $0x186] ss:$16 sm:$0xc0] %vm3_vm0, %v337_v26  }
  0xa4   :  { %926 = vst.msk [vmem:[%s2267_s1 + $0x106] ss:$16 sm:$0x3] %vm3_vm0, %v324_v27   ;;  %927 = vst.msk [vmem:[%s2267_s1 + $0x106] ss:$16 sm:$0xc] %vm3_vm0, %v324_v27  }
  0xa5   :  { %928 = vst.msk [vmem:[%s2267_s1 + $0x106] ss:$16 sm:$0x30] %vm3_vm0, %v324_v27   ;;  %929 = vst.msk [vmem:[%s2267_s1 + $0x106] ss:$16 sm:$0xc0] %vm3_vm0, %v324_v27   ;;  %v362_v28 = vpop.permute.xlu1 %361   ;;  %v349_v29 = vpop.permute.xlu0 %348  }
  0xa6   :  { %940 = vst.msk [vmem:[%s2267_s1 + $0x87] ss:$16 sm:$0x3] %vm3_vm0, %v362_v28   ;;  %941 = vst.msk [vmem:[%s2267_s1 + $0x87] ss:$16 sm:$0xc] %vm3_vm0, %v362_v28  }
  0xa7   :  { %942 = vst.msk [vmem:[%s2267_s1 + $0x87] ss:$16 sm:$0x30] %vm3_vm0, %v362_v28   ;;  %943 = vst.msk [vmem:[%s2267_s1 + $0x87] ss:$16 sm:$0xc0] %vm3_vm0, %v362_v28  }
  0xa8   :  { %935 = vst.msk [vmem:[%s2267_s1 + $0x7] ss:$16 sm:$0x3] %vm3_vm0, %v349_v29   ;;  %936 = vst.msk [vmem:[%s2267_s1 + $0x7] ss:$16 sm:$0xc] %vm3_vm0, %v349_v29  }
  0xa9   :  { %937 = vst.msk [vmem:[%s2267_s1 + $0x7] ss:$16 sm:$0x30] %vm3_vm0, %v349_v29   ;;  %938 = vst.msk [vmem:[%s2267_s1 + $0x7] ss:$16 sm:$0xc0] %vm3_vm0, %v349_v29   ;;  %v388_v30 = vpop.permute.xlu1 %387   ;;  %v375_v31 = vpop.permute.xlu0 %374  }
  0xaa   :  { %950 = vst.msk [vmem:[%s2267_s1 + $0x187] ss:$16 sm:$0x3] %vm3_vm0, %v388_v30   ;;  %951 = vst.msk [vmem:[%s2267_s1 + $0x187] ss:$16 sm:$0xc] %vm3_vm0, %v388_v30  }
  0xab   :  { %952 = vst.msk [vmem:[%s2267_s1 + $0x187] ss:$16 sm:$0x30] %vm3_vm0, %v388_v30   ;;  %953 = vst.msk [vmem:[%s2267_s1 + $0x187] ss:$16 sm:$0xc0] %vm3_vm0, %v388_v30  }
  0xac   :  { %945 = vst.msk [vmem:[%s2267_s1 + $0x107] ss:$16 sm:$0x3] %vm3_vm0, %v375_v31   ;;  %946 = vst.msk [vmem:[%s2267_s1 + $0x107] ss:$16 sm:$0xc] %vm3_vm0, %v375_v31  }
  0xad   :  { %947 = vst.msk [vmem:[%s2267_s1 + $0x107] ss:$16 sm:$0x30] %vm3_vm0, %v375_v31   ;;  %948 = vst.msk [vmem:[%s2267_s1 + $0x107] ss:$16 sm:$0xc0] %vm3_vm0, %v375_v31   ;;  %v413_v32 = vpop.permute.xlu1 %412   ;;  %v400_v33 = vpop.permute.xlu0 %399  }
  0xae   :  { %959 = vst.msk [vmem:[%s2267_s1 + $0x88] ss:$16 sm:$0x3] %vm3_vm0, %v413_v32   ;;  %960 = vst.msk [vmem:[%s2267_s1 + $0x88] ss:$16 sm:$0xc] %vm3_vm0, %v413_v32  }
  0xaf   :  { %961 = vst.msk [vmem:[%s2267_s1 + $0x88] ss:$16 sm:$0x30] %vm3_vm0, %v413_v32   ;;  %962 = vst.msk [vmem:[%s2267_s1 + $0x88] ss:$16 sm:$0xc0] %vm3_vm0, %v413_v32  }
  0xb0   :  { %954 = vst.msk [vmem:[%s2267_s1 + $0x8] ss:$16 sm:$0x3] %vm3_vm0, %v400_v33   ;;  %955 = vst.msk [vmem:[%s2267_s1 + $0x8] ss:$16 sm:$0xc] %vm3_vm0, %v400_v33  }
  0xb1   :  { %956 = vst.msk [vmem:[%s2267_s1 + $0x8] ss:$16 sm:$0x30] %vm3_vm0, %v400_v33   ;;  %957 = vst.msk [vmem:[%s2267_s1 + $0x8] ss:$16 sm:$0xc0] %vm3_vm0, %v400_v33   ;;  %v439_v34 = vpop.permute.xlu1 %438   ;;  %v426_v35 = vpop.permute.xlu0 %425  }
  0xb2   :  { %969 = vst.msk [vmem:[%s2267_s1 + $0x188] ss:$16 sm:$0x3] %vm3_vm0, %v439_v34   ;;  %970 = vst.msk [vmem:[%s2267_s1 + $0x188] ss:$16 sm:$0xc] %vm3_vm0, %v439_v34  }
  0xb3   :  { %971 = vst.msk [vmem:[%s2267_s1 + $0x188] ss:$16 sm:$0x30] %vm3_vm0, %v439_v34   ;;  %972 = vst.msk [vmem:[%s2267_s1 + $0x188] ss:$16 sm:$0xc0] %vm3_vm0, %v439_v34  }
  0xb4   :  { %964 = vst.msk [vmem:[%s2267_s1 + $0x108] ss:$16 sm:$0x3] %vm3_vm0, %v426_v35   ;;  %965 = vst.msk [vmem:[%s2267_s1 + $0x108] ss:$16 sm:$0xc] %vm3_vm0, %v426_v35  }
  0xb5   :  { %966 = vst.msk [vmem:[%s2267_s1 + $0x108] ss:$16 sm:$0x30] %vm3_vm0, %v426_v35   ;;  %967 = vst.msk [vmem:[%s2267_s1 + $0x108] ss:$16 sm:$0xc0] %vm3_vm0, %v426_v35   ;;  %v464_v36 = vpop.permute.xlu1 %463   ;;  %v451_v37 = vpop.permute.xlu0 %450  }
  0xb6   :  { %978 = vst.msk [vmem:[%s2267_s1 + $0x89] ss:$16 sm:$0x3] %vm3_vm0, %v464_v36   ;;  %979 = vst.msk [vmem:[%s2267_s1 + $0x89] ss:$16 sm:$0xc] %vm3_vm0, %v464_v36  }
  0xb7   :  { %980 = vst.msk [vmem:[%s2267_s1 + $0x89] ss:$16 sm:$0x30] %vm3_vm0, %v464_v36   ;;  %981 = vst.msk [vmem:[%s2267_s1 + $0x89] ss:$16 sm:$0xc0] %vm3_vm0, %v464_v36  }
  0xb8   :  { %973 = vst.msk [vmem:[%s2267_s1 + $0x9] ss:$16 sm:$0x3] %vm3_vm0, %v451_v37   ;;  %974 = vst.msk [vmem:[%s2267_s1 + $0x9] ss:$16 sm:$0xc] %vm3_vm0, %v451_v37  }
  0xb9   :  { %975 = vst.msk [vmem:[%s2267_s1 + $0x9] ss:$16 sm:$0x30] %vm3_vm0, %v451_v37   ;;  %976 = vst.msk [vmem:[%s2267_s1 + $0x9] ss:$16 sm:$0xc0] %vm3_vm0, %v451_v37   ;;  %v490_v38 = vpop.permute.xlu1 %489   ;;  %v477_v39 = vpop.permute.xlu0 %476  }
  0xba   :  { %988 = vst.msk [vmem:[%s2267_s1 + $0x189] ss:$16 sm:$0x3] %vm3_vm0, %v490_v38   ;;  %989 = vst.msk [vmem:[%s2267_s1 + $0x189] ss:$16 sm:$0xc] %vm3_vm0, %v490_v38  }
  0xbb   :  { %990 = vst.msk [vmem:[%s2267_s1 + $0x189] ss:$16 sm:$0x30] %vm3_vm0, %v490_v38   ;;  %991 = vst.msk [vmem:[%s2267_s1 + $0x189] ss:$16 sm:$0xc0] %vm3_vm0, %v490_v38  }
  0xbc   :  { %983 = vst.msk [vmem:[%s2267_s1 + $0x109] ss:$16 sm:$0x3] %vm3_vm0, %v477_v39   ;;  %984 = vst.msk [vmem:[%s2267_s1 + $0x109] ss:$16 sm:$0xc] %vm3_vm0, %v477_v39  }
  0xbd   :  { %985 = vst.msk [vmem:[%s2267_s1 + $0x109] ss:$16 sm:$0x30] %vm3_vm0, %v477_v39   ;;  %986 = vst.msk [vmem:[%s2267_s1 + $0x109] ss:$16 sm:$0xc0] %vm3_vm0, %v477_v39   ;;  %v515_v40 = vpop.permute.xlu1 %514   ;;  %v502_v41 = vpop.permute.xlu0 %501  }
  0xbe   :  { %997 = vst.msk [vmem:[%s2267_s1 + $0x8a] ss:$16 sm:$0x3] %vm3_vm0, %v515_v40   ;;  %998 = vst.msk [vmem:[%s2267_s1 + $0x8a] ss:$16 sm:$0xc] %vm3_vm0, %v515_v40  }
  0xbf   :  { %999 = vst.msk [vmem:[%s2267_s1 + $0x8a] ss:$16 sm:$0x30] %vm3_vm0, %v515_v40   ;;  %1000 = vst.msk [vmem:[%s2267_s1 + $0x8a] ss:$16 sm:$0xc0] %vm3_vm0, %v515_v40  }
  0xc0   :  { %992 = vst.msk [vmem:[%s2267_s1 + $0xa] ss:$16 sm:$0x3] %vm3_vm0, %v502_v41   ;;  %993 = vst.msk [vmem:[%s2267_s1 + $0xa] ss:$16 sm:$0xc] %vm3_vm0, %v502_v41  }
  0xc1   :  { %994 = vst.msk [vmem:[%s2267_s1 + $0xa] ss:$16 sm:$0x30] %vm3_vm0, %v502_v41   ;;  %995 = vst.msk [vmem:[%s2267_s1 + $0xa] ss:$16 sm:$0xc0] %vm3_vm0, %v502_v41   ;;  %v541_v42 = vpop.permute.xlu1 %540   ;;  %v528_v43 = vpop.permute.xlu0 %527  }
  0xc2   :  { %1007 = vst.msk [vmem:[%s2267_s1 + $0x18a] ss:$16 sm:$0x3] %vm3_vm0, %v541_v42   ;;  %1008 = vst.msk [vmem:[%s2267_s1 + $0x18a] ss:$16 sm:$0xc] %vm3_vm0, %v541_v42  }
  0xc3   :  { %1009 = vst.msk [vmem:[%s2267_s1 + $0x18a] ss:$16 sm:$0x30] %vm3_vm0, %v541_v42   ;;  %1010 = vst.msk [vmem:[%s2267_s1 + $0x18a] ss:$16 sm:$0xc0] %vm3_vm0, %v541_v42  }
  0xc4   :  { %1002 = vst.msk [vmem:[%s2267_s1 + $0x10a] ss:$16 sm:$0x3] %vm3_vm0, %v528_v43   ;;  %1003 = vst.msk [vmem:[%s2267_s1 + $0x10a] ss:$16 sm:$0xc] %vm3_vm0, %v528_v43  }
  0xc5   :  { %1004 = vst.msk [vmem:[%s2267_s1 + $0x10a] ss:$16 sm:$0x30] %vm3_vm0, %v528_v43   ;;  %1005 = vst.msk [vmem:[%s2267_s1 + $0x10a] ss:$16 sm:$0xc0] %vm3_vm0, %v528_v43   ;;  %v566_v44 = vpop.permute.xlu1 %565   ;;  %v553_v45 = vpop.permute.xlu0 %552  }
  0xc6   :  { %1016 = vst.msk [vmem:[%s2267_s1 + $0x8b] ss:$16 sm:$0x3] %vm3_vm0, %v566_v44   ;;  %1017 = vst.msk [vmem:[%s2267_s1 + $0x8b] ss:$16 sm:$0xc] %vm3_vm0, %v566_v44  }
  0xc7   :  { %1018 = vst.msk [vmem:[%s2267_s1 + $0x8b] ss:$16 sm:$0x30] %vm3_vm0, %v566_v44   ;;  %1019 = vst.msk [vmem:[%s2267_s1 + $0x8b] ss:$16 sm:$0xc0] %vm3_vm0, %v566_v44  }
  0xc8   :  { %1011 = vst.msk [vmem:[%s2267_s1 + $0xb] ss:$16 sm:$0x3] %vm3_vm0, %v553_v45   ;;  %1012 = vst.msk [vmem:[%s2267_s1 + $0xb] ss:$16 sm:$0xc] %vm3_vm0, %v553_v45  }
  0xc9   :  { %1013 = vst.msk [vmem:[%s2267_s1 + $0xb] ss:$16 sm:$0x30] %vm3_vm0, %v553_v45   ;;  %1014 = vst.msk [vmem:[%s2267_s1 + $0xb] ss:$16 sm:$0xc0] %vm3_vm0, %v553_v45   ;;  %v592_v46 = vpop.permute.xlu1 %591   ;;  %v579_v47 = vpop.permute.xlu0 %578  }
  0xca   :  { %1026 = vst.msk [vmem:[%s2267_s1 + $0x18b] ss:$16 sm:$0x3] %vm3_vm0, %v592_v46   ;;  %1027 = vst.msk [vmem:[%s2267_s1 + $0x18b] ss:$16 sm:$0xc] %vm3_vm0, %v592_v46  }
  0xcb   :  { %1028 = vst.msk [vmem:[%s2267_s1 + $0x18b] ss:$16 sm:$0x30] %vm3_vm0, %v592_v46   ;;  %1029 = vst.msk [vmem:[%s2267_s1 + $0x18b] ss:$16 sm:$0xc0] %vm3_vm0, %v592_v46  }
  0xcc   :  { %1021 = vst.msk [vmem:[%s2267_s1 + $0x10b] ss:$16 sm:$0x3] %vm3_vm0, %v579_v47   ;;  %1022 = vst.msk [vmem:[%s2267_s1 + $0x10b] ss:$16 sm:$0xc] %vm3_vm0, %v579_v47  }
  0xcd   :  { %1023 = vst.msk [vmem:[%s2267_s1 + $0x10b] ss:$16 sm:$0x30] %vm3_vm0, %v579_v47   ;;  %1024 = vst.msk [vmem:[%s2267_s1 + $0x10b] ss:$16 sm:$0xc0] %vm3_vm0, %v579_v47   ;;  %v617_v48 = vpop.permute.xlu1 %616   ;;  %v604_v49 = vpop.permute.xlu0 %603  }
  0xce   :  { %1035 = vst.msk [vmem:[%s2267_s1 + $0x8c] ss:$16 sm:$0x3] %vm3_vm0, %v617_v48   ;;  %1036 = vst.msk [vmem:[%s2267_s1 + $0x8c] ss:$16 sm:$0xc] %vm3_vm0, %v617_v48  }
  0xcf   :  { %1037 = vst.msk [vmem:[%s2267_s1 + $0x8c] ss:$16 sm:$0x30] %vm3_vm0, %v617_v48   ;;  %1038 = vst.msk [vmem:[%s2267_s1 + $0x8c] ss:$16 sm:$0xc0] %vm3_vm0, %v617_v48  }
  0xd0   :  { %1030 = vst.msk [vmem:[%s2267_s1 + $0xc] ss:$16 sm:$0x3] %vm3_vm0, %v604_v49   ;;  %1031 = vst.msk [vmem:[%s2267_s1 + $0xc] ss:$16 sm:$0xc] %vm3_vm0, %v604_v49  }
  0xd1   :  { %1032 = vst.msk [vmem:[%s2267_s1 + $0xc] ss:$16 sm:$0x30] %vm3_vm0, %v604_v49   ;;  %1033 = vst.msk [vmem:[%s2267_s1 + $0xc] ss:$16 sm:$0xc0] %vm3_vm0, %v604_v49   ;;  %v643_v50 = vpop.permute.xlu1 %642   ;;  %v630_v51 = vpop.permute.xlu0 %629  }
  0xd2   :  { %1045 = vst.msk [vmem:[%s2267_s1 + $0x18c] ss:$16 sm:$0x3] %vm3_vm0, %v643_v50   ;;  %1046 = vst.msk [vmem:[%s2267_s1 + $0x18c] ss:$16 sm:$0xc] %vm3_vm0, %v643_v50  }
  0xd3   :  { %1047 = vst.msk [vmem:[%s2267_s1 + $0x18c] ss:$16 sm:$0x30] %vm3_vm0, %v643_v50   ;;  %1048 = vst.msk [vmem:[%s2267_s1 + $0x18c] ss:$16 sm:$0xc0] %vm3_vm0, %v643_v50  }
  0xd4   :  { %1040 = vst.msk [vmem:[%s2267_s1 + $0x10c] ss:$16 sm:$0x3] %vm3_vm0, %v630_v51   ;;  %1041 = vst.msk [vmem:[%s2267_s1 + $0x10c] ss:$16 sm:$0xc] %vm3_vm0, %v630_v51  }
  0xd5   :  { %1042 = vst.msk [vmem:[%s2267_s1 + $0x10c] ss:$16 sm:$0x30] %vm3_vm0, %v630_v51   ;;  %1043 = vst.msk [vmem:[%s2267_s1 + $0x10c] ss:$16 sm:$0xc0] %vm3_vm0, %v630_v51   ;;  %v668_v52 = vpop.permute.xlu1 %667   ;;  %v655_v53 = vpop.permute.xlu0 %654  }
  0xd6   :  { %1054 = vst.msk [vmem:[%s2267_s1 + $0x8d] ss:$16 sm:$0x3] %vm3_vm0, %v668_v52   ;;  %1055 = vst.msk [vmem:[%s2267_s1 + $0x8d] ss:$16 sm:$0xc] %vm3_vm0, %v668_v52  }
  0xd7   :  { %1056 = vst.msk [vmem:[%s2267_s1 + $0x8d] ss:$16 sm:$0x30] %vm3_vm0, %v668_v52   ;;  %1057 = vst.msk [vmem:[%s2267_s1 + $0x8d] ss:$16 sm:$0xc0] %vm3_vm0, %v668_v52  }
  0xd8   :  { %1049 = vst.msk [vmem:[%s2267_s1 + $0xd] ss:$16 sm:$0x3] %vm3_vm0, %v655_v53   ;;  %1050 = vst.msk [vmem:[%s2267_s1 + $0xd] ss:$16 sm:$0xc] %vm3_vm0, %v655_v53  }
  0xd9   :  { %1051 = vst.msk [vmem:[%s2267_s1 + $0xd] ss:$16 sm:$0x30] %vm3_vm0, %v655_v53   ;;  %1052 = vst.msk [vmem:[%s2267_s1 + $0xd] ss:$16 sm:$0xc0] %vm3_vm0, %v655_v53   ;;  %v694_v54 = vpop.permute.xlu1 %693   ;;  %v681_v55 = vpop.permute.xlu0 %680  }
  0xda   :  { %1064 = vst.msk [vmem:[%s2267_s1 + $0x18d] ss:$16 sm:$0x3] %vm3_vm0, %v694_v54   ;;  %1065 = vst.msk [vmem:[%s2267_s1 + $0x18d] ss:$16 sm:$0xc] %vm3_vm0, %v694_v54  }
  0xdb   :  { %1066 = vst.msk [vmem:[%s2267_s1 + $0x18d] ss:$16 sm:$0x30] %vm3_vm0, %v694_v54   ;;  %1067 = vst.msk [vmem:[%s2267_s1 + $0x18d] ss:$16 sm:$0xc0] %vm3_vm0, %v694_v54  }
  0xdc   :  { %1059 = vst.msk [vmem:[%s2267_s1 + $0x10d] ss:$16 sm:$0x3] %vm3_vm0, %v681_v55   ;;  %1060 = vst.msk [vmem:[%s2267_s1 + $0x10d] ss:$16 sm:$0xc] %vm3_vm0, %v681_v55  }
  0xdd   :  { %1061 = vst.msk [vmem:[%s2267_s1 + $0x10d] ss:$16 sm:$0x30] %vm3_vm0, %v681_v55   ;;  %1062 = vst.msk [vmem:[%s2267_s1 + $0x10d] ss:$16 sm:$0xc0] %vm3_vm0, %v681_v55   ;;  %v719_v56 = vpop.permute.xlu1 %718   ;;  %v706_v57 = vpop.permute.xlu0 %705  }
  0xde   :  { %1073 = vst.msk [vmem:[%s2267_s1 + $0x8e] ss:$16 sm:$0x3] %vm3_vm0, %v719_v56   ;;  %1074 = vst.msk [vmem:[%s2267_s1 + $0x8e] ss:$16 sm:$0xc] %vm3_vm0, %v719_v56  }
  0xdf   :  { %1075 = vst.msk [vmem:[%s2267_s1 + $0x8e] ss:$16 sm:$0x30] %vm3_vm0, %v719_v56   ;;  %1076 = vst.msk [vmem:[%s2267_s1 + $0x8e] ss:$16 sm:$0xc0] %vm3_vm0, %v719_v56  }
  0xe0   :  { %1068 = vst.msk [vmem:[%s2267_s1 + $0xe] ss:$16 sm:$0x3] %vm3_vm0, %v706_v57   ;;  %1069 = vst.msk [vmem:[%s2267_s1 + $0xe] ss:$16 sm:$0xc] %vm3_vm0, %v706_v57  }
  0xe1   :  { %1070 = vst.msk [vmem:[%s2267_s1 + $0xe] ss:$16 sm:$0x30] %vm3_vm0, %v706_v57   ;;  %1071 = vst.msk [vmem:[%s2267_s1 + $0xe] ss:$16 sm:$0xc0] %vm3_vm0, %v706_v57   ;;  %v745_v58 = vpop.permute.xlu1 %744   ;;  %v732_v59 = vpop.permute.xlu0 %731  }
  0xe2   :  { %1083 = vst.msk [vmem:[%s2267_s1 + $0x18e] ss:$16 sm:$0x3] %vm3_vm0, %v745_v58   ;;  %1084 = vst.msk [vmem:[%s2267_s1 + $0x18e] ss:$16 sm:$0xc] %vm3_vm0, %v745_v58  }
  0xe3   :  { %1085 = vst.msk [vmem:[%s2267_s1 + $0x18e] ss:$16 sm:$0x30] %vm3_vm0, %v745_v58   ;;  %1086 = vst.msk [vmem:[%s2267_s1 + $0x18e] ss:$16 sm:$0xc0] %vm3_vm0, %v745_v58  }
  0xe4   :  { %1078 = vst.msk [vmem:[%s2267_s1 + $0x10e] ss:$16 sm:$0x3] %vm3_vm0, %v732_v59   ;;  %1079 = vst.msk [vmem:[%s2267_s1 + $0x10e] ss:$16 sm:$0xc] %vm3_vm0, %v732_v59  }
  0xe5   :  { %1080 = vst.msk [vmem:[%s2267_s1 + $0x10e] ss:$16 sm:$0x30] %vm3_vm0, %v732_v59   ;;  %1081 = vst.msk [vmem:[%s2267_s1 + $0x10e] ss:$16 sm:$0xc0] %vm3_vm0, %v732_v59   ;;  %v770_v60 = vpop.permute.xlu1 %769   ;;  %v757_v61 = vpop.permute.xlu0 %756  }
  0xe6   :  { %1092 = vst.msk [vmem:[%s2267_s1 + $0x8f] ss:$16 sm:$0x3] %vm3_vm0, %v770_v60   ;;  %1093 = vst.msk [vmem:[%s2267_s1 + $0x8f] ss:$16 sm:$0xc] %vm3_vm0, %v770_v60  }
  0xe7   :  { %1094 = vst.msk [vmem:[%s2267_s1 + $0x8f] ss:$16 sm:$0x30] %vm3_vm0, %v770_v60   ;;  %1095 = vst.msk [vmem:[%s2267_s1 + $0x8f] ss:$16 sm:$0xc0] %vm3_vm0, %v770_v60  }
  0xe8   :  { %1087 = vst.msk [vmem:[%s2267_s1 + $0xf] ss:$16 sm:$0x3] %vm3_vm0, %v757_v61   ;;  %1088 = vst.msk [vmem:[%s2267_s1 + $0xf] ss:$16 sm:$0xc] %vm3_vm0, %v757_v61  }
  0xe9   :  { %1089 = vst.msk [vmem:[%s2267_s1 + $0xf] ss:$16 sm:$0x30] %vm3_vm0, %v757_v61   ;;  %1090 = vst.msk [vmem:[%s2267_s1 + $0xf] ss:$16 sm:$0xc0] %vm3_vm0, %v757_v61   ;;  %v796_v62 = vpop.permute.xlu1 %795   ;;  %v783_v63 = vpop.permute.xlu0 %782  }
  0xea   :  { %1102 = vst.msk [vmem:[%s2267_s1 + $0x18f] ss:$16 sm:$0x3] %vm3_vm0, %v796_v62   ;;  %1103 = vst.msk [vmem:[%s2267_s1 + $0x18f] ss:$16 sm:$0xc] %vm3_vm0, %v796_v62  }
  0xeb   :  { %1104 = vst.msk [vmem:[%s2267_s1 + $0x18f] ss:$16 sm:$0x30] %vm3_vm0, %v796_v62   ;;  %1105 = vst.msk [vmem:[%s2267_s1 + $0x18f] ss:$16 sm:$0xc0] %vm3_vm0, %v796_v62  }
  0xec   :  { %1097 = vst.msk [vmem:[%s2267_s1 + $0x10f] ss:$16 sm:$0x3] %vm3_vm0, %v783_v63   ;;  %1098 = vst.msk [vmem:[%s2267_s1 + $0x10f] ss:$16 sm:$0xc] %vm3_vm0, %v783_v63  }
  0xed   :  { %1099 = vst.msk [vmem:[%s2267_s1 + $0x10f] ss:$16 sm:$0x30] %vm3_vm0, %v783_v63   ;;  %1100 = vst.msk [vmem:[%s2267_s1 + $0x10f] ss:$16 sm:$0xc0] %vm3_vm0, %v783_v63  }

// kernel: audio_encoder_forward.1
= control target key start
LH: loop header
LB: loop body
LE: loop exit
PB: predicated region body
PF: predicated region fallthrough
CT: control target
= control target key end

     0   :  { %13 = vsyncpa [#allocation3], 0  ;;  %s7011_s0 = inlined_call_operand.vmem [shape: f32[1024,64], index: 0, kind: input, shape index: {}]   ;;  %s7012_s1 = inlined_call_operand.vmem [shape: bf16[192,64], index: 1, kind: input, shape index: {}]   ;;  %s7013_s2 = inlined_call_operand.vmem [shape: f32[1,64], index: 2, kind: input, shape index: {}]   ;;  %s7014_s3 = inlined_call_operand.vmem [shape: bf16[192,128], index: 3, kind: input, shape index: {}]   ;;  %s7015_s4 = inlined_call_operand.vmem [shape: f32[1,128], index: 4, kind: input, shape index: {}]   ;;  %s7016_s5 = inlined_call_operand.vmem [shape: f32[512,1], index: 5, kind: input, shape index: {}]   ;;  %s7017_s6 = inlined_call_operand.vmem [shape: bf16[128,128], index: 6, kind: input, shape index: {}]   ;;  %s7018_s7 = inlined_call_operand.vmem [shape: f32[1,128], index: 7, kind: input, shape index: {}]   ;;  %s7019_s8 = inlined_call_operand.hbm [shape: f32[64,128], index: 8, kind: output, shape index: {}]  }
   0x1   :  { %15 = vsyncpa [#allocation3 + $0x1], 0  ;;  %s4622_s27 = smov 0   ;;  %s4624_s28 = smov 0  }
   0x2   :  { %s4626_s29 = smov 0   ;;  %s4628_s30 = smov 0  }
   0x3 LB: > { %s4643_s9 = sadd.s32 4294967295, %s4570_s30   ;;  %s3965_s10 = sadd.s32 4294967294, %s4570_s30   ;;  %s4570_s30 = sphi %s4628_s30, %s7112_s30   ;;  %s4566_s29 = sphi %s4626_s29, %s7111_s29   ;;  %s4562_s28 = sphi %s4624_s28, %s7110_s28   ;;  %s4558_s27 = sphi %s4622_s27, %s7109_s27  }
   0x4   : > { %s4647_s11 = sadd.s32 1, %s4570_s30   ;;  %s201_s12 = sadd.s32 1, %s4566_s29 }
   0x5   : > { %s198_s13 = ssub.s32 %s4570_s30, %s4647_s11  ;;  %p211_p0 = scmp.ne.s32.totalorder %s4566_s29, %s4562_s28 }
   0x6   : > { %p199_p1 = scmp.eq.s32.totalorder %s198_s13, 0  ;;  %p212_p2 = scmp.eq.s32.totalorder %s4643_s9, 1 }
   0x7   : > { %p217_p3 = scmp.ne.s32.totalorder %s4562_s28, %s4558_s27  ;;  %p218_p4 = scmp.eq.s32.totalorder %s3965_s10, 1 }
   0x8   : > { %s4658_s14 = scalar_select %p199_p1, %s4566_s29, %s201_s12  }
   0x9   : > { %p4660_p5 = por %p212_p2, %p211_p0  ;;  %p4664_p6 = por %p218_p4, %p217_p3 }
   0xa   : > { %p3968_p7 = scmp.ge.s32.totalorder %s4570_s30, 1  ;;  %p266_p8 = scmp.lt.s32.totalorder %s4570_s30, 3 }
   0xc   : > { %p267_p9 = pnand %p3968_p7, %p266_p8 }
   0xe   : > { %270 = sbr.rel (%p267_p9) target bundleno = 1233 (0x4d1), region = 52 }
  0x15   : > { %s3970_s17 = sshll.u32 %s4643_s9, 6  ;;  %v436_v0 = vlaneseq  ;;  %v4472_v1 = vld [vmem:[%s7012_s1] sm:$0xff]   ;;  %v7025_v2 = vmov 0   ;;  %v4473_v3 = vld [vmem:[%s7012_s1 + $0x8] sm:$0xff]   ;;  %v4474_v5 = vld [vmem:[%s7012_s1 + $0x10] sm:$0xff]   ;;  %vm888_vm2 = vcmask 523264  }
  0x16   : > { %p301_p10 = scmp.lt.s32.totalorder %s3970_s17, 127  ;;  %1216 = vmatprep.subr.bf16.mxu0 %v7025_v2  ;;  %2601 = vmatprep.subr.bf16.mxu1 %v7025_v2  ;;  %v4475_v20 = vld [vmem:[%s7012_s1 + $0x18] sm:$0xff]   ;;  %v4476_v49 = vld [vmem:[%s7012_s1 + $0x20] sm:$0xff]   ;;  %vm3745_vm4 = vcmask 1041409   ;;  %vm3747_vm5 = vcmask 1042434   ;;  %vm3749_vm6 = vcmask 1043459  }
  0x17   : > { %1217 = vmatpush1.bf16.msra.mxu0 %v4472_v1  ;;  %4471 = vset.pattern.permute.xlu1 %v7025_v2  ;;  %v4680_v4 = vshrl.u32 %v436_v0, 7  ;;  %vm3751_vm7 = vcmask 1044484   ;;  %vm3753_vm8 = vcmask 1045509   ;;  %vm3755_vm9 = vcmask 1046534   ;;  %s4574_s20 = smov [#allocation2]  }
  0x18   : > { %s7114_s17 = smov (!%p301_p10, %s3970_s17), 127  ;;  %1218 = vmatprep.subr.bf16.mxu0 %v7025_v2  ;;  %4470 = vset.pattern.permute.xlu0 %v7025_v2  ;;  %vm3757_vm10 = vcmask 1047559   ;;  %s4512_s21 = sshll.u32 %s4574_s20, 4  ;;  %s4513_s21 = int_to_ptr.vmem [resolvable:$false] %s4512_s21 }
  0x19   : > { %s3971_s22 = sshll.u32 %s7114_s17, 3  ;;  %vm438_vm0 = vcmp.lt.s32.totalorder %v4680_v4, 7  ;;  %s4573_s17 = smov 64   ;;  %vm567_vm1 = vcmp.lt.s32.totalorder %v4680_v4, 6  ;;  %vm1953_vm3 = vcmp.lt.s32.totalorder %v4680_v4, 4 }
  0x1a   : > { %s4690_s10 = scalar_lea.vmem %s7011_s0, %s3971_s22  ;;  %s297_s22 = sand.u32 1, %s4562_s28  }
  0x1b   : > { %1219 = vmatpush1.bf16.msra.mxu0 %v4473_v3  ;;  %v4693_v6 = vld [vmem:[%s4690_s10] sm:$0xff]  ;;  %v4696_v7 = vld [vmem:[%s4690_s10 + $0x8] sm:$0xff]  ;;  %v4699_v8 = vld [vmem:[%s4690_s10 + $0x10] sm:$0xff] }
  0x1c   : > { %1220 = vmatprep.subr.bf16.mxu0 %v7025_v2  ;;  %v7021_v9 = vrot.slane %v4693_v6, 1  ;;  %v373_v10 = vrot.slane %v4696_v7, 1  ;;  %v374_v11 = vrot.slane %v4699_v8, 1  ;;  %v4707_v12 = vld [vmem:[%s4690_s10 + $0x18] sm:$0xff]  ;;  %v4710_v13 = vld [vmem:[%s4690_s10 + $0x20] sm:$0xff]  ;;  %v4713_v14 = vld [vmem:[%s4690_s10 + $0x28] sm:$0xff] }
  0x1d   : > { %v375_v15 = vrot.slane %v4707_v12, 1  ;;  %v376_v16 = vrot.slane %v4710_v13, 1  ;;  %v4718_v17 = vld [vmem:[%s4690_s10 + $0x30] sm:$0xff]  ;;  %v377_v18 = vrot.slane %v4713_v14, 1  ;;  %v4722_v19 = vld [vmem:[%s4690_s10 + $0x38] sm:$0xff]  ;;  %v4735_v24 = vld [vmem:[%s4690_s10 + $0x40] sm:$0xff] }
  0x1e   : > { %v500_v21 = vsel %vm438_vm0, %v373_v10, %v374_v11  ;;  %v501_v22 = vsel %vm438_vm0, %v7021_v9, %v373_v10  ;;  %v378_v23 = vrot.slane %v4718_v17, 1  ;;  %v4738_v25 = vld [vmem:[%s4690_s10 + $0x48] sm:$0xff]  ;;  %v4741_v26 = vld [vmem:[%s4690_s10 + $0x50] sm:$0xff]  ;;  %v4750_v31 = vld [vmem:[%s4690_s10 + $0x58] sm:$0xff]  ;;  %v379_v36 = vrot.slane %v4722_v19, 1 }
  0x1f   : > { %1221 = vmatpush1.bf16.msra.mxu0 %v4474_v5  ;;  %v4150_v27 = vpack.i.bf16 %v500_v21, %v501_v22  ;;  %v498_v28 = vsel %vm438_vm0, %v375_v15, %v376_v16  ;;  %v499_v29 = vsel %vm438_vm0, %v374_v11, %v375_v15  ;;  %v497_v30 = vsel %vm438_vm0, %v376_v16, %v377_v18  ;;  %v4753_v32 = vld [vmem:[%s4690_s10 + $0x60] sm:$0xff]  ;;  %v4756_v33 = vld [vmem:[%s4690_s10 + $0x68] sm:$0xff]  ;;  %v4768_v42 = vld [vmem:[%s4690_s10 + $0x70] sm:$0xff] }
  0x20   : > { %1222 = vmatprep.subr.bf16.mxu0 %v7025_v2  ;;  %v4155_v34 = vpack.i.bf16 %v498_v28, %v499_v29  ;;  %v496_v35 = vsel %vm438_vm0, %v377_v18, %v378_v23  ;;  %v380_v37 = vrot.slane %v4735_v24, 1  ;;  %v381_v39 = vrot.slane %v4738_v25, 1  ;;  %v4777_v47 = vld [vmem:[%s4690_s10 + $0x78] sm:$0xff]  ;;  %v4780_v48 = vld [vmem:[%s4690_s10 + $0x80] sm:$0xff]  ;;  %v4791_v53 = vld [vmem:[%s4690_s10 + $0x88] sm:$0xff] }
  0x21   : > { %4151 = vrot.lane.b32.xlu0 %v4150_v27, %s4573_s17  ;;  %v4160_v38 = vpack.i.bf16 %v496_v35, %v497_v30  ;;  %v382_v40 = vrot.slane %v4741_v26, 1  ;;  %v383_v41 = vrot.slane %v4750_v31, 1  ;;  %v495_v44 = vsel %vm438_vm0, %v378_v23, %v379_v36  ;;  %v4794_v54 = vld [vmem:[%s4690_s10 + $0x90] sm:$0xff]  ;;  %v4806_v61 = vld [vmem:[%s4690_s10 + $0x98] sm:$0xff]  ;;  %v4809_v62 = vld [vmem:[%s4690_s10 + $0xa0] sm:$0xff] }
  0x22   : > { %v494_v43 = vsel %vm438_vm0, %v379_v36, %v380_v37  ;;  %v384_v45 = vrot.slane %v4753_v32, 1  ;;  %v385_v46 = vrot.slane %v4756_v33, 1  ;;  %v493_v52 = vsel %vm438_vm0, %v380_v37, %v381_v39  ;;  %v4818_v5 = vld [vmem:[%s4690_s10 + $0xa8] sm:$0xff]  ;;  %v4821_v10 = vld [vmem:[%s4690_s10 + $0xb0] sm:$0xff]  ;;  %v4834_v22 = vld [vmem:[%s4690_s10 + $0xb8] sm:$0xff] }
  0x23   : > { %1223 = vmatpush1.bf16.msra.mxu0 %v4475_v20  ;;  %4161 = vrot.lane.b32.xlu1 %v4160_v38, %s4573_s17  ;;  %v4165_v50 = vpack.i.bf16 %v494_v43, %v495_v44  ;;  %v492_v51 = vsel %vm438_vm0, %v381_v39, %v382_v40  ;;  %v491_v56 = vsel %vm438_vm0, %v382_v40, %v383_v41  ;;  %v386_v57 = vrot.slane %v4768_v42, 1  ;;  %v4477_v11 = vld [vmem:[%s7012_s1 + $0x28] sm:$0xff]   ;;  %v4839_v27 = vld [vmem:[%s4690_s10 + $0xc0] sm:$0xff]  ;;  %v4851_v36 = vld [vmem:[%s4690_s10 + $0xd0] sm:$0xff] }
  0x24   : > { %v490_v55 = vsel %vm438_vm0, %v383_v41, %v384_v45  ;;  %1224 = vmatprep.subr.bf16.mxu0 %v7025_v2  ;;  %v4170_v58 = vpack.i.bf16 %v492_v51, %v493_v52  ;;  %v387_v59 = vrot.slane %v4777_v47, 1  ;;  %v388_v60 = vrot.slane %v4780_v48, 1  ;;  %v4842_v28 = vld [vmem:[%s4690_s10 + $0xc8] sm:$0xff]  ;;  %v4478_v37 = vld [vmem:[%s7012_s1 + $0x30] sm:$0xff]   ;;  %v4859_v39 = vld [vmem:[%s4690_s10 + $0xd8] sm:$0xff] }
  0x25   : > { %4156 = vrot.lane.b32.xlu0 %v4155_v34, %s4573_s17  ;;  %v488_v63 = vsel %vm438_vm0, %v385_v46, %v386_v57  ;;  %v489_v0 = vsel %vm438_vm0, %v384_v45, %v385_v46  ;;  %v389_v1 = vrot.slane %v4791_v53, 1  ;;  %v390_v3 = vrot.slane %v4794_v54, 1 }
  0x26   : > { %v4175_v15 = vpack.i.bf16 %v490_v55, %v491_v56  ;;  %v486_v16 = vsel %vm438_vm0, %v387_v59, %v388_v60  ;;  %v487_v18 = vsel %vm438_vm0, %v386_v57, %v387_v59  ;;  %v391_v20 = vrot.slane %v4806_v61, 1  ;;  %v4479_v55 = vld [vmem:[%s7012_s1 + $0x38] sm:$0xff]   ;;  %v4882_v57 = vld [vmem:[%s4690_s10 + $0xe8] sm:$0xff] }
  0x27   : > { %1225 = vmatpush1.bf16.msra.mxu0 %v4476_v49  ;;  %4166 = vrot.lane.b32.xlu1 %v4165_v50, %s4573_s17  ;;  %v392_v21 = vrot.slane %v4809_v62, 1  ;;  %v4180_v23 = vpack.i.bf16 %v488_v63, %v489_v0  ;;  %v484_v29 = vsel %vm438_vm0, %v389_v1, %v390_v3  ;;  %v485_v30 = vsel %vm438_vm0, %v388_v60, %v389_v1  ;;  %v4871_v50 = vld [vmem:[%s4690_s10 + $0xe0] sm:$0xff]  ;;  %v4894_v1 = vld [vmem:[%s4690_s10 + $0xf8] sm:$0xff] }
  0x28   : > { %1226 = vmatprep.subr.bf16.mxu0 %v7025_v2  ;;  %v393_v34 = vrot.slane %v4818_v5, 1  ;;  %v394_v35 = vrot.slane %v4821_v10, 1  ;;  %v4185_v38 = vpack.i.bf16 %v486_v16, %v487_v18  ;;  %v483_v41 = vsel %vm438_vm0, %v390_v3, %v391_v20  ;;  %v4480_v16 = vld [vmem:[%s7012_s1 + $0x40] sm:$0xff]  }
  0x29   : > { %4171 = vrot.lane.b32.xlu0 %v4170_v58, %s4573_s17  ;;  %v482_v40 = vsel %vm438_vm0, %v391_v20, %v392_v21  ;;  %v395_v43 = vrot.slane %v4834_v22, 1  ;;  %v396_v44 = vrot.slane %v4839_v27, 1  ;;  %v4190_v45 = vpack.i.bf16 %v484_v29, %v485_v30  ;;  %v4885_v58 = vld [vmem:[%s4690_s10 + $0xf0] sm:$0xff]  ;;  %v4905_v18 = vld [vmem:[%s4690_s10 + $0x100] sm:$0xff]  ;;  %v4919_v30 = vld [vmem:[%s4690_s10 + $0x108] sm:$0xff] }
  0x2a   : > { %v397_v46 = vrot.slane %v4842_v28, 1  ;;  %v398_v49 = vrot.slane %v4851_v36, 1  ;;  %v480_v51 = vsel %vm438_vm0, %v393_v34, %v394_v35  ;;  %v481_v52 = vsel %vm438_vm0, %v392_v21, %v393_v34 }
  0x2b   : > { %1227 = vmatpush1.bf16.msra.mxu0 %v4477_v11  ;;  %4176 = vrot.lane.b32.xlu1 %v4175_v15, %s4573_s17  ;;  %v399_v56 = vrot.slane %v4859_v39, 1  ;;  %v4195_v59 = vpack.i.bf16 %v482_v40, %v483_v41  ;;  %v7020_v60 = vrot.slane %v4693_v6, 2  ;;  %v504_v63 = vrot.slane %v4696_v7, 2  ;;  %v4926_v40 = vld [vmem:[%s4690_s10 + $0x110] sm:$0xff]  ;;  %v4929_v41 = vld [vmem:[%s4690_s10 + $0x118] sm:$0xff] }
  0x2c   : > { %1228 = vmatprep.subr.bf16.mxu0 %v7025_v2  ;;  %v7022_v0 = vrot.slane %v4699_v8, 2  ;;  %v478_v3 = vsel %vm438_vm0, %v395_v43, %v396_v44  ;;  %v479_v11 = vsel %vm438_vm0, %v394_v35, %v395_v43  ;;  %v400_v15 = vrot.slane %v4871_v50, 1 }
  0x2d   : > { %4181 = vrot.lane.b32.xlu0 %v4180_v23, %s4573_s17  ;;  %v4200_v20 = vpack.i.bf16 %v480_v51, %v481_v52  ;;  %v476_v21 = vsel %vm438_vm0, %v397_v46, %v398_v49  ;;  %v630_v29 = vsel %vm567_vm1, %v7020_v60, %v504_v63  ;;  %v477_v34 = vsel %vm438_vm0, %v396_v44, %v397_v46  ;;  %v4481_v51 = vld [vmem:[%s7012_s1 + $0x48] sm:$0xff]  }
  0x2e   : > { %v629_v23 = vsel %vm567_vm1, %v504_v63, %v7022_v0  ;;  %v401_v35 = vrot.slane %v4882_v57, 1  ;;  %v4205_v43 = vpack.i.bf16 %v478_v3, %v479_v11  ;;  %v474_v44 = vsel %vm438_vm0, %v399_v56, %v400_v15  ;;  %v4984_v0 = vld [vmem:[%s4690_s10 + $0x148] sm:$0xff] }
  0x2f   : > { %1229 = vmatpush1.bf16.msra.mxu0 %v4478_v37  ;;  %4186 = vrot.lane.b32.xlu1 %v4185_v38, %s4573_s17  ;;  %v402_v37 = vrot.slane %v4885_v58, 1  ;;  %v954_v38 = vpack.c.bf16 %v629_v23, %v630_v29  ;;  %v475_v46 = vsel %vm438_vm0, %v398_v49, %v399_v56  ;;  %v403_v52 = vrot.slane %v4894_v1, 1  ;;  %v4961_v23 = vld [vmem:[%s4690_s10 + $0x130] sm:$0xff] }
  0x30   : > { %1230 = vmatprep.subr.bf16.mxu0 %v7025_v2  ;;  %v473_v56 = vsel %vm438_vm0, %v400_v15, %v401_v35  ;;  %v405_v63 = vrot.slane %v4919_v30, 1  ;;  %v406_v3 = vrot.slane %v4926_v40, 1  ;;  %v4215_v11 = vpack.i.bf16 %v474_v44, %v475_v46  ;;  %v4482_v15 = vld [vmem:[%s7012_s1 + $0x50] sm:$0xff]  }
  0x31   : > { %4191 = vrot.lane.b32.xlu0 %v4190_v45, %s4573_s17  ;;  %v4934_v45 = vld [vmem:[%s4690_s10 + $0x120] sm:$0xff]  ;;  %3985 = vmatprep.mubr.msk.bf16.mxu0 %vm888_vm2, %v954_v38  ;;  %v472_v49 = vsel %vm438_vm0, %v401_v35, %v402_v37  ;;  %v4971_v35 = vld [vmem:[%s4690_s10 + $0x138] sm:$0xff]  ;;  %v410_v9 = vrot.slane %v4961_v23, 1 }
  0x32   : > { %v4220_v38 = vpack.i.bf16 %v472_v49, %v473_v56  ;;  %v468_v44 = vsel %vm438_vm0, %v405_v63, %v406_v3  ;;  %v411_v49 = vrot.slane %v4971_v35, 1 }
  0x33   : > { %1231 = vmatpush1.bf16.msra.mxu0 %v4479_v55  ;;  %4196 = vrot.lane.b32.xlu1 %v4195_v59, %s4573_s17  ;;  %v404_v55 = vrot.slane %v4905_v18, 1  ;;  %v4210_v59 = vpack.i.bf16 %v476_v21, %v477_v34  ;;  %v4958_v21 = vld [vmem:[%s4690_s10 + $0x128] sm:$0xff]  ;;  %v471_v34 = vsel %vm438_vm0, %v402_v37, %v403_v52  ;;  %v4987_v37 = vld [vmem:[%s4690_s10 + $0x150] sm:$0xff] }
  0x34   : > { %1232 = vmatprep.subr.bf16.mxu0 %v7025_v2  ;;  %v409_v60 = vrot.slane %v4958_v21, 1  ;;  %7065 = vst [vmem:[#allocation5_spill] sm:$0xff] %v4987_v37 }
  0x35   : > { %4201 = vrot.lane.b32.xlu0 %v4200_v20, %s4573_s17  ;;  %v407_v20 = vrot.slane %v4929_v41, 1  ;;  %v470_v29 = vsel %vm438_vm0, %v403_v52, %v404_v55  ;;  %v469_v46 = vsel %vm438_vm0, %v404_v55, %v405_v63  ;;  %v4483_v55 = vld [vmem:[%s7012_s1 + $0x58] sm:$0xff]   ;;  %v413_v63 = vrot.slane %v4984_v0, 1 }
  0x36   : > { %v4225_v52 = vpack.i.bf16 %v470_v29, %v471_v34  ;;  %v4230_v29 = vpack.i.bf16 %v468_v44, %v469_v46  ;;  %v5022_v46 = vld [vmem:[%s4690_s10 + $0x160] sm:$0xff] }
  0x37   : > { %1233 = vmatpush1.bf16.msra.mxu0 %v4480_v16  ;;  %4206 = vrot.lane.b32.xlu1 %v4205_v43, %s4573_s17  ;;  %v408_v16 = vrot.slane %v4934_v45, 1  ;;  %v4975_v43 = vld [vmem:[%s4690_s10 + $0x140] sm:$0xff] }
  0x38   : > { %1234 = vmatprep.subr.bf16.mxu0 %v7025_v2  ;;  %v412_v56 = vrot.slane %v4975_v43, 1 }
  0x39   : > { %4211 = vrot.lane.b32.xlu0 %v4210_v59, %s4573_s17  ;;  %v467_v59 = vsel %vm438_vm0, %v406_v3, %v407_v20  ;;  %v464_v3 = vsel %vm438_vm0, %v409_v60, %v410_v9 }
  0x3b   : > { %1235 = vmatpush1.bf16.msra.mxu0 %v4481_v51  ;;  %4216 = vrot.lane.b32.xlu1 %v4215_v11, %s4573_s17  ;;  %v466_v51 = vsel %vm438_vm0, %v407_v20, %v408_v16  ;;  %v414_v11 = vrot.slane %v4987_v37, 1  ;;  %v465_v20 = vsel %vm438_vm0, %v408_v16, %v409_v60  ;;  %v462_v37 = vsel %vm438_vm0, %v411_v49, %v412_v56  ;;  %v5019_v16 = vld [vmem:[%s4690_s10 + $0x158] sm:$0xff] }
  0x3c   : > { %1236 = vmatprep.subr.bf16.mxu0 %v7025_v2  ;;  %v4235_v34 = vpack.i.bf16 %v466_v51, %v467_v59  ;;  %v461_v60 = vsel %vm438_vm0, %v412_v56, %v413_v63  ;;  %v416_v51 = vrot.slane %v5022_v46, 1 }
  0x3d   : > { %4221 = vrot.lane.b32.xlu0 %v4220_v38, %s4573_s17  ;;  %v463_v38 = vsel %vm438_vm0, %v410_v9, %v411_v49  ;;  %v460_v44 = vsel %vm438_vm0, %v413_v63, %v414_v11  ;;  %v415_v9 = vrot.slane %v5019_v16, 1  ;;  %v5038_v63 = vld [vmem:[%s4690_s10 + $0x170] sm:$0xff] }
  0x3e   : > { %v4250_v59 = vpack.i.bf16 %v460_v44, %v461_v60  ;;  %7067 = vst [vmem:[#allocation7_spill] sm:$0xff] %v5038_v63 }
  0x3f   : > { %1237 = vmatpush1.bf16.msra.mxu0 %v4482_v15  ;;  %4226 = vrot.lane.b32.xlu1 %v4225_v52, %s4573_s17  ;;  %v4240_v15 = vpack.i.bf16 %v464_v3, %v465_v20  ;;  %v4245_v52 = vpack.i.bf16 %v462_v37, %v463_v38  ;;  %v459_v49 = vsel %vm438_vm0, %v414_v11, %v415_v9  ;;  %v5035_v37 = vld [vmem:[%s4690_s10 + $0x168] sm:$0xff]  ;;  %v418_v3 = vrot.slane %v5038_v63, 1  ;;  %v5049_v38 = vld [vmem:[%s4690_s10 + $0x178] sm:$0xff] }
  0x40   : > { %1238 = vmatprep.subr.bf16.mxu0 %v7025_v2  ;;  %7066 = vst [vmem:[#allocation6_spill] sm:$0xff] %v5035_v37  ;;  %7068 = vst [vmem:[#allocation8_spill] sm:$0xff] %v5049_v38  ;;  %v419_v44 = vrot.slane %v5049_v38, 1 }
  0x41   : > { %4231 = vrot.lane.b32.xlu0 %v4230_v29, %s4573_s17  ;;  %v417_v29 = vrot.slane %v5035_v37, 1 }
  0x43   : > { %1239 = vmatpush1.bf16.msra.mxu0 %v4483_v55  ;;  %4236 = vrot.lane.b32.xlu1 %v4235_v34, %s4573_s17  ;;  %v458_v55 = vsel %vm438_vm0, %v415_v9, %v416_v51  ;;  %v456_v11 = vsel %vm438_vm0, %v417_v29, %v418_v3  ;;  %v457_v20 = vsel %vm438_vm0, %v416_v51, %v417_v29 }
  0x44   : > { %v4255_v56 = vpack.i.bf16 %v458_v55, %v459_v49  ;;  %v4260_v34 = vpack.i.bf16 %v456_v11, %v457_v20  ;;  %v455_v9 = vsel %vm438_vm0, %v418_v3, %v419_v44  ;;  %v5065_v55 = vld [vmem:[%s4690_s10 + $0x190] sm:$0xff]  ;;  %v5075_v20 = vld [vmem:[%s4690_s10 + $0x198] sm:$0xff] }
  0x45   : > { %4241 = vrot.lane.b32.xlu0 %v4240_v15, %s4573_s17  ;;  %v5052_v15 = vld [vmem:[%s4690_s10 + $0x180] sm:$0xff]  ;;  %7071 = vst [vmem:[#allocation11_spill] sm:$0xff] %v5065_v55  ;;  %7072 = vst [vmem:[#allocation12_spill] sm:$0xff] %v5075_v20 }
  0x46   : > { %7069 = vst [vmem:[#allocation9_spill] sm:$0xff] %v5052_v15  ;;  %v420_v60 = vrot.slane %v5052_v15, 1 }
  0x47   : > { %4246 = vrot.lane.b32.xlu1 %v4245_v52, %s4573_s17 }
  0x48   : > { %v454_v52 = vsel %vm438_vm0, %v419_v44, %v420_v60  ;;  %v423_v44 = vrot.slane %v5075_v20, 1 }
  0x49   : > { %4251 = vrot.lane.b32.xlu0 %v4250_v59, %s4573_s17  ;;  %v4265_v51 = vpack.i.bf16 %v454_v52, %v455_v9  ;;  %v5062_v59 = vld [vmem:[%s4690_s10 + $0x188] sm:$0xff] }
  0x4a   : > { %7070 = vst [vmem:[#allocation10_spill] sm:$0xff] %v5062_v59  ;;  %v421_v49 = vrot.slane %v5062_v59, 1 }
  0x4b   : > { %4256 = vrot.lane.b32.xlu1 %v4255_v56, %s4573_s17  ;;  %v422_v56 = vrot.slane %v5065_v55, 1 }
  0x4c   : > { %v453_v11 = vsel %vm438_vm0, %v420_v60, %v421_v49 }
  0x4d   : > { %4261 = vrot.lane.b32.xlu0 %v4260_v34, %s4573_s17  ;;  %v452_v29 = vsel %vm438_vm0, %v421_v49, %v422_v56  ;;  %v5078_v34 = vld [vmem:[%s4690_s10 + $0x1a0] sm:$0xff]  ;;  %v5088_v49 = vld [vmem:[%s4690_s10 + $0x1a8] sm:$0xff] }
  0x4e   : > { %v4270_v3 = vpack.i.bf16 %v452_v29, %v453_v11  ;;  %7073 = vst [vmem:[#allocation13_spill] sm:$0xff] %v5078_v34  ;;  %v424_v52 = vrot.slane %v5078_v34, 1  ;;  %7074 = vst [vmem:[#allocation14_spill] sm:$0xff] %v5088_v49  ;;  %v5091_v29 = vld [vmem:[%s4690_s10 + $0x1b0] sm:$0xff]  ;;  %v425_v11 = vrot.slane %v5088_v49, 1 }
  0x4f   : > { %4266 = vrot.lane.b32.xlu1 %v4265_v51, %s4573_s17  ;;  %v451_v51 = vsel %vm438_vm0, %v422_v56, %v423_v44  ;;  %7075 = vst [vmem:[#allocation15_spill] sm:$0xff] %v5091_v29 }
  0x50   : > { %v450_v9 = vsel %vm438_vm0, %v423_v44, %v424_v52  ;;  %v449_v34 = vsel %vm438_vm0, %v424_v52, %v425_v11  ;;  %v5101_v44 = vld [vmem:[%s4690_s10 + $0x1b8] sm:$0xff] }
  0x51   : > { %4271 = vrot.lane.b32.xlu0 %v4270_v3, %s4573_s17  ;;  %v4275_v60 = vpack.i.bf16 %v450_v9, %v451_v51  ;;  %v426_v3 = vrot.slane %v5091_v29, 1  ;;  %7076 = vst [vmem:[#allocation16_spill] sm:$0xff] %v5101_v44  ;;  %v5104_v9 = vld [vmem:[%s4690_s10 + $0x1c0] sm:$0xff]  ;;  %v427_v51 = vrot.slane %v5101_v44, 1 }
  0x52   : > { %7077 = vst [vmem:[#allocation17_spill] sm:$0xff] %v5104_v9 }
  0x53   : > { %4276 = vrot.lane.b32.xlu1 %v4275_v60, %s4573_s17  ;;  %v448_v2 = vsel %vm438_vm0, %v425_v11, %v426_v3  ;;  %v428_v60 = vrot.slane %v5104_v9, 1  ;;  %v447_v49 = vsel %vm438_vm0, %v426_v3, %v427_v51 }
  0x54   : > { %v4280_v56 = vpack.i.bf16 %v448_v2, %v449_v34  ;;  %v5114_v2 = vld [vmem:[%s4690_s10 + $0x1c8] sm:$0xff]  ;;  %v5117_v34 = vld [vmem:[%s4690_s10 + $0x1d0] sm:$0xff] }
  0x55   : > { %v446_v29 = vsel %vm438_vm0, %v427_v51, %v428_v60  ;;  %7078 = vst [vmem:[#allocation18_spill] sm:$0xff] %v5114_v2  ;;  %7079 = vst [vmem:[#allocation19_spill] sm:$0xff] %v5117_v34  ;;  %v429_v11 = vrot.slane %v5114_v2, 1 }
  0x56   : > { %4281 = vrot.lane.b32.xlu0 %v4280_v56, %s4573_s17  ;;  %v4285_v52 = vpack.i.bf16 %v446_v29, %v447_v49  ;;  %v430_v56 = vrot.slane %v5117_v34, 1  ;;  %v5127_v49 = vld [vmem:[%s4690_s10 + $0x1d8] sm:$0xff]  ;;  %v5130_v29 = vld [vmem:[%s4690_s10 + $0x1e0] sm:$0xff] }
  0x57   : > { %v445_v44 = vsel %vm438_vm0, %v428_v60, %v429_v11  ;;  %7080 = vst [vmem:[#allocation20_spill] sm:$0xff] %v5127_v49  ;;  %7081 = vst [vmem:[#allocation21_spill] sm:$0xff] %v5130_v29  ;;  %v431_v51 = vrot.slane %v5127_v49, 1 }
  0x58   : > { %4286 = vrot.lane.b32.xlu1 %v4285_v52, %s4573_s17  ;;  %v444_v9 = vsel %vm438_vm0, %v429_v11, %v430_v56  ;;  %v432_v52 = vrot.slane %v5130_v29, 1 }
  0x59   : > { %v4290_v3 = vpack.i.bf16 %v444_v9, %v445_v44  ;;  %v443_v2 = vsel %vm438_vm0, %v430_v56, %v431_v51  ;;  %v5140_v44 = vld [vmem:[%s4690_s10 + $0x1e8] sm:$0xff]  ;;  %v5143_v9 = vld [vmem:[%s4690_s10 + $0x1f0] sm:$0xff]  ;;  %v506_v56 = vrot.slane %v4707_v12, 2 }
  0x5a   : > { %v442_v34 = vsel %vm438_vm0, %v431_v51, %v432_v52  ;;  %7082 = vst [vmem:[#allocation22_spill] sm:$0xff] %v5140_v44  ;;  %7083 = vst [vmem:[#allocation23_spill] sm:$0xff] %v5143_v9  ;;  %v433_v60 = vrot.slane %v5140_v44, 1  ;;  %v434_v11 = vrot.slane %v5143_v9, 1  ;;  %v7085_v9 = vrot.slane %v4699_v8, 2 }
  0x5b   : > { %4291 = vrot.lane.b32.xlu0 %v4290_v3, %s4573_s17  ;;  %v4295_v20 = vpack.i.bf16 %v442_v34, %v443_v2  ;;  %v507_v2 = vrot.slane %v4710_v13, 2 }
  0x5c   : > { %v440_v3 = vsel %vm438_vm0, %v433_v60, %v434_v11  ;;  %v441_v29 = vsel %vm438_vm0, %v432_v52, %v433_v60  ;;  %v628_v44 = vsel %vm567_vm1, %v7085_v9, %v506_v56  ;;  %v508_v9 = vrot.slane %v4713_v14, 2 }
  0x5d   : > { %4296 = vrot.lane.b32.xlu1 %v4295_v20, %s4573_s17  ;;  %v4300_v49 = vpack.i.bf16 %v440_v3, %v441_v29  ;;  %v5155_v20 = vld [vmem:[%s4690_s10 + $0x1f8] sm:$0xff]  ;;  %v627_v51 = vsel %vm567_vm1, %v506_v56, %v507_v2  ;;  %v509_v56 = vrot.slane %v4718_v17, 2 }
  0x5e   : > { %7084 = vst [vmem:[#allocation24_spill] sm:$0xff] %v5155_v20  ;;  %v435_v52 = vrot.slane %v5155_v20, 1  ;;  %v956_v38 = vpack.c.bf16 %v627_v51, %v628_v44 }
  0x5f   : > { %4301 = vrot.lane.b32.xlu0 %v4300_v49, %s4573_s17  ;;  %v7086_v49 = vrot.slane %v4693_v6, 1  ;;  %v625_v51 = vsel %vm567_vm1, %v508_v9, %v509_v56 }
  0x60   : > { %v439_v3 = vsel %vm438_vm0, %v434_v11, %v435_v52 }
  0x61   : > { %v502_v55 = vsel %vm438_vm0, %v435_v52, %v7086_v49 }
  0x62   : > { %v4305_v63 = vpack.i.bf16 %v502_v55, %v439_v3 }
  0x64   : > { %4306 = vrot.lane.b32.xlu1 %v4305_v63, %s4573_s17  ;;  %v510_v63 = vrot.slane %v4722_v19, 2 }
  0x93   : > { %v4152_v34 = vpop.permute.xlu0 %4151 }
  0x94   : > { %v4154_v29 = vunpack.i.h.bf16 %v4152_v34  ;;  %v4153_v60 = vunpack.i.l.bf16 %v4152_v34 }
  0x95   : > { %v4162_v44 = vpop.permute.xlu1 %4161 }
  0x96   : > { %v889_v59 = vsel %vm888_vm2, %v4693_v6, %v4153_v60  ;;  %v890_v15 = vsel %vm888_vm2, %v4696_v7, %v4154_v29  ;;  %v4164_v55 = vunpack.i.h.bf16 %v4162_v44  ;;  %v624_v60 = vsel %vm567_vm1, %v509_v56, %v510_v63 }
  0x97   : > { %v953_v34 = vpack.c.bf16 %v890_v15, %v889_v59  ;;  %v4157_v20 = vpop.permute.xlu0 %4156  ;;  %v626_v15 = vsel %vm567_vm1, %v507_v2, %v508_v9 }
  0x98   : > { %v4159_v11 = vunpack.i.h.bf16 %v4157_v20  ;;  %v4158_v37 = vunpack.i.l.bf16 %v4157_v20  ;;  %v4163_v20 = vunpack.i.l.bf16 %v4162_v44  ;;  %v958_v29 = vpack.c.bf16 %v625_v51, %v626_v15 }
  0x99   : > { %1249 = vmatmul.mubr.bf16.vlgmr.msra.gmra.mrb[0].mxu0 %v953_v34 }
  0x9a   : > { %3986 = vmatprep.mubr.msk.bf16.mxu0 %vm888_vm2, %v956_v38  ;;  %v891_v52 = vsel %vm888_vm2, %v4699_v8, %v4158_v37  ;;  %v892_v7 = vsel %vm888_vm2, %v4707_v12, %v4159_v11  ;;  %v511_v38 = vrot.slane %v4735_v24, 2  ;;  %v893_v8 = vsel %vm888_vm2, %v4710_v13, %v4163_v20  ;;  %v4167_v37 = vpop.permute.xlu1 %4166 }
  0x9b   : > { %v955_v59 = vpack.c.bf16 %v892_v7, %v891_v52  ;;  %v894_v12 = vsel %vm888_vm2, %v4713_v14, %v4164_v55  ;;  %v4169_v49 = vunpack.i.h.bf16 %v4167_v37  ;;  %v4168_v9 = vunpack.i.l.bf16 %v4167_v37  ;;  %v4172_v7 = vpop.permute.xlu0 %4171 }
  0x9c   : > { %v623_v2 = vsel %vm567_vm1, %v510_v63, %v511_v38  ;;  %v957_v3 = vpack.c.bf16 %v894_v12, %v893_v8  ;;  %v512_v11 = vrot.slane %v4738_v25, 2  ;;  %v513_v52 = vrot.slane %v4741_v26, 2 }
  0x9d   : > { %v960_v34 = vpack.c.bf16 %v623_v2, %v624_v60  ;;  %v895_v13 = vsel %vm888_vm2, %v4718_v17, %v4168_v9  ;;  %v896_v14 = vsel %vm888_vm2, %v4722_v19, %v4169_v49  ;;  %v4174_v15 = vunpack.i.h.bf16 %v4172_v7 }
  0x9e   : > { %v621_v56 = vsel %vm567_vm1, %v512_v11, %v513_v52  ;;  %v622_v44 = vsel %vm567_vm1, %v511_v38, %v512_v11  ;;  %v959_v51 = vpack.c.bf16 %v896_v14, %v895_v13  ;;  %v514_v20 = vrot.slane %v4750_v31, 2  ;;  %v4177_v63 = vpop.permute.xlu1 %4176 }
  0x9f   : > { %v962_v55 = vpack.c.bf16 %v621_v56, %v622_v44  ;;  %v898_v19 = vsel %vm888_vm2, %v4738_v25, %v4174_v15  ;;  %v4179_v37 = vunpack.i.h.bf16 %v4177_v63  ;;  %v4178_v2 = vunpack.i.l.bf16 %v4177_v63  ;;  %v4182_v9 = vpop.permute.xlu0 %4181 }
  0xa0   : > { %v620_v8 = vsel %vm567_vm1, %v513_v52, %v514_v20  ;;  %v517_v49 = vrot.slane %v4768_v42, 2  ;;  %v4184_v13 = vunpack.i.h.bf16 %v4182_v9  ;;  %v4183_v14 = vunpack.i.l.bf16 %v4182_v9 }
  0xa1   : > { %1257 = vmatmul.mubr.bf16.gmra.mrb[4].mxu0 %v955_v59  ;;  %v4173_v59 = vunpack.i.l.bf16 %v4172_v7  ;;  %v900_v25 = vsel %vm888_vm2, %v4750_v31, %v4179_v37  ;;  %v518_v56 = vrot.slane %v4777_v47, 2  ;;  %v519_v44 = vrot.slane %v4780_v48, 2 }
  0xa2   : > { %3987 = vmatprep.mubr.msk.bf16.mxu0 %vm888_vm2, %v958_v29  ;;  %v515_v29 = vrot.slane %v4753_v32, 2  ;;  %v902_v31 = vsel %vm888_vm2, %v4756_v33, %v4184_v13  ;;  %v521_v63 = vrot.slane %v4794_v54, 2 }
  0xa3   : > { %v897_v17 = vsel %vm888_vm2, %v4735_v24, %v4173_v59  ;;  %v899_v24 = vsel %vm888_vm2, %v4741_v26, %v4178_v2  ;;  %v901_v26 = vsel %vm888_vm2, %v4753_v32, %v4183_v14  ;;  %v615_v15 = vsel %vm567_vm1, %v518_v56, %v519_v44 }
  0xa4   : > { %v619_v38 = vsel %vm567_vm1, %v514_v20, %v515_v29  ;;  %v961_v12 = vpack.c.bf16 %v898_v19, %v897_v17  ;;  %v963_v52 = vpack.c.bf16 %v900_v25, %v899_v24  ;;  %v616_v59 = vsel %vm567_vm1, %v517_v49, %v518_v56 }
  0xa5   : > { %v964_v60 = vpack.c.bf16 %v619_v38, %v620_v8  ;;  %v968_v17 = vpack.c.bf16 %v615_v15, %v616_v59  ;;  %v520_v19 = vrot.slane %v4791_v53, 2  ;;  %v4192_v38 = vpop.permute.xlu0 %4191  ;;  %v523_v24 = vrot.slane %v4809_v62, 2 }
  0xa6   : > { %v4194_v2 = vunpack.i.h.bf16 %v4192_v38  ;;  %v525_v56 = vrot.slane %v4821_v10, 2 }
  0xa7   : > { %v613_v8 = vsel %vm567_vm1, %v520_v19, %v521_v63 }
  0xa9   : > { %1265 = vmatmul.mubr.bf16.gmra.mrb[8].mxu0 %v957_v3  ;;  %v516_v3 = vrot.slane %v4756_v33, 2 }
  0xaa   : > { %3988 = vmatprep.mubr.msk.bf16.mxu0 %vm888_vm2, %v960_v34 }
  0xab   : > { %v617_v34 = vsel %vm567_vm1, %v516_v3, %v517_v49  ;;  %v618_v11 = vsel %vm567_vm1, %v515_v29, %v516_v3  ;;  %v522_v49 = vrot.slane %v4806_v61, 2 }
  0xac   : > { %v966_v7 = vpack.c.bf16 %v617_v34, %v618_v11 }
  0xad   : > { %v611_v9 = vsel %vm567_vm1, %v522_v49, %v523_v24  ;;  %v612_v34 = vsel %vm567_vm1, %v521_v63, %v522_v49 }
  0xae   : > { %v972_v14 = vpack.c.bf16 %v611_v9, %v612_v34  ;;  %v531_v9 = vrot.slane %v4871_v50, 2 }
  0xb1   : > { %1273 = vmatmul.mubr.bf16.gmra.mrb[12].mxu0 %v959_v51  ;;  %v4187_v51 = vpop.permute.xlu1 %4186 }
  0xb2   : > { %3989 = vmatprep.mubr.msk.bf16.mxu0 %vm888_vm2, %v962_v55  ;;  %v965_v55 = vpack.c.bf16 %v902_v31, %v901_v26  ;;  %v4189_v20 = vunpack.i.h.bf16 %v4187_v51  ;;  %v4188_v29 = vunpack.i.l.bf16 %v4187_v51 }
  0xb4   : > { %v903_v32 = vsel %vm888_vm2, %v4768_v42, %v4188_v29  ;;  %v904_v33 = vsel %vm888_vm2, %v4777_v47, %v4189_v20  ;;  %v906_v47 = vsel %vm888_vm2, %v4791_v53, %v4194_v2  ;;  %v526_v20 = vrot.slane %v4834_v22, 2 }
  0xb5   : > { %v967_v37 = vpack.c.bf16 %v904_v33, %v903_v32  ;;  %v4197_v25 = vpop.permute.xlu1 %4196  ;;  %v527_v29 = vrot.slane %v4839_v27, 2 }
  0xb6   : > { %v4198_v13 = vunpack.i.l.bf16 %v4197_v25  ;;  %v608_v63 = vsel %vm567_vm1, %v525_v56, %v526_v20 }
  0xb9   : > { %1281 = vmatmul.mubr.bf16.gmra.mrb[16].mxu0 %v961_v12  ;;  %v614_v12 = vsel %vm567_vm1, %v519_v44, %v520_v19  ;;  %v4202_v44 = vpop.permute.xlu0 %4201  ;;  %v607_v19 = vsel %vm567_vm1, %v526_v20, %v527_v29  ;;  %v534_v20 = vrot.slane %v4894_v1, 2 }
  0xba   : > { %3990 = vmatprep.mubr.msk.bf16.mxu0 %vm888_vm2, %v964_v60  ;;  %v4193_v60 = vunpack.i.l.bf16 %v4192_v38  ;;  %v970_v3 = vpack.c.bf16 %v613_v8, %v614_v12  ;;  %v4204_v15 = vunpack.i.h.bf16 %v4202_v44  ;;  %v4203_v59 = vunpack.i.l.bf16 %v4202_v44 }
  0xbb   : > { %v976_v8 = vpack.c.bf16 %v607_v19, %v608_v63  ;;  %v528_v12 = vrot.slane %v4842_v28, 2 }
  0xbc   : > { %v905_v42 = vsel %vm888_vm2, %v4780_v48, %v4193_v60  ;;  %v907_v48 = vsel %vm888_vm2, %v4794_v54, %v4198_v13  ;;  %v909_v54 = vsel %vm888_vm2, %v4809_v62, %v4203_v59 }
  0xbd   : > { %v969_v11 = vpack.c.bf16 %v906_v47, %v905_v42  ;;  %v4212_v2 = vpop.permute.xlu0 %4211 }
  0xbe   : > { %v4213_v42 = vunpack.i.l.bf16 %v4212_v2 }
  0xc1   : > { %1289 = vmatmul.mubr.bf16.gmra.mrb[20].mxu0 %v963_v52  ;;  %v4199_v52 = vunpack.i.h.bf16 %v4197_v25  ;;  %v530_v25 = vrot.slane %v4859_v39, 2  ;;  %v4222_v44 = vpop.permute.xlu0 %4221 }
  0xc2   : > { %3991 = vmatprep.mubr.msk.bf16.mxu0 %vm888_vm2, %v966_v7  ;;  %v524_v7 = vrot.slane %v4818_v5, 2  ;;  %v4223_v59 = vunpack.i.l.bf16 %v4222_v44 }
  0xc3   : > { %v908_v53 = vsel %vm888_vm2, %v4806_v61, %v4199_v52  ;;  %v910_v61 = vsel %vm888_vm2, %v4818_v5, %v4204_v15  ;;  %v4224_v15 = vunpack.i.h.bf16 %v4222_v44  ;;  %v543_v44 = vrot.slane %v4975_v43, 2 }
  0xc4   : > { %v609_v26 = vsel %vm567_vm1, %v524_v7, %v525_v56  ;;  %v610_v31 = vsel %vm567_vm1, %v523_v24, %v524_v7  ;;  %v971_v51 = vpack.c.bf16 %v908_v53, %v907_v48  ;;  %v973_v32 = vpack.c.bf16 %v910_v61, %v909_v54 }
  0xc5   : > { %v4214_v24 = vunpack.i.h.bf16 %v4212_v2  ;;  %v532_v48 = vrot.slane %v4882_v57, 2  ;;  %v533_v53 = vrot.slane %v4885_v58, 2 }
  0xc9   : > { %1297 = vmatmul.mubr.bf16.gmra.mrb[24].mxu0 %v965_v55  ;;  %v974_v55 = vpack.c.bf16 %v609_v26, %v610_v31  ;;  %v601_v26 = vsel %vm567_vm1, %v532_v48, %v533_v53  ;;  %v602_v31 = vsel %vm567_vm1, %v531_v9, %v532_v48 }
  0xca   : > { %3992 = vmatprep.mubr.msk.bf16.mxu0 %vm888_vm2, %v968_v17  ;;  %v4207_v17 = vpop.permute.xlu1 %4206 }
  0xcb   : > { %v4209_v33 = vunpack.i.h.bf16 %v4207_v17  ;;  %v4208_v38 = vunpack.i.l.bf16 %v4207_v17  ;;  %v600_v17 = vsel %vm567_vm1, %v533_v53, %v534_v20 }
  0xcd   : > { %v911_v62 = vsel %vm888_vm2, %v4821_v10, %v4208_v38  ;;  %v912_v5 = vsel %vm888_vm2, %v4834_v22, %v4209_v33  ;;  %v913_v10 = vsel %vm888_vm2, %v4839_v27, %v4213_v42  ;;  %v914_v22 = vsel %vm888_vm2, %v4842_v28, %v4214_v24 }
  0xce   : > { %v975_v49 = vpack.c.bf16 %v912_v5, %v911_v62  ;;  %v4217_v34 = vpop.permute.xlu1 %4216  ;;  %v977_v13 = vpack.c.bf16 %v914_v22, %v913_v10  ;;  %v536_v38 = vrot.slane %v4919_v30, 2  ;;  %v539_v24 = vrot.slane %v4934_v45, 2 }
  0xcf   : > { %v4218_v7 = vunpack.i.l.bf16 %v4217_v34 }
  0xd1   : > { %1305 = vmatmul.mubr.bf16.gmra.mrb[28].mxu0 %v967_v37  ;;  %v529_v37 = vrot.slane %v4851_v36, 2  ;;  %v915_v27 = vsel %vm888_vm2, %v4851_v36, %v4218_v7  ;;  %v917_v36 = vsel %vm888_vm2, %v4871_v50, %v4223_v59 }
  0xd2   : > { %3993 = vmatprep.mubr.msk.bf16.mxu0 %vm888_vm2, %v970_v3  ;;  %v606_v3 = vsel %vm567_vm1, %v527_v29, %v528_v12  ;;  %v535_v29 = vrot.slane %v4905_v18, 2  ;;  %v4227_v54 = vpop.permute.xlu1 %4226 }
  0xd3   : > { %v605_v60 = vsel %vm567_vm1, %v528_v12, %v529_v37  ;;  %v604_v52 = vsel %vm567_vm1, %v529_v37, %v530_v25  ;;  %v4229_v63 = vunpack.i.h.bf16 %v4227_v54  ;;  %v4232_v12 = vpop.permute.xlu0 %4231 }
  0xd4   : > { %v978_v47 = vpack.c.bf16 %v605_v60, %v606_v3  ;;  %v599_v61 = vsel %vm567_vm1, %v534_v20, %v535_v29  ;;  %v598_v62 = vsel %vm567_vm1, %v535_v29, %v536_v38  ;;  %v4234_v2 = vunpack.i.h.bf16 %v4232_v12 }
  0xd5   : > { %v984_v33 = vpack.c.bf16 %v599_v61, %v600_v17  ;;  %v4233_v60 = vunpack.i.l.bf16 %v4232_v12  ;;  %v544_v29 = vrot.slane %v4984_v0, 2 }
  0xd6   : > { %v4237_v42 = vpop.permute.xlu1 %4236 }
  0xd7   : > { %v4239_v10 = vunpack.i.h.bf16 %v4237_v42  ;;  %v4238_v22 = vunpack.i.l.bf16 %v4237_v42  ;;  %v590_v17 = vsel %vm567_vm1, %v543_v44, %v544_v29 }
  0xd9   : > { %1313 = vmatmul.mubr.bf16.gmra.mrb[32].mxu0 %v969_v11  ;;  %v603_v11 = vsel %vm567_vm1, %v530_v25, %v531_v9 }
  0xda   : > { %3994 = vmatprep.mubr.msk.bf16.mxu0 %vm888_vm2, %v972_v14  ;;  %v4219_v14 = vunpack.i.h.bf16 %v4217_v34  ;;  %v980_v56 = vpack.c.bf16 %v603_v11, %v604_v52  ;;  %v540_v11 = vrot.slane %v4958_v21, 2  ;;  %v541_v52 = vrot.slane %v4961_v23, 2 }
  0xdc   : > { %v916_v28 = vsel %vm888_vm2, %v4859_v39, %v4219_v14  ;;  %v918_v39 = vsel %vm888_vm2, %v4882_v57, %v4224_v15  ;;  %v920_v57 = vsel %vm888_vm2, %v4894_v1, %v4229_v63  ;;  %v922_v1 = vsel %vm888_vm2, %v4919_v30, %v4234_v2 }
  0xdd   : > { %v981_v19 = vpack.c.bf16 %v918_v39, %v917_v36  ;;  %v924_v30 = vsel %vm888_vm2, %v4929_v41, %v4239_v10  ;;  %v593_v14 = vsel %vm567_vm1, %v540_v11, %v541_v52  ;;  %v594_v7 = vsel %vm567_vm1, %v539_v24, %v540_v11  ;;  %v7087_v36 = vld [vmem:[#allocation5_spill] sm:$0xff] }
  0xde   : > { %v545_v39 = vrot.slane %v7087_v36, 2  ;;  %v7091_v11 = vld [vmem:[#allocation9_spill] sm:$0xff] }
  0xe0   : > { %v589_v61 = vsel %vm567_vm1, %v544_v29, %v545_v39 }
  0xe1   : > { %1321 = vmatmul.mubr.bf16.gmra.mrb[36].mxu0 %v971_v51  ;;  %v979_v51 = vpack.c.bf16 %v916_v28, %v915_v27  ;;  %v990_v27 = vpack.c.bf16 %v593_v14, %v594_v7  ;;  %v542_v28 = vrot.slane %v4971_v35, 2 }
  0xe2   : > { %3995 = vmatprep.mubr.msk.bf16.mxu0 %vm888_vm2, %v974_v55  ;;  %v982_v55 = vpack.c.bf16 %v601_v26, %v602_v31  ;;  %v4247_v26 = vpop.permute.xlu1 %4246 }
  0xe3   : > { %v591_v31 = vsel %vm567_vm1, %v542_v28, %v543_v44  ;;  %v4249_v59 = vunpack.i.h.bf16 %v4247_v26  ;;  %v7093_v44 = vld [vmem:[#allocation11_spill] sm:$0xff] }
  0xe9   : > { %1329 = vmatmul.mubr.bf16.gmra.mrb[40].mxu0 %v973_v32  ;;  %v4228_v32 = vunpack.i.l.bf16 %v4227_v54 }
  0xea   : > { %3996 = vmatprep.mubr.msk.bf16.mxu0 %vm888_vm2, %v976_v8  ;;  %v537_v8 = vrot.slane %v4926_v40, 2 }
  0xeb   : > { %v919_v50 = vsel %vm888_vm2, %v4885_v58, %v4228_v32  ;;  %v921_v58 = vsel %vm888_vm2, %v4905_v18, %v4233_v60  ;;  %v923_v18 = vsel %vm888_vm2, %v4926_v40, %v4238_v22  ;;  %v7088_v60 = vld [vmem:[#allocation6_spill] sm:$0xff]  ;;  %v7090_v22 = vld [vmem:[#allocation8_spill] sm:$0xff] }
  0xec   : > { %v597_v37 = vsel %vm567_vm1, %v536_v38, %v537_v8  ;;  %v983_v5 = vpack.c.bf16 %v920_v57, %v919_v50  ;;  %v985_v9 = vpack.c.bf16 %v922_v1, %v921_v58  ;;  %v546_v38 = vrot.slane %v5019_v16, 2  ;;  %v4257_v50 = vpop.permute.xlu1 %4256 }
  0xed   : > { %v986_v3 = vpack.c.bf16 %v597_v37, %v598_v62  ;;  %v4259_v62 = vunpack.i.h.bf16 %v4257_v50 }
  0xee   : > { %v588_v12 = vsel %vm567_vm1, %v545_v39, %v546_v38 }
  0xf1   : > { %1337 = vmatmul.mubr.bf16.gmra.mrb[44].mxu0 %v975_v49  ;;  %v538_v49 = vrot.slane %v4929_v41, 2 }
  0xf2   : > { %3997 = vmatprep.mubr.msk.bf16.mxu0 %vm888_vm2, %v978_v47 }
  0xf3   : > { %v595_v47 = vsel %vm567_vm1, %v538_v49, %v539_v24  ;;  %v596_v25 = vsel %vm567_vm1, %v537_v8, %v538_v49  ;;  %v547_v8 = vrot.slane %v5022_v46, 2  ;;  %v7089_v49 = vld [vmem:[#allocation7_spill] sm:$0xff] }
  0xf4   : > { %v988_v34 = vpack.c.bf16 %v595_v47, %v596_v25  ;;  %v549_v24 = vrot.slane %v7089_v49, 2 }
  0xf5   : > { %v587_v57 = vsel %vm567_vm1, %v546_v38, %v547_v8  ;;  %v4486_v38 = vld [vmem:[%s7014_s3 + $0x10] sm:$0xff]  }
  0xf6   : > { %v996_v2 = vpack.c.bf16 %v587_v57, %v588_v12  ;;  %v7097_v57 = vld [vmem:[#allocation14_spill] sm:$0xff] }
  0xf7   : > { %v556_v12 = vrot.slane %v7097_v57, 2 }
  0xf9   : > { %1345 = vmatmul.mubr.bf16.gmra.mrb[48].mxu0 %v977_v13  ;;  %v4242_v13 = vpop.permute.xlu0 %4241 }
  0xfa   : > { %3998 = vmatprep.mubr.msk.bf16.mxu0 %vm888_vm2, %v980_v56  ;;  %v987_v56 = vpack.c.bf16 %v924_v30, %v923_v18  ;;  %v4244_v48 = vunpack.i.h.bf16 %v4242_v13  ;;  %v4243_v53 = vunpack.i.l.bf16 %v4242_v13  ;;  %v4267_v30 = vpop.permute.xlu1 %4266 }
  0xfc   : > { %v925_v40 = vsel %vm888_vm2, %v4934_v45, %v4243_v53  ;;  %v926_v41 = vsel %vm888_vm2, %v4958_v21, %v4244_v48  ;;  %v928_v21 = vsel %vm888_vm2, %v4971_v35, %v4249_v59  ;;  %v4268_v48 = vunpack.i.l.bf16 %v4267_v30 }
  0xfd   : > { %v989_v15 = vpack.c.bf16 %v926_v41, %v925_v40  ;;  %v4252_v54 = vpop.permute.xlu0 %4251  ;;  %v553_v40 = vrot.slane %v7093_v44, 2 }
  0xfe   : > { %v4254_v63 = vunpack.i.h.bf16 %v4252_v54  ;;  %v4253_v32 = vunpack.i.l.bf16 %v4252_v54  ;;  %v7096_v54 = vmov 0  }
 0x100   : > { %v930_v35 = vsel %vm888_vm2, %v4984_v0, %v4254_v63  ;;  %v4277_v63 = vpop.permute.xlu1 %4276 }
 0x101   : > { %1353 = vmatmul.mubr.bf16.gmra.mrb[52].mxu0 %v979_v51  ;;  %v592_v51 = vsel %vm567_vm1, %v541_v52, %v542_v28  ;;  %v4262_v58 = vpop.permute.xlu0 %4261  ;;  %v551_v52 = vrot.slane %v7091_v11, 2 }
 0x102   : > { %3999 = vmatprep.mubr.msk.bf16.mxu0 %vm888_vm2, %v982_v55  ;;  %v4248_v55 = vunpack.i.l.bf16 %v4247_v26  ;;  %v992_v20 = vpack.c.bf16 %v591_v31, %v592_v51  ;;  %v4264_v25 = vunpack.i.h.bf16 %v4262_v58 }
 0x104   : > { %v927_v45 = vsel %vm888_vm2, %v4961_v23, %v4248_v55  ;;  %v929_v23 = vsel %vm888_vm2, %v4975_v43, %v4253_v32  ;;  %v932_v43 = vsel %vm888_vm2, %v5019_v16, %v4259_v62  ;;  %v934_v18 = vsel %vm888_vm2, %v7088_v60, %v4264_v25 }
 0x105   : > { %v993_v37 = vpack.c.bf16 %v930_v35, %v929_v23  ;;  %v4272_v26 = vpop.permute.xlu0 %4271  ;;  %v4279_v23 = vunpack.i.h.bf16 %v4277_v63  ;;  %v4278_v35 = vunpack.i.l.bf16 %v4277_v63  ;;  %v7103_v63 = vld [vmem:[#allocation20_spill] sm:$0xff] }
 0x106   : > { %v4274_v55 = vunpack.i.h.bf16 %v4272_v26 }
 0x109   : > { %1361 = vmatmul.mubr.bf16.gmra.mrb[56].mxu0 %v981_v19  ;;  %v991_v19 = vpack.c.bf16 %v928_v21, %v927_v45  ;;  %v7095_v45 = vld [vmem:[#allocation13_spill] sm:$0xff] }
 0x10a   : > { %4000 = vmatprep.mubr.msk.bf16.mxu0 %vm888_vm2, %v984_v33  ;;  %v994_v33 = vpack.c.bf16 %v589_v61, %v590_v17  ;;  %v555_v21 = vrot.slane %v7095_v45, 2  ;;  %v4485_v61 = vld [vmem:[%s7014_s3 + $0x8] sm:$0xff]  }
 0x111   : > { %1369 = vmatmul.mubr.bf16.gmra.mrb[60].mxu0 %v983_v5  ;;  %v4258_v5 = vunpack.i.l.bf16 %v4257_v50 }
 0x112   : > { %4001 = vmatprep.mubr.msk.bf16.mxu0 %vm888_vm2, %v986_v3  ;;  %v548_v3 = vrot.slane %v7088_v60, 2 }
 0x113   : > { %v931_v0 = vsel %vm888_vm2, %v7087_v36, %v4258_v5  ;;  %v7094_v36 = vld [vmem:[#allocation12_spill] sm:$0xff] }
 0x114   : > { %v585_v1 = vsel %vm567_vm1, %v548_v3, %v549_v24  ;;  %v586_v42 = vsel %vm567_vm1, %v547_v8, %v548_v3  ;;  %v995_v47 = vpack.c.bf16 %v932_v43, %v931_v0  ;;  %v554_v39 = vrot.slane %v7094_v36, 2  ;;  %v4487_v5 = vld [vmem:[%s7014_s3 + $0x18] sm:$0xff]   ;;  %v4282_v3 = vpop.permute.xlu0 %4281  ;;  %v4488_v0 = vld [vmem:[%s7014_s3 + $0x20] sm:$0xff]  }
 0x115   : > { %v998_v10 = vpack.c.bf16 %v585_v1, %v586_v42  ;;  %v940_v60 = vsel %vm888_vm2, %v7094_v36, %v4279_v23  ;;  %v4283_v1 = vunpack.i.l.bf16 %v4282_v3 }
 0x116   : > { %v579_v32 = vsel %vm567_vm1, %v554_v39, %v555_v21 }
 0x119   : > { %1377 = vmatmul.mubr.bf16.gmra.mrb[64].mxu0 %v985_v9  ;;  %v4263_v9 = vunpack.i.l.bf16 %v4262_v58  ;;  %v4284_v58 = vunpack.i.h.bf16 %v4282_v3  ;;  %v4494_v3 = vld [vmem:[%s7014_s3 + $0x50] sm:$0xff]  }
 0x11a   : > { %4002 = vmatprep.mubr.msk.bf16.mxu0 %vm888_vm2, %v988_v34  ;;  %v550_v34 = vrot.slane %v7090_v22, 2 }
 0x11b   : > { %v933_v16 = vsel %vm888_vm2, %v5022_v46, %v4263_v9  ;;  %v935_v46 = vsel %vm888_vm2, %v7089_v49, %v4268_v48  ;;  %v7100_v9 = vld [vmem:[#allocation17_spill] sm:$0xff]  ;;  %v7101_v48 = vld [vmem:[#allocation18_spill] sm:$0xff] }
 0x11c   : > { %v583_v13 = vsel %vm567_vm1, %v550_v34, %v551_v52  ;;  %v584_v14 = vsel %vm567_vm1, %v549_v24, %v550_v34  ;;  %v997_v7 = vpack.c.bf16 %v934_v18, %v933_v16  ;;  %v578_v24 = vsel %vm567_vm1, %v555_v21, %v556_v12 }
 0x11d   : > { %v1000_v53 = vpack.c.bf16 %v583_v13, %v584_v14  ;;  %v941_v34 = vsel %vm888_vm2, %v7095_v45, %v4283_v1 }
 0x121   : > { %1385 = vmatmul.mubr.bf16.gmra.mrb[68].mxu0 %v987_v56  ;;  %v4269_v56 = vunpack.i.h.bf16 %v4267_v30  ;;  %v4490_v30 = vld [vmem:[%s7014_s3 + $0x30] sm:$0xff]  }
 0x122   : > { %4003 = vmatprep.mubr.msk.bf16.mxu0 %vm888_vm2, %v990_v27  ;;  %v7092_v27 = vld [vmem:[#allocation10_spill] sm:$0xff] }
 0x123   : > { %v552_v28 = vrot.slane %v7092_v27, 2  ;;  %v936_v41 = vsel %vm888_vm2, %v7090_v22, %v4269_v56  ;;  %v4489_v22 = vld [vmem:[%s7014_s3 + $0x28] sm:$0xff]  }
 0x124   : > { %v999_v59 = vpack.c.bf16 %v936_v41, %v935_v46 }
 0x125   : > { %v581_v31 = vsel %vm567_vm1, %v552_v28, %v553_v40  ;;  %v582_v51 = vsel %vm567_vm1, %v551_v52, %v552_v28  ;;  %v4287_v52 = vpop.permute.xlu1 %4286 }
 0x126   : > { %v1002_v29 = vpack.c.bf16 %v581_v31, %v582_v51  ;;  %v4289_v14 = vunpack.i.h.bf16 %v4287_v52 }
 0x129   : > { %1393 = vmatmul.mubr.bf16.gmra.mrb[72].mxu0 %v989_v15  ;;  %v4484_v15 = vld [vmem:[%s7014_s3] sm:$0xff]  }
 0x12a   : > { %4004 = vmatprep.mubr.msk.bf16.mxu0 %vm888_vm2, %v992_v20  ;;  %v4273_v20 = vunpack.i.l.bf16 %v4272_v26  ;;  %2602 = vmatpush1.bf16.msra.mxu1 %v4484_v15  ;;  %v4292_v26 = vpop.permute.xlu0 %4291 }
 0x12b   : > { %2603 = vmatprep.subr.bf16.mxu1 %v7096_v54  ;;  %v4294_v36 = vunpack.i.h.bf16 %v4292_v26 }
 0x12c   : > { %v937_v17 = vsel %vm888_vm2, %v7091_v11, %v4273_v20  ;;  %v942_v11 = vsel %vm888_vm2, %v7097_v57, %v4284_v58  ;;  %v4297_v57 = vpop.permute.xlu1 %4296 }
 0x12d   : > { %v1005_v13 = vpack.c.bf16 %v942_v11, %v941_v34  ;;  %v4298_v58 = vunpack.i.l.bf16 %v4297_v57  ;;  %v7105_v34 = vld [vmem:[#allocation22_spill] sm:$0xff] }
 0x12e   : > { %2604 = vmatpush1.bf16.msra.mxu1 %v4485_v61  ;;  %v564_v11 = vrot.slane %v7105_v34, 2 }
 0x12f   : > { %2605 = vmatprep.subr.bf16.mxu1 %v7096_v54 }
 0x131   : > { %1401 = vmatmul.mubr.bf16.gmra.mrb[76].mxu0 %v991_v19  ;;  %v938_v19 = vsel %vm888_vm2, %v7092_v27, %v4274_v55  ;;  %v7102_v27 = vld [vmem:[#allocation19_spill] sm:$0xff] }
 0x132   : > { %4005 = vmatprep.mubr.msk.bf16.mxu0 %vm888_vm2, %v994_v33  ;;  %v580_v33 = vsel %vm567_vm1, %v553_v40, %v554_v39  ;;  %v1001_v8 = vpack.c.bf16 %v938_v19, %v937_v17  ;;  %2606 = vmatpush1.bf16.msra.mxu1 %v4486_v38  ;;  %v561_v28 = vrot.slane %v7102_v27, 2  ;;  %v5497_v40 = vld [vmem:[%s7013_s2] ss:$0 sm:$0xff]  ;;  %v4293_v39 = vunpack.i.l.bf16 %v4292_v26 }
 0x133   : > { %v1004_v50 = vpack.c.bf16 %v579_v32, %v580_v33  ;;  %2607 = vmatprep.subr.bf16.mxu1 %v7096_v54  ;;  %v562_v32 = vrot.slane %v7103_v63, 2  ;;  %v7104_v33 = vld [vmem:[#allocation21_spill] sm:$0xff] }
 0x134   : > { %v563_v38 = vrot.slane %v7104_v33, 2 }
 0x136   : > { %2608 = vmatpush1.bf16.msra.mxu1 %v4487_v5  ;;  %v572_v5 = vsel %vm567_vm1, %v561_v28, %v562_v32 }
 0x137   : > { %2609 = vmatprep.subr.bf16.mxu1 %v7096_v54 }
 0x139   : > { %1409 = vmatmul.mubr.bf16.gmra.mrb[80].mxu0 %v993_v37  ;;  %v7098_v37 = vld [vmem:[#allocation15_spill] sm:$0xff] }
 0x13a   : > { %4006 = vmatprep.mubr.msk.bf16.mxu0 %vm888_vm2, %v996_v2  ;;  %v557_v62 = vrot.slane %v7098_v37, 2  ;;  %v939_v2 = vsel %vm888_vm2, %v7093_v44, %v4278_v35  ;;  %2610 = vmatpush1.bf16.msra.mxu1 %v4488_v0  ;;  %v4491_v44 = vld [vmem:[%s7014_s3 + $0x38] sm:$0xff]   ;;  %v945_v35 = vsel %vm888_vm2, %v7100_v9, %v4293_v39 }
 0x13b   : > { %v1003_v43 = vpack.c.bf16 %v940_v60, %v939_v2  ;;  %2611 = vmatprep.subr.bf16.mxu1 %v7096_v54 }
 0x13c   : > { %v577_v49 = vsel %vm567_vm1, %v556_v12, %v557_v62 }
 0x13d   : > { %v1006_v42 = vpack.c.bf16 %v577_v49, %v578_v24 }
 0x13e   : > { %2612 = vmatpush1.bf16.msra.mxu1 %v4489_v22  ;;  %v4302_v22 = vpop.permute.xlu0 %4301 }
 0x13f   : > { %2613 = vmatprep.subr.bf16.mxu1 %v7096_v54 }
 0x141   : > { %1417 = vmatmul.mubr.bf16.gmra.mrb[84].mxu0 %v995_v47  ;;  %v7099_v47 = vld [vmem:[#allocation16_spill] sm:$0xff] }
 0x142   : > { %4007 = vmatprep.mubr.msk.bf16.mxu0 %vm888_vm2, %v998_v10  ;;  %v558_v25 = vrot.slane %v7099_v47, 2  ;;  %v559_v10 = vrot.slane %v7100_v9, 2  ;;  %2614 = vmatpush1.bf16.msra.mxu1 %v4490_v30  ;;  %v944_v41 = vsel %vm888_vm2, %v7099_v47, %v4289_v14  ;;  %v947_v14 = vsel %vm888_vm2, %v7102_v27, %v4298_v58 }
 0x143   : > { %2615 = vmatprep.subr.bf16.mxu1 %v7096_v54 }
 0x144   : > { %v575_v16 = vsel %vm567_vm1, %v558_v25, %v559_v10  ;;  %v576_v18 = vsel %vm567_vm1, %v557_v62, %v558_v25  ;;  %v571_v62 = vsel %vm567_vm1, %v562_v32, %v563_v38 }
 0x145   : > { %v1008_v56 = vpack.c.bf16 %v575_v16, %v576_v18  ;;  %v1012_v47 = vpack.c.bf16 %v571_v62, %v572_v5  ;;  %v4495_v18 = vld [vmem:[%s7014_s3 + $0x58] sm:$0xff]  }
 0x146   : > { %2616 = vmatpush1.bf16.msra.mxu1 %v4491_v44  ;;  %v570_v44 = vsel %vm567_vm1, %v563_v38, %v564_v11 }
 0x147   : > { %2617 = vmatprep.subr.bf16.mxu1 %v7096_v54 }
 0x149   : > { %1425 = vmatmul.mubr.bf16.gmra.mrb[88].mxu0 %v997_v7  ;;  %v4288_v7 = vunpack.i.l.bf16 %v4287_v52  ;;  %v7106_v52 = vld [vmem:[#allocation23_spill] sm:$0xff] }
 0x14a   : > { %4008 = vmatprep.mubr.msk.bf16.mxu0 %vm888_vm2, %v1000_v53  ;;  %v560_v53 = vrot.slane %v7101_v48, 2  ;;  %v565_v16 = vrot.slane %v7106_v52, 2 }
 0x14b   : > { %v943_v46 = vsel %vm888_vm2, %v7098_v37, %v4288_v7 }
 0x14c   : > { %v573_v31 = vsel %vm567_vm1, %v560_v53, %v561_v28  ;;  %v574_v51 = vsel %vm567_vm1, %v559_v10, %v560_v53  ;;  %v569_v28 = vsel %vm567_vm1, %v564_v11, %v565_v16 }
 0x14d   : > { %v1010_v21 = vpack.c.bf16 %v573_v31, %v574_v51  ;;  %v1014_v39 = vpack.c.bf16 %v569_v28, %v570_v44  ;;  %v4505_v28 = vld [vmem:[%s4690_s10 + $0x1f8] sm:$0xff] }
 0x151   : > { %1433 = vmatmul.mubr.bf16.gmra.mrb[92].mxu0 %v999_v59  ;;  %v4492_v59 = vld [vmem:[%s7014_s3 + $0x40] sm:$0xff]  }
 0x152   : > { %4009 = vmatprep.mubr.msk.bf16.mxu0 %vm888_vm2, %v1002_v29  ;;  %v1007_v29 = vpack.c.bf16 %v944_v41, %v943_v46  ;;  %2618 = vmatpush1.bf16.msra.mxu1 %v4492_v59 }
 0x153   : > { %2619 = vmatprep.subr.bf16.mxu1 %v7096_v54 }
 0x159   : > { %1441 = vmatmul.mubr.bf16.gmra.mrb[96].mxu0 %v1001_v8  ;;  %v4493_v8 = vld [vmem:[%s7014_s3 + $0x48] sm:$0xff]  }
 0x15a   : > { %4010 = vmatprep.mubr.msk.bf16.mxu0 %vm888_vm2, %v1004_v50  ;;  %v946_v50 = vsel %vm888_vm2, %v7101_v48, %v4294_v36  ;;  %2620 = vmatpush1.bf16.msra.mxu1 %v4493_v8  ;;  %v4303_v48 = vunpack.i.l.bf16 %v4302_v22 }
 0x15b   : > { %2621 = vmatprep.subr.bf16.mxu1 %v7096_v54  ;;  %v1009_v60 = vpack.c.bf16 %v946_v50, %v945_v35 }
 0x15e   : > { %2622 = vmatpush1.bf16.msra.mxu1 %v4494_v3 }
 0x15f   : > { %2623 = vmatprep.subr.bf16.mxu1 %v7096_v54 }
 0x161   : > { %1449 = vmatmul.mubr.bf16.gmra.mrb[100].mxu0 %v1003_v43  ;;  %v4299_v43 = vunpack.i.h.bf16 %v4297_v57  ;;  %v7108_v57 = vrot.slane %v4693_v6, 2 }
 0x162   : > { %4011 = vmatprep.mubr.msk.bf16.mxu0 %vm888_vm2, %v1006_v42  ;;  %2624 = vmatpush1.bf16.msra.mxu1 %v4495_v18 }
 0x163   : > { %v948_v7 = vsel %vm888_vm2, %v7103_v63, %v4299_v43 }
 0x164   : > { %v1011_v41 = vpack.c.bf16 %v948_v7, %v947_v14 }
 0x169   : > { %1457 = vmatmul.mubr.bf16.gmra.mrb[104].mxu0 %v1005_v13 }
 0x16a   : > { %4012 = vmatprep.mubr.msk.bf16.mxu0 %vm888_vm2, %v1008_v56  ;;  %v4304_v56 = vunpack.i.h.bf16 %v4302_v22 }
 0x16c   : > { %v1250_v15 = vpop.f32.mrb[0].mxu0 }
 0x16d   : > { %v1251_v55 = vadd.f32 %v5497_v40, %v1250_v15  ;;  %v1252_v20 = vpop.f32.mrb[1].mxu0  ;;  %v7107_v15 = vld [vmem:[#allocation24_spill] sm:$0xff] }
 0x16e   : > { %v1253_v45 = vpop.f32.mrb[2].mxu0  ;;  %v566_v59 = vrot.slane %v7107_v15, 2 }
 0x16f   : > { %v1505_v61 = vmax.f32 %v1251_v55, 0.0  ;;  %v1254_v17 = vadd.f32 %v5497_v40, %v1253_v45  ;;  %v1255_v19 = vpop.f32.mrb[3].mxu0 }
 0x170   : > { %v950_v19 = vsel %vm888_vm2, %v7105_v34, %v4304_v56  ;;  %v568_v50 = vsel %vm567_vm1, %v565_v16, %v566_v59 }
 0x171   : > { %v1506_v23 = vmax.f32 %v1254_v17, 0.0  ;;  %1465 = vmatmul.mubr.bf16.gmra.mrb[108].mxu0 %v1007_v29  ;;  %v5525_v12 = vrot.slane %v1505_v61, 1  ;;  %v949_v17 = vsel %vm888_vm2, %v7104_v33, %v4303_v48  ;;  %v631_v33 = vsel %vm567_vm1, %v566_v59, %v7108_v57 }
 0x172   : > { %4013 = vmatprep.mubr.msk.bf16.mxu0 %vm888_vm2, %v1010_v21  ;;  %v1016_v52 = vpack.c.bf16 %v631_v33, %v568_v50 }
 0x173   : > { %v1570_v37 = vrot.slane %v1506_v23, 1 }
 0x174   : > { %v1258_v2 = vpop.f32.mrb[4].mxu0 }
 0x175   : > { %v1695_v49 = vsel %vm438_vm0, %v5525_v12, %v1570_v37  ;;  %v1259_v24 = vadd.f32 %v5497_v40, %v1258_v2  ;;  %v1260_v0 = vpop.f32.mrb[5].mxu0  ;;  %v4307_v2 = vpop.permute.xlu1 %4306 }
 0x176   : > { %v5539_v1 = vmax.f32 %v1505_v61, %v1695_v49  ;;  %v1261_v42 = vpop.f32.mrb[6].mxu0  ;;  %v4308_v34 = vunpack.i.l.bf16 %v4307_v2 }
 0x177   : > { %v1507_v25 = vmax.f32 %v1259_v24, 0.0  ;;  %v1262_v9 = vadd.f32 %v5497_v40, %v1261_v42  ;;  %v1263_v10 = vpop.f32.mrb[7].mxu0 }
 0x178   : > { %v1889_v63 = vrot.slane %v5539_v1, 4  ;;  %v1761_v38 = vrot.slane %v5539_v1, 2 }
 0x179   : > { %v1571_v30 = vrot.slane %v1507_v25, 1  ;;  %v1508_v13 = vmax.f32 %v1262_v9, 0.0  ;;  %1473 = vmatmul.mubr.bf16.gmra.mrb[112].mxu0 %v1009_v60  ;;  %v4309_v9 = vunpack.i.h.bf16 %v4307_v2 }
 0x17a   : > { %4014 = vmatprep.mubr.msk.bf16.mxu0 %vm888_vm2, %v1012_v47 }
 0x17b   : > { %v1694_v54 = vsel %vm438_vm0, %v1570_v37, %v1571_v30  ;;  %v1572_v53 = vrot.slane %v1508_v13, 1  ;;  %v952_v44 = vsel %vm888_vm2, %v4505_v28, %v4309_v9 }
 0x17c   : > { %v5559_v46 = vmax.f32 %v1506_v23, %v1694_v54  ;;  %v1266_v27 = vpop.f32.mrb[8].mxu0  ;;  %v4504_v54 = vld [vmem:[%s4690_s10 + $0x1f0] sm:$0xff]  ;;  %s4076_s10 = sshll.u32 %s4643_s9, 9  ;;  %s6970_s9 = scalar_lea.sflag [#allocation3], %s297_s22 }
 0x17d   : > { %v1693_v26 = vsel %vm438_vm0, %v1571_v30, %v1572_v53  ;;  %v1267_v31 = vadd.f32 %v5497_v40, %v1266_v27  ;;  %v1268_v51 = vpop.f32.mrb[9].mxu0  ;;  %s6968_s18 = scalar_lea.hbm %s7019_s8, %s4076_s10 }
 0x17e   : > { %v5566_v55 = vmax.f32 %v1507_v25, %v1693_v26  ;;  %v1269_v20 = vpop.f32.mrb[10].mxu0  ;;  %v1890_v29 = vrot.slane %v5559_v46, 4  ;;  %v1762_v36 = vrot.slane %v5559_v46, 2  ;;  %v1013_v25 = vpack.c.bf16 %v950_v19, %v949_v17 }
 0x17f   : > { %v1509_v45 = vmax.f32 %v1267_v31, 0.0  ;;  %v1270_v21 = vadd.f32 %v5497_v40, %v1269_v20  ;;  %v1271_v61 = vpop.f32.mrb[11].mxu0 }
 0x180   : > { %v1891_v32 = vrot.slane %v5566_v55, 4  ;;  %v1763_v8 = vrot.slane %v5566_v55, 2  ;;  %v2016_v62 = vsel %vm1953_vm3, %v1889_v63, %v1890_v29  ;;  %v1887_v6 = vsel %vm567_vm1, %v1761_v38, %v1762_v36 }
 0x181   : > { %v1573_v23 = vrot.slane %v1509_v45, 1  ;;  %v1510_v35 = vmax.f32 %v1270_v21, 0.0  ;;  %1481 = vmatmul.mubr.bf16.gmra.mrb[116].mxu0 %v1011_v41 }
 0x182   : > { %v2015_v37 = vsel %vm1953_vm3, %v1890_v29, %v1891_v32  ;;  %v1886_v5 = vsel %vm567_vm1, %v1762_v36, %v1763_v8  ;;  %4015 = vmatprep.mubr.msk.bf16.mxu0 %vm888_vm2, %v1014_v39 }
 0x183   : > { %v1692_v60 = vsel %vm438_vm0, %v1572_v53, %v1573_v23  ;;  %v1574_v3 = vrot.slane %v1510_v35, 1  ;;  %v2339_v49 = vpack.c.bf16 %v2015_v37, %v2016_v62  ;;  %v4310_v24 = vpack.i.bf16 %v1886_v5, %v1887_v6 }
 0x184   : > { %v5602_v0 = vmax.f32 %v1508_v13, %v1692_v60  ;;  %v1274_v43 = vpop.f32.mrb[12].mxu0  ;;  %v951_v53 = vsel %vm888_vm2, %v4504_v54, %v4308_v34 }
 0x185   : > { %v1691_v58 = vsel %vm438_vm0, %v1573_v23, %v1574_v3  ;;  %v1275_v42 = vadd.f32 %v5497_v40, %v1274_v43  ;;  %v1276_v47 = vpop.f32.mrb[13].mxu0  ;;  %4030 = vmatprep.mubr.msk.bf16.mxu1 %vm888_vm2, %v2339_v49  ;;  %4311 = vrot.lane.b32.xlu0 %v4310_v24, %s4573_s17  ;;  %v1015_v29 = vpack.c.bf16 %v952_v44, %v951_v53 }
 0x186   : > { %v5609_v10 = vmax.f32 %v1509_v45, %v1691_v58  ;;  %v1277_v22 = vpop.f32.mrb[14].mxu0  ;;  %v1764_v11 = vrot.slane %v5602_v0, 2 }
 0x187   : > { %v1511_v16 = vmax.f32 %v1275_v42, 0.0  ;;  %v1278_v18 = vadd.f32 %v5497_v40, %v1277_v22  ;;  %v1279_v30 = vpop.f32.mrb[15].mxu0 }
 0x188   : > { %v1765_v13 = vrot.slane %v5609_v10, 2  ;;  %v1885_v48 = vsel %vm567_vm1, %v1763_v8, %v1764_v11 }
 0x189   : > { %v1575_v14 = vrot.slane %v1511_v16, 1  ;;  %v1512_v7 = vmax.f32 %v1278_v18, 0.0  ;;  %1489 = vmatmul.mubr.bf16.gmra.mrb[120].mxu0 %v1013_v25 }
 0x18a   : > { %v1884_v56 = vsel %vm567_vm1, %v1764_v11, %v1765_v13  ;;  %4016 = vmatprep.mubr.msk.bf16.mxu0 %vm888_vm2, %v1016_v52 }
 0x18b   : > { %v1690_v27 = vsel %vm438_vm0, %v1574_v3, %v1575_v14  ;;  %v1576_v41 = vrot.slane %v1512_v7, 1  ;;  %v4315_v26 = vpack.i.bf16 %v1884_v56, %v1885_v48 }
 0x18c   : > { %v5625_v31 = vmax.f32 %v1510_v35, %v1690_v27  ;;  %v1282_v51 = vpop.f32.mrb[16].mxu0 }
 0x18d   : > { %v1689_v15 = vsel %vm438_vm0, %v1575_v14, %v1576_v41  ;;  %v1283_v59 = vadd.f32 %v5497_v40, %v1282_v51  ;;  %v1284_v20 = vpop.f32.mrb[17].mxu0  ;;  %4316 = vrot.lane.b32.xlu1 %v4315_v26, %s4573_s17 }
 0x18e   : > { %v5631_v36 = vmax.f32 %v1511_v16, %v1689_v15  ;;  %v1285_v39 = vpop.f32.mrb[18].mxu0  ;;  %v1766_v45 = vrot.slane %v5625_v31, 2 }
 0x18f   : > { %v1513_v21 = vmax.f32 %v1283_v59, 0.0  ;;  %v1286_v61 = vadd.f32 %v5497_v40, %v1285_v39  ;;  %v1287_v17 = vpop.f32.mrb[19].mxu0 }
 0x190   : > { %v1767_v19 = vrot.slane %v5631_v36, 2  ;;  %v1883_v50 = vsel %vm567_vm1, %v1765_v13, %v1766_v45 }
 0x191   : > { %v1577_v8 = vrot.slane %v1513_v21, 1  ;;  %v1514_v23 = vmax.f32 %v1286_v61, 0.0  ;;  %1497 = vmatmul.mubr.bf16.gmra.mrb[124].mxu0 %v1015_v29 }
 0x192   : > { %v1882_v35 = vsel %vm567_vm1, %v1766_v45, %v1767_v19 }
 0x193   : > { %v1688_v57 = vsel %vm438_vm0, %v1576_v41, %v1577_v8  ;;  %v1578_v33 = vrot.slane %v1514_v23, 1  ;;  %v4320_v37 = vpack.i.bf16 %v1882_v35, %v1883_v50 }
 0x194   : > { %v5642_v62 = vmax.f32 %v1512_v7, %v1688_v57  ;;  %v1290_v5 = vpop.f32.mrb[20].mxu0 }
 0x195   : > { %v1687_v6 = vsel %vm438_vm0, %v1577_v8, %v1578_v33  ;;  %v1291_v2 = vadd.f32 %v5497_v40, %v1290_v5  ;;  %v1292_v60 = vpop.f32.mrb[21].mxu0  ;;  %4321 = vrot.lane.b32.xlu0 %v4320_v37, %s4573_s17 }
 0x196   : > { %v5648_v3 = vmax.f32 %v1513_v21, %v1687_v6  ;;  %v1293_v49 = vpop.f32.mrb[22].mxu0  ;;  %v1768_v24 = vrot.slane %v5642_v62, 2 }
 0x197   : > { %v1515_v43 = vmax.f32 %v1291_v2, 0.0  ;;  %v1294_v58 = vadd.f32 %v5497_v40, %v1293_v49  ;;  %v1295_v42 = vpop.f32.mrb[23].mxu0 }
 0x198   : > { %v1769_v47 = vrot.slane %v5648_v3, 2  ;;  %v1881_v34 = vsel %vm567_vm1, %v1767_v19, %v1768_v24 }
 0x199   : > { %v1579_v25 = vrot.slane %v1515_v43, 1  ;;  %v1516_v9 = vmax.f32 %v1294_v58, 0.0 }
 0x19a   : > { %v1880_v22 = vsel %vm567_vm1, %v1768_v24, %v1769_v47 }
 0x19b   : > { %v1686_v11 = vsel %vm438_vm0, %v1578_v33, %v1579_v25  ;;  %v1580_v52 = vrot.slane %v1516_v9, 1  ;;  %v4325_v16 = vpack.i.bf16 %v1880_v22, %v1881_v34 }
 0x19c   : > { %v5659_v18 = vmax.f32 %v1514_v23, %v1686_v11  ;;  %v1298_v30 = vpop.f32.mrb[24].mxu0 }
 0x19d   : > { %v1685_v13 = vsel %vm438_vm0, %v1579_v25, %v1580_v52  ;;  %v1299_v14 = vadd.f32 %v5497_v40, %v1298_v30  ;;  %v1300_v7 = vpop.f32.mrb[25].mxu0  ;;  %4326 = vrot.lane.b32.xlu1 %v4325_v16, %s4573_s17 }
 0x19e   : > { %v5665_v56 = vmax.f32 %v1515_v43, %v1685_v13  ;;  %v1301_v48 = vpop.f32.mrb[26].mxu0  ;;  %v1770_v54 = vrot.slane %v5659_v18, 2 }
 0x19f   : > { %v1517_v53 = vmax.f32 %v1299_v14, 0.0  ;;  %v1302_v28 = vadd.f32 %v5497_v40, %v1301_v48  ;;  %v1303_v44 = vpop.f32.mrb[27].mxu0 }
 0x1a0   : > { %v1771_v27 = vrot.slane %v5665_v56, 2  ;;  %v1879_v15 = vsel %vm567_vm1, %v1769_v47, %v1770_v54 }
 0x1a1   : > { %v1581_v41 = vrot.slane %v1517_v53, 1  ;;  %v1518_v26 = vmax.f32 %v1302_v28, 0.0 }
 0x1a2   : > { %v1878_v51 = vsel %vm567_vm1, %v1770_v54, %v1771_v27 }
 0x1a3   : > { %v1684_v59 = vsel %vm438_vm0, %v1580_v52, %v1581_v41  ;;  %v1582_v20 = vrot.slane %v1518_v26, 1  ;;  %v4330_v29 = vpack.i.bf16 %v1878_v51, %v1879_v15 }
 0x1a4   : > { %v5676_v39 = vmax.f32 %v1516_v9, %v1684_v59  ;;  %v1306_v45 = vpop.f32.mrb[28].mxu0 }
 0x1a5   : > { %v1683_v21 = vsel %vm438_vm0, %v1581_v41, %v1582_v20  ;;  %v1307_v61 = vadd.f32 %v5497_v40, %v1306_v45  ;;  %v1308_v17 = vpop.f32.mrb[29].mxu0  ;;  %4331 = vrot.lane.b32.xlu0 %v4330_v29, %s4573_s17 }
 0x1a6   : > { %v5682_v19 = vmax.f32 %v1517_v53, %v1683_v21  ;;  %v1309_v8 = vpop.f32.mrb[30].mxu0  ;;  %v1772_v23 = vrot.slane %v5676_v39, 2 }
 0x1a7   : > { %v1519_v35 = vmax.f32 %v1307_v61, 0.0  ;;  %v1310_v50 = vadd.f32 %v5497_v40, %v1309_v8  ;;  %v1311_v57 = vpop.f32.mrb[31].mxu0 }
 0x1a8   : > { %v1773_v33 = vrot.slane %v5682_v19, 2  ;;  %v1877_v2 = vsel %vm567_vm1, %v1771_v27, %v1772_v23 }
 0x1a9   : > { %v1583_v37 = vrot.slane %v1519_v35, 1  ;;  %v1520_v5 = vmax.f32 %v1310_v50, 0.0 }
 0x1aa   : > { %v1876_v6 = vsel %vm567_vm1, %v1772_v23, %v1773_v33 }
 0x1ab   : > { %v1682_v60 = vsel %vm438_vm0, %v1582_v20, %v1583_v37  ;;  %v1584_v49 = vrot.slane %v1520_v5, 1  ;;  %v4335_v24 = vpack.i.bf16 %v1876_v6, %v1877_v2 }
 0x1ac   : > { %v5693_v43 = vmax.f32 %v1518_v26, %v1682_v60  ;;  %v1314_v58 = vpop.f32.mrb[32].mxu0 }
 0x1ad   : > { %v1681_v42 = vsel %vm438_vm0, %v1583_v37, %v1584_v49  ;;  %v1315_v47 = vadd.f32 %v5497_v40, %v1314_v58  ;;  %v1316_v25 = vpop.f32.mrb[33].mxu0  ;;  %4336 = vrot.lane.b32.xlu1 %v4335_v24, %s4573_s17 }
 0x1ae   : > { %v5699_v9 = vmax.f32 %v1519_v35, %v1681_v42  ;;  %v1317_v22 = vpop.f32.mrb[34].mxu0  ;;  %v1774_v34 = vrot.slane %v5693_v43, 2 }
 0x1af   : > { %v1521_v11 = vmax.f32 %v1315_v47, 0.0  ;;  %v1318_v52 = vadd.f32 %v5497_v40, %v1317_v22  ;;  %v1319_v16 = vpop.f32.mrb[35].mxu0 }
 0x1b0   : > { %v1775_v30 = vrot.slane %v5699_v9, 2  ;;  %v1875_v48 = vsel %vm567_vm1, %v1773_v33, %v1774_v34 }
 0x1b1   : > { %v1585_v13 = vrot.slane %v1521_v11, 1  ;;  %v1522_v14 = vmax.f32 %v1318_v52, 0.0 }
 0x1b2   : > { %v1874_v7 = vsel %vm567_vm1, %v1774_v34, %v1775_v30 }
 0x1b3   : > { %v1680_v54 = vsel %vm438_vm0, %v1584_v49, %v1585_v13  ;;  %v1586_v53 = vrot.slane %v1522_v14, 1  ;;  %v4340_v28 = vpack.i.bf16 %v1874_v7, %v1875_v48 }
 0x1b4   : > { %v5710_v44 = vmax.f32 %v1520_v5, %v1680_v54  ;;  %v1322_v27 = vpop.f32.mrb[36].mxu0 }
 0x1b5   : > { %v1679_v41 = vsel %vm438_vm0, %v1585_v13, %v1586_v53  ;;  %v1323_v26 = vadd.f32 %v5497_v40, %v1322_v27  ;;  %v1324_v51 = vpop.f32.mrb[37].mxu0  ;;  %4341 = vrot.lane.b32.xlu0 %v4340_v28, %s4573_s17 }
 0x1b6   : > { %v5716_v15 = vmax.f32 %v1521_v11, %v1679_v41  ;;  %v1325_v59 = vpop.f32.mrb[38].mxu0  ;;  %v1776_v20 = vrot.slane %v5710_v44, 2 }
 0x1b7   : > { %v1523_v29 = vmax.f32 %v1323_v26, 0.0  ;;  %v1326_v45 = vadd.f32 %v5497_v40, %v1325_v59  ;;  %v1327_v21 = vpop.f32.mrb[39].mxu0 }
 0x1b8   : > { %v1777_v61 = vrot.slane %v5716_v15, 2  ;;  %v1873_v35 = vsel %vm567_vm1, %v1775_v30, %v1776_v20 }
 0x1b9   : > { %v1587_v17 = vrot.slane %v1523_v29, 1  ;;  %v1524_v8 = vmax.f32 %v1326_v45, 0.0 }
 0x1ba   : > { %v1872_v23 = vsel %vm567_vm1, %v1776_v20, %v1777_v61 }
 0x1bb   : > { %v1678_v50 = vsel %vm438_vm0, %v1586_v53, %v1587_v17  ;;  %v1588_v57 = vrot.slane %v1524_v8, 1  ;;  %v4345_v33 = vpack.i.bf16 %v1872_v23, %v1873_v35 }
 0x1bc   : > { %v5727_v37 = vmax.f32 %v1522_v14, %v1678_v50  ;;  %v1330_v5 = vpop.f32.mrb[40].mxu0 }
 0x1bd   : > { %v1677_v6 = vsel %vm438_vm0, %v1587_v17, %v1588_v57  ;;  %v1331_v2 = vadd.f32 %v5497_v40, %v1330_v5  ;;  %v1332_v60 = vpop.f32.mrb[41].mxu0  ;;  %4346 = vrot.lane.b32.xlu1 %v4345_v33, %s4573_s17 }
 0x1be   : > { %v5733_v49 = vmax.f32 %v1523_v29, %v1677_v6  ;;  %v1333_v24 = vpop.f32.mrb[42].mxu0  ;;  %v1778_v58 = vrot.slane %v5727_v37, 2 }
 0x1bf   : > { %v1525_v42 = vmax.f32 %v1331_v2, 0.0  ;;  %v1334_v47 = vadd.f32 %v5497_v40, %v1333_v24  ;;  %v1335_v25 = vpop.f32.mrb[43].mxu0 }
 0x1c0   : > { %v1779_v22 = vrot.slane %v5733_v49, 2  ;;  %v1871_v16 = vsel %vm567_vm1, %v1777_v61, %v1778_v58 }
 0x1c1   : > { %v1589_v34 = vrot.slane %v1525_v42, 1  ;;  %v1526_v11 = vmax.f32 %v1334_v47, 0.0 }
 0x1c2   : > { %v1870_v52 = vsel %vm567_vm1, %v1778_v58, %v1779_v22 }
 0x1c3   : > { %v1676_v30 = vsel %vm438_vm0, %v1588_v57, %v1589_v34  ;;  %v1590_v13 = vrot.slane %v1526_v11, 1  ;;  %v4350_v14 = vpack.i.bf16 %v1870_v52, %v1871_v16 }
 0x1c4   : > { %v5744_v7 = vmax.f32 %v1524_v8, %v1676_v30  ;;  %v1338_v48 = vpop.f32.mrb[44].mxu0 }
 0x1c5   : > { %v1675_v54 = vsel %vm438_vm0, %v1589_v34, %v1590_v13  ;;  %v1339_v53 = vadd.f32 %v5497_v40, %v1338_v48  ;;  %v1340_v28 = vpop.f32.mrb[45].mxu0  ;;  %4351 = vrot.lane.b32.xlu0 %v4350_v14, %s4573_s17 }
 0x1c6   : > { %v5750_v27 = vmax.f32 %v1525_v42, %v1675_v54  ;;  %v1341_v41 = vpop.f32.mrb[46].mxu0  ;;  %v1780_v26 = vrot.slane %v5744_v7, 2 }
 0x1c7   : > { %v1527_v51 = vmax.f32 %v1339_v53, 0.0  ;;  %v1342_v59 = vadd.f32 %v5497_v40, %v1341_v41  ;;  %v1343_v20 = vpop.f32.mrb[47].mxu0 }
 0x1c8   : > { %v1781_v29 = vrot.slane %v5750_v27, 2  ;;  %v1869_v17 = vsel %vm567_vm1, %v1779_v22, %v1780_v26 }
 0x1c9   : > { %v1591_v45 = vrot.slane %v1527_v51, 1  ;;  %v1528_v21 = vmax.f32 %v1342_v59, 0.0 }
 0x1ca   : > { %v1868_v61 = vsel %vm567_vm1, %v1780_v26, %v1781_v29 }
 0x1cb   : > { %v1674_v8 = vsel %vm438_vm0, %v1590_v13, %v1591_v45  ;;  %v1592_v23 = vrot.slane %v1528_v21, 1  ;;  %v4355_v35 = vpack.i.bf16 %v1868_v61, %v1869_v17 }
 0x1cc   : > { %v5761_v50 = vmax.f32 %v1526_v11, %v1674_v8  ;;  %v1346_v57 = vpop.f32.mrb[48].mxu0 }
 0x1cd   : > { %v1673_v33 = vsel %vm438_vm0, %v1591_v45, %v1592_v23  ;;  %v1347_v5 = vadd.f32 %v5497_v40, %v1346_v57  ;;  %v1348_v6 = vpop.f32.mrb[49].mxu0  ;;  %4356 = vrot.lane.b32.xlu1 %v4355_v35, %s4573_s17 }
 0x1ce   : > { %v5767_v2 = vmax.f32 %v1527_v51, %v1673_v33  ;;  %v1349_v60 = vpop.f32.mrb[50].mxu0  ;;  %v1782_v24 = vrot.slane %v5761_v50, 2 }
 0x1cf   : > { %v1529_v58 = vmax.f32 %v1347_v5, 0.0  ;;  %v1350_v42 = vadd.f32 %v5497_v40, %v1349_v60  ;;  %v1351_v47 = vpop.f32.mrb[51].mxu0 }
 0x1d0   : > { %v1783_v25 = vrot.slane %v5767_v2, 2  ;;  %v1867_v52 = vsel %vm567_vm1, %v1781_v29, %v1782_v24 }
 0x1d1   : > { %v1593_v22 = vrot.slane %v1529_v58, 1  ;;  %v1530_v34 = vmax.f32 %v1350_v42, 0.0 }
 0x1d2   : > { %v1866_v11 = vsel %vm567_vm1, %v1782_v24, %v1783_v25 }
 0x1d3   : > { %v1672_v16 = vsel %vm438_vm0, %v1592_v23, %v1593_v22  ;;  %v1594_v30 = vrot.slane %v1530_v34, 1  ;;  %v4360_v13 = vpack.i.bf16 %v1866_v11, %v1867_v52 }
 0x1d4   : > { %v5778_v14 = vmax.f32 %v1528_v21, %v1672_v16  ;;  %v1354_v48 = vpop.f32.mrb[52].mxu0 }
 0x1d5   : > { %v1671_v54 = vsel %vm438_vm0, %v1593_v22, %v1594_v30  ;;  %v1355_v53 = vadd.f32 %v5497_v40, %v1354_v48  ;;  %v1356_v28 = vpop.f32.mrb[53].mxu0  ;;  %4361 = vrot.lane.b32.xlu0 %v4360_v13, %s4573_s17 }
 0x1d6   : > { %v5784_v41 = vmax.f32 %v1529_v58, %v1671_v54  ;;  %v1357_v26 = vpop.f32.mrb[54].mxu0  ;;  %v1784_v51 = vrot.slane %v5778_v14, 2 }
 0x1d7   : > { %v1531_v59 = vmax.f32 %v1355_v53, 0.0  ;;  %v1358_v20 = vadd.f32 %v5497_v40, %v1357_v26  ;;  %v1359_v29 = vpop.f32.mrb[55].mxu0 }
 0x1d8   : > { %v1785_v45 = vrot.slane %v5784_v41, 2  ;;  %v1865_v8 = vsel %vm567_vm1, %v1783_v25, %v1784_v51 }
 0x1d9   : > { %v1595_v21 = vrot.slane %v1531_v59, 1  ;;  %v1532_v61 = vmax.f32 %v1358_v20, 0.0 }
 0x1da   : > { %v1864_v17 = vsel %vm567_vm1, %v1784_v51, %v1785_v45 }
 0x1db   : > { %v1670_v23 = vsel %vm438_vm0, %v1594_v30, %v1595_v21  ;;  %v1596_v35 = vrot.slane %v1532_v61, 1  ;;  %v4365_v57 = vpack.i.bf16 %v1864_v17, %v1865_v8 }
 0x1dc   : > { %v5795_v33 = vmax.f32 %v1530_v34, %v1670_v23  ;;  %v1362_v5 = vpop.f32.mrb[56].mxu0 }
 0x1dd   : > { %v1669_v6 = vsel %vm438_vm0, %v1595_v21, %v1596_v35  ;;  %v1363_v60 = vadd.f32 %v5497_v40, %v1362_v5  ;;  %v1364_v24 = vpop.f32.mrb[57].mxu0  ;;  %4366 = vrot.lane.b32.xlu1 %v4365_v57, %s4573_s17 }
 0x1de   : > { %v5801_v58 = vmax.f32 %v1531_v59, %v1669_v6  ;;  %v1365_v42 = vpop.f32.mrb[58].mxu0  ;;  %v1786_v47 = vrot.slane %v5795_v33, 2 }
 0x1df   : > { %v1533_v25 = vmax.f32 %v1363_v60, 0.0  ;;  %v1366_v22 = vadd.f32 %v5497_v40, %v1365_v42  ;;  %v1367_v11 = vpop.f32.mrb[59].mxu0 }
 0x1e0   : > { %v1787_v34 = vrot.slane %v5801_v58, 2  ;;  %v1863_v13 = vsel %vm567_vm1, %v1785_v45, %v1786_v47 }
 0x1e1   : > { %v1597_v52 = vrot.slane %v1533_v25, 1  ;;  %v1534_v16 = vmax.f32 %v1366_v22, 0.0 }
 0x1e2   : > { %v1862_v30 = vsel %vm567_vm1, %v1786_v47, %v1787_v34 }
 0x1e3   : > { %v1668_v48 = vsel %vm438_vm0, %v1596_v35, %v1597_v52  ;;  %v1598_v54 = vrot.slane %v1534_v16, 1  ;;  %v4370_v53 = vpack.i.bf16 %v1862_v30, %v1863_v13 }
 0x1e4   : > { %v5812_v28 = vmax.f32 %v1532_v61, %v1668_v48  ;;  %v1370_v26 = vpop.f32.mrb[60].mxu0 }
 0x1e5   : > { %v1667_v51 = vsel %vm438_vm0, %v1597_v52, %v1598_v54  ;;  %v1371_v59 = vadd.f32 %v5497_v40, %v1370_v26  ;;  %v1372_v20 = vpop.f32.mrb[61].mxu0  ;;  %4371 = vrot.lane.b32.xlu0 %v4370_v53, %s4573_s17 }
 0x1e6   : > { %v5818_v29 = vmax.f32 %v1533_v25, %v1667_v51  ;;  %v1373_v21 = vpop.f32.mrb[62].mxu0  ;;  %v1788_v45 = vrot.slane %v5812_v28, 2 }
 0x1e7   : > { %v1535_v17 = vmax.f32 %v1371_v59, 0.0  ;;  %v1374_v8 = vadd.f32 %v5497_v40, %v1373_v21  ;;  %v1375_v23 = vpop.f32.mrb[63].mxu0 }
 0x1e8   : > { %v1789_v61 = vrot.slane %v5818_v29, 2  ;;  %v1861_v6 = vsel %vm567_vm1, %v1787_v34, %v1788_v45 }
 0x1e9   : > { %v1599_v35 = vrot.slane %v1535_v17, 1  ;;  %v1536_v57 = vmax.f32 %v1374_v8, 0.0 }
 0x1ea   : > { %v1860_v5 = vsel %vm567_vm1, %v1788_v45, %v1789_v61 }
 0x1eb   : > { %v1666_v60 = vsel %vm438_vm0, %v1598_v54, %v1599_v35  ;;  %v1600_v24 = vrot.slane %v1536_v57, 1  ;;  %v4375_v42 = vpack.i.bf16 %v1860_v5, %v1861_v6 }
 0x1ec   : > { %v5829_v47 = vmax.f32 %v1534_v16, %v1666_v60  ;;  %v1378_v25 = vpop.f32.mrb[64].mxu0  ;;  %v1892_v60 = vrot.slane %v5602_v0, 4 }
 0x1ed   : > { %v1665_v22 = vsel %vm438_vm0, %v1599_v35, %v1600_v24  ;;  %v1379_v11 = vadd.f32 %v5497_v40, %v1378_v25  ;;  %v1380_v52 = vpop.f32.mrb[65].mxu0  ;;  %4376 = vrot.lane.b32.xlu1 %v4375_v42, %s4573_s17 }
 0x1ee   : > { %v5835_v30 = vmax.f32 %v1535_v17, %v1665_v22  ;;  %v1381_v13 = vpop.f32.mrb[66].mxu0  ;;  %v1790_v34 = vrot.slane %v5829_v47, 2 }
 0x1ef   : > { %v1537_v48 = vmax.f32 %v1379_v11, 0.0  ;;  %v1382_v54 = vadd.f32 %v5497_v40, %v1381_v13  ;;  %v1383_v53 = vpop.f32.mrb[67].mxu0 }
 0x1f0   : > { %v1791_v16 = vrot.slane %v5835_v30, 2  ;;  %v1859_v20 = vsel %vm567_vm1, %v1789_v61, %v1790_v34  ;;  %v1893_v61 = vrot.slane %v5609_v10, 4 }
 0x1f1   : > { %v1601_v26 = vrot.slane %v1537_v48, 1  ;;  %v1538_v51 = vmax.f32 %v1382_v54, 0.0 }
 0x1f2   : > { %v1858_v59 = vsel %vm567_vm1, %v1790_v34, %v1791_v16 }
 0x1f3   : > { %v1664_v21 = vsel %vm438_vm0, %v1600_v24, %v1601_v26  ;;  %v1602_v45 = vrot.slane %v1538_v51, 1  ;;  %v4380_v17 = vpack.i.bf16 %v1858_v59, %v1859_v20  ;;  %v2013_v59 = vsel %vm1953_vm3, %v1892_v60, %v1893_v61 }
 0x1f4   : > { %v5846_v8 = vmax.f32 %v1536_v57, %v1664_v21  ;;  %v1386_v23 = vpop.f32.mrb[68].mxu0 }
 0x1f5   : > { %v1663_v35 = vsel %vm438_vm0, %v1601_v26, %v1602_v45  ;;  %v1387_v5 = vadd.f32 %v5497_v40, %v1386_v23  ;;  %v1388_v6 = vpop.f32.mrb[69].mxu0  ;;  %4381 = vrot.lane.b32.xlu0 %v4380_v17, %s4573_s17 }
 0x1f6   : > { %v5854_v42 = vmax.f32 %v1537_v48, %v1663_v35  ;;  %v1389_v24 = vpop.f32.mrb[70].mxu0  ;;  %v1792_v25 = vrot.slane %v5846_v8, 2  ;;  %v2014_v48 = vsel %vm1953_vm3, %v1891_v32, %v1892_v60 }
 0x1f7   : > { %v1539_v57 = vmax.f32 %v1387_v5, 0.0  ;;  %v1390_v22 = vadd.f32 %v5497_v40, %v1389_v24  ;;  %v1391_v11 = vpop.f32.mrb[71].mxu0  ;;  %v4312_v52 = vpop.permute.xlu0 %4311  ;;  %v2341_v60 = vpack.c.bf16 %v2013_v59, %v2014_v48 }
 0x1f8   : > { %v4314_v13 = vunpack.i.h.bf16 %v4312_v52  ;;  %v4313_v34 = vunpack.i.l.bf16 %v4312_v52  ;;  %v1793_v54 = vrot.slane %v5854_v42, 2  ;;  %v1857_v21 = vsel %vm567_vm1, %v1791_v16, %v1792_v25 }
 0x1f9   : > { %v1603_v53 = vrot.slane %v1539_v57, 1  ;;  %v1540_v26 = vmax.f32 %v1390_v22, 0.0 }
 0x1fa   : > { %v1856_v20 = vsel %vm567_vm1, %v1792_v25, %v1793_v54  ;;  %v2274_v17 = vsel %vm888_vm2, %v5539_v1, %v4313_v34  ;;  %v2275_v23 = vsel %vm888_vm2, %v5559_v46, %v4314_v13  ;;  %v1894_v46 = vrot.slane %v5625_v31, 4  ;;  %v6696_v1 = vld [vmem:[%s7015_s4] ss:$0 sm:$0xff] }
 0x1fb   : > { %v1662_v35 = vsel %vm438_vm0, %v1602_v45, %v1603_v53  ;;  %v1604_v5 = vrot.slane %v1540_v26, 1  ;;  %v4385_v6 = vpack.i.bf16 %v1856_v20, %v1857_v21  ;;  %v2338_v24 = vpack.c.bf16 %v2275_v23, %v2274_v17 }
 0x1fc   : > { %v5875_v22 = vmax.f32 %v1538_v51, %v1662_v35  ;;  %v1394_v32 = vpop.f32.mrb[72].mxu0  ;;  %v1895_v45 = vrot.slane %v5631_v36, 4 }
 0x1fd   : > { %v1661_v11 = vsel %vm438_vm0, %v1603_v53, %v1604_v5  ;;  %v1395_v16 = vadd.f32 %v5497_v40, %v1394_v32  ;;  %v1396_v25 = vpop.f32.mrb[73].mxu0  ;;  %4386 = vrot.lane.b32.xlu1 %v4385_v6, %s4573_s17  ;;  %2634 = vmatmul.mubr.bf16.vlgmr.msra.gmra.mrb[0].mxu1 %v2338_v24  ;;  %v2012_v6 = vsel %vm1953_vm3, %v1893_v61, %v1894_v46 }
 0x1fe   : > { %v5883_v52 = vmax.f32 %v1539_v57, %v1661_v11  ;;  %v1397_v13 = vpop.f32.mrb[74].mxu0  ;;  %4031 = vmatprep.mubr.msk.bf16.mxu1 %vm888_vm2, %v2341_v60  ;;  %v1794_v51 = vrot.slane %v5875_v22, 2  ;;  %v2011_v57 = vsel %vm1953_vm3, %v1894_v46, %v1895_v45 }
 0x1ff   : > { %v1541_v34 = vmax.f32 %v1395_v16, 0.0  ;;  %v1398_v53 = vadd.f32 %v5497_v40, %v1397_v13  ;;  %v1399_v59 = vpop.f32.mrb[75].mxu0  ;;  %v4317_v48 = vpop.permute.xlu1 %4316  ;;  %v2343_v46 = vpack.c.bf16 %v2011_v57, %v2012_v6 }
 0x200   : > { %v4319_v20 = vunpack.i.h.bf16 %v4317_v48  ;;  %v4318_v21 = vunpack.i.l.bf16 %v4317_v48  ;;  %v1795_v17 = vrot.slane %v5883_v52, 2  ;;  %v1855_v32 = vsel %vm567_vm1, %v1793_v54, %v1794_v51 }
 0x201   : > { %v1605_v23 = vrot.slane %v1541_v34, 1  ;;  %v1542_v35 = vmax.f32 %v1398_v53, 0.0 }
 0x202   : > { %v1854_v24 = vsel %vm567_vm1, %v1794_v51, %v1795_v17  ;;  %v2276_v60 = vsel %vm888_vm2, %v5566_v55, %v4318_v21  ;;  %v2277_v11 = vsel %vm888_vm2, %v5602_v0, %v4319_v20  ;;  %v1896_v55 = vrot.slane %v5642_v62, 4 }
 0x203   : > { %v1660_v16 = vsel %vm438_vm0, %v1604_v5, %v1605_v23  ;;  %v1606_v25 = vrot.slane %v1542_v35, 1  ;;  %v4390_v13 = vpack.i.bf16 %v1854_v24, %v1855_v32  ;;  %v2340_v53 = vpack.c.bf16 %v2277_v11, %v2276_v60 }
 0x204   : > { %v5903_v59 = vmax.f32 %v1540_v26, %v1660_v16  ;;  %v1402_v61 = vpop.f32.mrb[76].mxu0  ;;  %v1897_v0 = vrot.slane %v5648_v3, 4 }
 0x205   : > { %v1659_v48 = vsel %vm438_vm0, %v1605_v23, %v1606_v25  ;;  %v1403_v54 = vadd.f32 %v5497_v40, %v1402_v61  ;;  %v1404_v51 = vpop.f32.mrb[77].mxu0  ;;  %4391 = vrot.lane.b32.xlu0 %v4390_v13, %s4573_s17  ;;  %2642 = vmatmul.mubr.bf16.gmra.mrb[4].mxu1 %v2340_v53  ;;  %v2010_v13 = vsel %vm1953_vm3, %v1895_v45, %v1896_v55 }
 0x206   : > { %v5911_v5 = vmax.f32 %v1541_v34, %v1659_v48  ;;  %v1405_v20 = vpop.f32.mrb[78].mxu0  ;;  %4032 = vmatprep.mubr.msk.bf16.mxu1 %vm888_vm2, %v2343_v46  ;;  %v1796_v26 = vrot.slane %v5903_v59, 2  ;;  %v2009_v34 = vsel %vm1953_vm3, %v1896_v55, %v1897_v0 }
 0x207   : > { %v1543_v21 = vmax.f32 %v1403_v54, 0.0  ;;  %v1406_v23 = vadd.f32 %v5497_v40, %v1405_v20  ;;  %v1407_v57 = vpop.f32.mrb[79].mxu0  ;;  %v4322_v6 = vpop.permute.xlu0 %4321  ;;  %v2345_v55 = vpack.c.bf16 %v2009_v34, %v2010_v13 }
 0x208   : > { %v4324_v24 = vunpack.i.h.bf16 %v4322_v6  ;;  %v4323_v32 = vunpack.i.l.bf16 %v4322_v6  ;;  %v1797_v60 = vrot.slane %v5911_v5, 2  ;;  %v1853_v61 = vsel %vm567_vm1, %v1795_v17, %v1796_v26 }
 0x209   : > { %v1607_v11 = vrot.slane %v1543_v21, 1  ;;  %v1544_v16 = vmax.f32 %v1406_v23, 0.0 }
 0x20a   : > { %v1852_v53 = vsel %vm567_vm1, %v1796_v26, %v1797_v60  ;;  %v2278_v46 = vsel %vm888_vm2, %v5609_v10, %v4323_v32  ;;  %v2279_v48 = vsel %vm888_vm2, %v5625_v31, %v4324_v24  ;;  %v1898_v10 = vrot.slane %v5659_v18, 4 }
 0x20b   : > { %v1658_v54 = vsel %vm438_vm0, %v1606_v25, %v1607_v11  ;;  %v1608_v51 = vrot.slane %v1544_v16, 1  ;;  %v4395_v20 = vpack.i.bf16 %v1852_v53, %v1853_v61  ;;  %v2342_v23 = vpack.c.bf16 %v2279_v48, %v2278_v46 }
 0x20c   : > { %v5931_v57 = vmax.f32 %v1542_v35, %v1658_v54  ;;  %v1410_v45 = vpop.f32.mrb[80].mxu0  ;;  %v1899_v31 = vrot.slane %v5665_v56, 4 }
 0x20d   : > { %v1657_v6 = vsel %vm438_vm0, %v1607_v11, %v1608_v51  ;;  %v1411_v17 = vadd.f32 %v5497_v40, %v1410_v45  ;;  %v1412_v26 = vpop.f32.mrb[81].mxu0  ;;  %4396 = vrot.lane.b32.xlu1 %v4395_v20, %s4573_s17  ;;  %2650 = vmatmul.mubr.bf16.gmra.mrb[8].mxu1 %v2342_v23  ;;  %v2008_v20 = vsel %vm1953_vm3, %v1897_v0, %v1898_v10 }
 0x20e   : > { %v5939_v25 = vmax.f32 %v1543_v21, %v1657_v6  ;;  %v1413_v24 = vpop.f32.mrb[82].mxu0  ;;  %4033 = vmatprep.mubr.msk.bf16.mxu1 %vm888_vm2, %v2345_v55  ;;  %v1798_v35 = vrot.slane %v5931_v57, 2  ;;  %v2007_v21 = vsel %vm1953_vm3, %v1898_v10, %v1899_v31 }
 0x20f   : > { %v1545_v32 = vmax.f32 %v1411_v17, 0.0  ;;  %v1414_v11 = vadd.f32 %v5497_v40, %v1413_v24  ;;  %v1415_v34 = vpop.f32.mrb[83].mxu0  ;;  %v4327_v13 = vpop.permute.xlu1 %4326  ;;  %v2347_v10 = vpack.c.bf16 %v2007_v21, %v2008_v20 }
 0x210   : > { %v4329_v53 = vunpack.i.h.bf16 %v4327_v13  ;;  %v4328_v61 = vunpack.i.l.bf16 %v4327_v13  ;;  %v1799_v46 = vrot.slane %v5939_v25, 2  ;;  %v1851_v40 = vsel %vm567_vm1, %v1797_v60, %v1798_v35 }
 0x211   : > { %v1609_v48 = vrot.slane %v1545_v32, 1  ;;  %v1546_v54 = vmax.f32 %v1414_v11, 0.0 }
 0x212   : > { %v1850_v23 = vsel %vm567_vm1, %v1798_v35, %v1799_v46  ;;  %v2280_v45 = vsel %vm888_vm2, %v5631_v36, %v4328_v61  ;;  %v2281_v55 = vsel %vm888_vm2, %v5642_v62, %v4329_v53  ;;  %v5966_v36 = vld [vmem:[%s7013_s2] ss:$0 sm:$0xff] }
 0x213   : > { %v1656_v6 = vsel %vm438_vm0, %v1608_v51, %v1609_v48  ;;  %v1610_v17 = vrot.slane %v1546_v54, 1  ;;  %v4400_v26 = vpack.i.bf16 %v1850_v23, %v1851_v40  ;;  %v2344_v24 = vpack.c.bf16 %v2281_v55, %v2280_v45 }
 0x214   : > { %v5959_v11 = vmax.f32 %v1544_v16, %v1656_v6  ;;  %v1418_v0 = vpop.f32.mrb[84].mxu0  ;;  %v1900_v51 = vrot.slane %v5676_v39, 4  ;;  %v1901_v16 = vrot.slane %v5682_v19, 4 }
 0x215   : > { %v1655_v34 = vsel %vm438_vm0, %v1609_v48, %v1610_v17  ;;  %v1419_v62 = vadd.f32 %v5966_v36, %v1418_v0  ;;  %v1420_v60 = vpop.f32.mrb[85].mxu0  ;;  %4401 = vrot.lane.b32.xlu0 %v4400_v26, %s4573_s17  ;;  %2658 = vmatmul.mubr.bf16.gmra.mrb[12].mxu1 %v2344_v24 }
 0x216   : > { %v5972_v35 = vmax.f32 %v1545_v32, %v1655_v34  ;;  %v1421_v13 = vpop.f32.mrb[86].mxu0  ;;  %4034 = vmatprep.mubr.msk.bf16.mxu1 %vm888_vm2, %v2347_v10  ;;  %v1800_v53 = vrot.slane %v5959_v11, 2  ;;  %v2005_v32 = vsel %vm1953_vm3, %v1900_v51, %v1901_v16  ;;  %v2006_v26 = vsel %vm1953_vm3, %v1899_v31, %v1900_v51 }
 0x217   : > { %v1547_v61 = vmax.f32 %v1419_v62, 0.0  ;;  %v1422_v48 = vadd.f32 %v5966_v36, %v1421_v13  ;;  %v1423_v21 = vpop.f32.mrb[87].mxu0  ;;  %v4332_v20 = vpop.permute.xlu0 %4331  ;;  %v2349_v51 = vpack.c.bf16 %v2005_v32, %v2006_v26 }
 0x218   : > { %v4334_v23 = vunpack.i.h.bf16 %v4332_v20  ;;  %v4333_v40 = vunpack.i.l.bf16 %v4332_v20  ;;  %v1801_v45 = vrot.slane %v5972_v35, 2  ;;  %v1849_v0 = vsel %vm567_vm1, %v1799_v46, %v1800_v53 }
 0x219   : > { %v1611_v55 = vrot.slane %v1547_v61, 1  ;;  %v1548_v6 = vmax.f32 %v1422_v48, 0.0 }
 0x21a   : > { %v1848_v24 = vsel %vm567_vm1, %v1800_v53, %v1801_v45  ;;  %v2282_v10 = vsel %vm888_vm2, %v5648_v3, %v4333_v40  ;;  %v2283_v34 = vsel %vm888_vm2, %v5659_v18, %v4334_v23  ;;  %v1902_v3 = vrot.slane %v5693_v43, 4 }
 0x21b   : > { %v1654_v62 = vsel %vm438_vm0, %v1610_v17, %v1611_v55  ;;  %v1612_v60 = vrot.slane %v1548_v6, 1  ;;  %v4405_v13 = vpack.i.bf16 %v1848_v24, %v1849_v0  ;;  %v2346_v48 = vpack.c.bf16 %v2283_v34, %v2282_v10 }
 0x21c   : > { %v5992_v21 = vmax.f32 %v1546_v54, %v1654_v62  ;;  %v1426_v31 = vpop.f32.mrb[88].mxu0  ;;  %v1903_v18 = vrot.slane %v5699_v9, 4 }
 0x21d   : > { %v1653_v20 = vsel %vm438_vm0, %v1611_v55, %v1612_v60  ;;  %v1427_v46 = vadd.f32 %v5966_v36, %v1426_v31  ;;  %v1428_v53 = vpop.f32.mrb[89].mxu0  ;;  %4406 = vrot.lane.b32.xlu1 %v4405_v13, %s4573_s17  ;;  %2666 = vmatmul.mubr.bf16.gmra.mrb[16].mxu1 %v2346_v48  ;;  %v2004_v13 = vsel %vm1953_vm3, %v1901_v16, %v1902_v3 }
 0x21e   : > { %v6000_v17 = vmax.f32 %v1547_v61, %v1653_v20  ;;  %v1429_v23 = vpop.f32.mrb[90].mxu0  ;;  %4035 = vmatprep.mubr.msk.bf16.mxu1 %vm888_vm2, %v2349_v51  ;;  %v1802_v54 = vrot.slane %v5992_v21, 2  ;;  %v2003_v61 = vsel %vm1953_vm3, %v1902_v3, %v1903_v18 }
 0x21f   : > { %v1549_v40 = vmax.f32 %v1427_v46, 0.0  ;;  %v1430_v55 = vadd.f32 %v5966_v36, %v1429_v23  ;;  %v1431_v32 = vpop.f32.mrb[91].mxu0  ;;  %v4337_v26 = vpop.permute.xlu1 %4336  ;;  %v2351_v3 = vpack.c.bf16 %v2003_v61, %v2004_v13 }
 0x220   : > { %v4339_v24 = vunpack.i.h.bf16 %v4337_v26  ;;  %v4338_v0 = vunpack.i.l.bf16 %v4337_v26  ;;  %v1803_v10 = vrot.slane %v6000_v17, 2  ;;  %v1847_v31 = vsel %vm567_vm1, %v1801_v45, %v1802_v54 }
 0x221   : > { %v1613_v34 = vrot.slane %v1549_v40, 1  ;;  %v1550_v62 = vmax.f32 %v1430_v55, 0.0 }
 0x222   : > { %v1846_v48 = vsel %vm567_vm1, %v1802_v54, %v1803_v10  ;;  %v2284_v51 = vsel %vm888_vm2, %v5665_v56, %v4338_v0  ;;  %v2285_v20 = vsel %vm888_vm2, %v5676_v39, %v4339_v24  ;;  %v1904_v56 = vrot.slane %v5710_v44, 4 }
 0x223   : > { %v1652_v46 = vsel %vm438_vm0, %v1612_v60, %v1613_v34  ;;  %v1614_v53 = vrot.slane %v1550_v62, 1  ;;  %v4410_v23 = vpack.i.bf16 %v1846_v48, %v1847_v31  ;;  %v2348_v55 = vpack.c.bf16 %v2285_v20, %v2284_v51 }
 0x224   : > { %v6020_v32 = vmax.f32 %v1548_v6, %v1652_v46  ;;  %v1434_v16 = vpop.f32.mrb[92].mxu0  ;;  %v1905_v39 = vrot.slane %v5716_v15, 4 }
 0x225   : > { %v1651_v26 = vsel %vm438_vm0, %v1613_v34, %v1614_v53  ;;  %v1435_v45 = vadd.f32 %v5966_v36, %v1434_v16  ;;  %v1436_v54 = vpop.f32.mrb[93].mxu0  ;;  %4411 = vrot.lane.b32.xlu0 %v4410_v23, %s4573_s17  ;;  %2674 = vmatmul.mubr.bf16.gmra.mrb[20].mxu1 %v2348_v55  ;;  %v2002_v23 = vsel %vm1953_vm3, %v1903_v18, %v1904_v56 }
 0x226   : > { %v6028_v60 = vmax.f32 %v1549_v40, %v1651_v26  ;;  %v1437_v24 = vpop.f32.mrb[94].mxu0  ;;  %4036 = vmatprep.mubr.msk.bf16.mxu1 %vm888_vm2, %v2351_v3  ;;  %v1804_v6 = vrot.slane %v6020_v32, 2  ;;  %v2001_v40 = vsel %vm1953_vm3, %v1904_v56, %v1905_v39 }
 0x227   : > { %v1551_v0 = vmax.f32 %v1435_v45, 0.0  ;;  %v1438_v34 = vadd.f32 %v5966_v36, %v1437_v24  ;;  %v1439_v61 = vpop.f32.mrb[95].mxu0  ;;  %v4342_v13 = vpop.permute.xlu0 %4341  ;;  %v2353_v56 = vpack.c.bf16 %v2001_v40, %v2002_v23 }
 0x228   : > { %v4344_v48 = vunpack.i.h.bf16 %v4342_v13  ;;  %v4343_v31 = vunpack.i.l.bf16 %v4342_v13  ;;  %v1805_v51 = vrot.slane %v6028_v60, 2  ;;  %v1845_v16 = vsel %vm567_vm1, %v1803_v10, %v1804_v6 }
 0x229   : > { %v1615_v20 = vrot.slane %v1551_v0, 1  ;;  %v1552_v46 = vmax.f32 %v1438_v34, 0.0 }
 0x22a   : > { %v1844_v55 = vsel %vm567_vm1, %v1804_v6, %v1805_v51  ;;  %v2286_v3 = vsel %vm888_vm2, %v5682_v19, %v4343_v31  ;;  %v2287_v26 = vsel %vm888_vm2, %v5693_v43, %v4344_v48  ;;  %v1906_v19 = vrot.slane %v5727_v37, 4 }
 0x22b   : > { %v1650_v45 = vsel %vm438_vm0, %v1614_v53, %v1615_v20  ;;  %v1616_v54 = vrot.slane %v1552_v46, 1  ;;  %v4415_v24 = vpack.i.bf16 %v1844_v55, %v1845_v16  ;;  %v2350_v34 = vpack.c.bf16 %v2287_v26, %v2286_v3 }
 0x22c   : > { %v6048_v61 = vmax.f32 %v1550_v62, %v1650_v45  ;;  %v1442_v18 = vpop.f32.mrb[96].mxu0  ;;  %v1907_v43 = vrot.slane %v5733_v49, 4 }
 0x22d   : > { %v1649_v13 = vsel %vm438_vm0, %v1615_v20, %v1616_v54  ;;  %v1443_v10 = vadd.f32 %v5966_v36, %v1442_v18  ;;  %v1444_v6 = vpop.f32.mrb[97].mxu0  ;;  %4416 = vrot.lane.b32.xlu1 %v4415_v24, %s4573_s17  ;;  %2682 = vmatmul.mubr.bf16.gmra.mrb[24].mxu1 %v2350_v34  ;;  %v2000_v24 = vsel %vm1953_vm3, %v1905_v39, %v1906_v19 }
 0x22e   : > { %v6056_v53 = vmax.f32 %v1551_v0, %v1649_v13  ;;  %v1445_v48 = vpop.f32.mrb[98].mxu0  ;;  %4037 = vmatprep.mubr.msk.bf16.mxu1 %vm888_vm2, %v2353_v56  ;;  %v1806_v62 = vrot.slane %v6048_v61, 2  ;;  %v1999_v0 = vsel %vm1953_vm3, %v1906_v19, %v1907_v43 }
 0x22f   : > { %v1553_v31 = vmax.f32 %v1443_v10, 0.0  ;;  %v1446_v20 = vadd.f32 %v5966_v36, %v1445_v48  ;;  %v1447_v40 = vpop.f32.mrb[99].mxu0  ;;  %v4347_v23 = vpop.permute.xlu1 %4346  ;;  %v2355_v19 = vpack.c.bf16 %v1999_v0, %v2000_v24 }
 0x230   : > { %v4349_v55 = vunpack.i.h.bf16 %v4347_v23  ;;  %v4348_v16 = vunpack.i.l.bf16 %v4347_v23  ;;  %v1807_v3 = vrot.slane %v6056_v53, 2  ;;  %v1843_v18 = vsel %vm567_vm1, %v1805_v51, %v1806_v62 }
 0x231   : > { %v1617_v26 = vrot.slane %v1553_v31, 1  ;;  %v1554_v45 = vmax.f32 %v1446_v20, 0.0 }
 0x232   : > { %v1842_v34 = vsel %vm567_vm1, %v1806_v62, %v1807_v3  ;;  %v2288_v56 = vsel %vm888_vm2, %v5699_v9, %v4348_v16  ;;  %v2289_v13 = vsel %vm888_vm2, %v5710_v44, %v4349_v55  ;;  %v1908_v9 = vrot.slane %v5744_v7, 4 }
 0x233   : > { %v1648_v10 = vsel %vm438_vm0, %v1616_v54, %v1617_v26  ;;  %v1618_v6 = vrot.slane %v1554_v45, 1  ;;  %v4420_v48 = vpack.i.bf16 %v1842_v34, %v1843_v18  ;;  %v2352_v20 = vpack.c.bf16 %v2289_v13, %v2288_v56 }
 0x234   : > { %v6076_v40 = vmax.f32 %v1552_v46, %v1648_v10  ;;  %v1450_v39 = vpop.f32.mrb[100].mxu0  ;;  %v1909_v44 = vrot.slane %v5750_v27, 4 }
 0x235   : > { %v1647_v23 = vsel %vm438_vm0, %v1617_v26, %v1618_v6  ;;  %v1451_v51 = vadd.f32 %v5966_v36, %v1450_v39  ;;  %v1452_v62 = vpop.f32.mrb[101].mxu0  ;;  %4421 = vrot.lane.b32.xlu0 %v4420_v48, %s4573_s17  ;;  %2690 = vmatmul.mubr.bf16.gmra.mrb[28].mxu1 %v2352_v20  ;;  %v1998_v48 = vsel %vm1953_vm3, %v1907_v43, %v1908_v9 }
 0x236   : > { %v6084_v54 = vmax.f32 %v1553_v31, %v1647_v23  ;;  %v1453_v55 = vpop.f32.mrb[102].mxu0  ;;  %4038 = vmatprep.mubr.msk.bf16.mxu1 %vm888_vm2, %v2355_v19  ;;  %v1808_v46 = vrot.slane %v6076_v40, 2  ;;  %v1997_v31 = vsel %vm1953_vm3, %v1908_v9, %v1909_v44 }
 0x237   : > { %v1555_v16 = vmax.f32 %v1451_v51, 0.0  ;;  %v1454_v26 = vadd.f32 %v5966_v36, %v1453_v55  ;;  %v1455_v0 = vpop.f32.mrb[103].mxu0  ;;  %v4352_v24 = vpop.permute.xlu0 %4351  ;;  %v2357_v9 = vpack.c.bf16 %v1997_v31, %v1998_v48 }
 0x238   : > { %v4354_v34 = vunpack.i.h.bf16 %v4352_v24  ;;  %v4353_v18 = vunpack.i.l.bf16 %v4352_v24  ;;  %v1809_v56 = vrot.slane %v6084_v54, 2  ;;  %v1841_v39 = vsel %vm567_vm1, %v1807_v3, %v1808_v46 }
 0x239   : > { %v1619_v13 = vrot.slane %v1555_v16, 1  ;;  %v1556_v10 = vmax.f32 %v1454_v26, 0.0 }
 0x23a   : > { %v1840_v20 = vsel %vm567_vm1, %v1808_v46, %v1809_v56  ;;  %v2290_v19 = vsel %vm888_vm2, %v5716_v15, %v4353_v18  ;;  %v2291_v23 = vsel %vm888_vm2, %v5727_v37, %v4354_v34  ;;  %v1910_v15 = vrot.slane %v5761_v50, 4 }
 0x23b   : > { %v1646_v51 = vsel %vm438_vm0, %v1618_v6, %v1619_v13  ;;  %v1620_v62 = vrot.slane %v1556_v10, 1  ;;  %v4425_v55 = vpack.i.bf16 %v1840_v20, %v1841_v39  ;;  %v2354_v26 = vpack.c.bf16 %v2291_v23, %v2290_v19 }
 0x23c   : > { %v6104_v0 = vmax.f32 %v1554_v45, %v1646_v51  ;;  %v1458_v43 = vpop.f32.mrb[104].mxu0  ;;  %v1911_v37 = vrot.slane %v5767_v2, 4 }
 0x23d   : > { %v1645_v24 = vsel %vm438_vm0, %v1619_v13, %v1620_v62  ;;  %v1459_v3 = vadd.f32 %v5966_v36, %v1458_v43  ;;  %v1460_v46 = vpop.f32.mrb[105].mxu0  ;;  %4426 = vrot.lane.b32.xlu1 %v4425_v55, %s4573_s17  ;;  %2698 = vmatmul.mubr.bf16.gmra.mrb[32].mxu1 %v2354_v26  ;;  %v1996_v55 = vsel %vm1953_vm3, %v1909_v44, %v1910_v15 }
 0x23e   : > { %v6112_v6 = vmax.f32 %v1555_v16, %v1645_v24  ;;  %v1461_v34 = vpop.f32.mrb[106].mxu0  ;;  %4039 = vmatprep.mubr.msk.bf16.mxu1 %vm888_vm2, %v2357_v9  ;;  %v1810_v45 = vrot.slane %v6104_v0, 2  ;;  %v1995_v16 = vsel %vm1953_vm3, %v1910_v15, %v1911_v37 }
 0x23f   : > { %v1557_v18 = vmax.f32 %v1459_v3, 0.0  ;;  %v1462_v13 = vadd.f32 %v5966_v36, %v1461_v34  ;;  %v1463_v31 = vpop.f32.mrb[107].mxu0  ;;  %v4357_v48 = vpop.permute.xlu1 %4356  ;;  %v2359_v15 = vpack.c.bf16 %v1995_v16, %v1996_v55 }
 0x240   : > { %v4359_v20 = vunpack.i.h.bf16 %v4357_v48  ;;  %v4358_v39 = vunpack.i.l.bf16 %v4357_v48  ;;  %v1811_v19 = vrot.slane %v6112_v6, 2  ;;  %v1839_v43 = vsel %vm567_vm1, %v1809_v56, %v1810_v45 }
 0x241   : > { %v1621_v23 = vrot.slane %v1557_v18, 1  ;;  %v1558_v51 = vmax.f32 %v1462_v13, 0.0 }
 0x242   : > { %v1838_v26 = vsel %vm567_vm1, %v1810_v45, %v1811_v19  ;;  %v2292_v9 = vsel %vm888_vm2, %v5733_v49, %v4358_v39  ;;  %v2293_v24 = vsel %vm888_vm2, %v5744_v7, %v4359_v20  ;;  %v1912_v49 = vrot.slane %v5778_v14, 4 }
 0x243   : > { %v1644_v3 = vsel %vm438_vm0, %v1620_v62, %v1621_v23  ;;  %v1622_v46 = vrot.slane %v1558_v51, 1  ;;  %v4430_v34 = vpack.i.bf16 %v1838_v26, %v1839_v43  ;;  %v2356_v13 = vpack.c.bf16 %v2293_v24, %v2292_v9 }
 0x244   : > { %v6132_v31 = vmax.f32 %v1556_v10, %v1644_v3  ;;  %v1466_v44 = vpop.f32.mrb[108].mxu0  ;;  %v1913_v7 = vrot.slane %v5784_v41, 4 }
 0x245   : > { %v1643_v48 = vsel %vm438_vm0, %v1621_v23, %v1622_v46  ;;  %v1467_v56 = vadd.f32 %v5966_v36, %v1466_v44  ;;  %v1468_v45 = vpop.f32.mrb[109].mxu0  ;;  %4431 = vrot.lane.b32.xlu0 %v4430_v34, %s4573_s17  ;;  %2706 = vmatmul.mubr.bf16.gmra.mrb[36].mxu1 %v2356_v13  ;;  %v1994_v34 = vsel %vm1953_vm3, %v1911_v37, %v1912_v49 }
 0x246   : > { %v6140_v62 = vmax.f32 %v1557_v18, %v1643_v48  ;;  %v1469_v20 = vpop.f32.mrb[110].mxu0  ;;  %4040 = vmatprep.mubr.msk.bf16.mxu1 %vm888_vm2, %v2359_v15  ;;  %v1812_v10 = vrot.slane %v6132_v31, 2  ;;  %v1993_v18 = vsel %vm1953_vm3, %v1912_v49, %v1913_v7 }
 0x247   : > { %v1559_v39 = vmax.f32 %v1467_v56, 0.0  ;;  %v1470_v23 = vadd.f32 %v5966_v36, %v1469_v20  ;;  %v1471_v16 = vpop.f32.mrb[111].mxu0  ;;  %v4362_v55 = vpop.permute.xlu0 %4361  ;;  %v2361_v49 = vpack.c.bf16 %v1993_v18, %v1994_v34 }
 0x248   : > { %v4364_v26 = vunpack.i.h.bf16 %v4362_v55  ;;  %v4363_v43 = vunpack.i.l.bf16 %v4362_v55  ;;  %v1813_v9 = vrot.slane %v6140_v62, 2  ;;  %v1837_v44 = vsel %vm567_vm1, %v1811_v19, %v1812_v10 }
 0x249   : > { %v1623_v24 = vrot.slane %v1559_v39, 1  ;;  %v1560_v3 = vmax.f32 %v1470_v23, 0.0 }
 0x24a   : > { %v1836_v13 = vsel %vm567_vm1, %v1812_v10, %v1813_v9  ;;  %v2294_v15 = vsel %vm888_vm2, %v5750_v27, %v4363_v43  ;;  %v2295_v48 = vsel %vm888_vm2, %v5761_v50, %v4364_v26  ;;  %v1914_v27 = vrot.slane %v5795_v33, 4 }
 0x24b   : > { %v1642_v56 = vsel %vm438_vm0, %v1622_v46, %v1623_v24  ;;  %v1624_v45 = vrot.slane %v1560_v3, 1  ;;  %v4435_v20 = vpack.i.bf16 %v1836_v13, %v1837_v44  ;;  %v2358_v23 = vpack.c.bf16 %v2295_v48, %v2294_v15 }
 0x24c   : > { %v6160_v16 = vmax.f32 %v1558_v51, %v1642_v56  ;;  %v1474_v37 = vpop.f32.mrb[112].mxu0  ;;  %v1915_v50 = vrot.slane %v5801_v58, 4 }
 0x24d   : > { %v1641_v55 = vsel %vm438_vm0, %v1623_v24, %v1624_v45  ;;  %v1475_v19 = vadd.f32 %v5966_v36, %v1474_v37  ;;  %v1476_v10 = vpop.f32.mrb[113].mxu0  ;;  %4436 = vrot.lane.b32.xlu1 %v4435_v20, %s4573_s17  ;;  %2714 = vmatmul.mubr.bf16.gmra.mrb[40].mxu1 %v2358_v23  ;;  %v1992_v20 = vsel %vm1953_vm3, %v1913_v7, %v1914_v27 }
 0x24e   : > { %v6168_v46 = vmax.f32 %v1559_v39, %v1641_v55  ;;  %v1477_v26 = vpop.f32.mrb[114].mxu0  ;;  %4041 = vmatprep.mubr.msk.bf16.mxu1 %vm888_vm2, %v2361_v49  ;;  %v1814_v51 = vrot.slane %v6160_v16, 2  ;;  %v1991_v39 = vsel %vm1953_vm3, %v1914_v27, %v1915_v50 }
 0x24f   : > { %v1561_v43 = vmax.f32 %v1475_v19, 0.0  ;;  %v1478_v24 = vadd.f32 %v5966_v36, %v1477_v26  ;;  %v1479_v18 = vpop.f32.mrb[115].mxu0  ;;  %v4367_v34 = vpop.permute.xlu1 %4366  ;;  %v2363_v27 = vpack.c.bf16 %v1991_v39, %v1992_v20 }
 0x250   : > { %v4369_v13 = vunpack.i.h.bf16 %v4367_v34  ;;  %v4368_v44 = vunpack.i.l.bf16 %v4367_v34  ;;  %v1815_v15 = vrot.slane %v6168_v46, 2  ;;  %v1835_v37 = vsel %vm567_vm1, %v1813_v9, %v1814_v51 }
 0x251   : > { %v1625_v48 = vrot.slane %v1561_v43, 1  ;;  %v1562_v56 = vmax.f32 %v1478_v24, 0.0 }
 0x252   : > { %v1834_v23 = vsel %vm567_vm1, %v1814_v51, %v1815_v15  ;;  %v2296_v49 = vsel %vm888_vm2, %v5767_v2, %v4368_v44  ;;  %v2297_v55 = vsel %vm888_vm2, %v5778_v14, %v4369_v13  ;;  %v1916_v2 = vrot.slane %v5812_v28, 4 }
 0x253   : > { %v1640_v19 = vsel %vm438_vm0, %v1624_v45, %v1625_v48  ;;  %v1626_v10 = vrot.slane %v1562_v56, 1  ;;  %v4440_v26 = vpack.i.bf16 %v1834_v23, %v1835_v37  ;;  %v2360_v24 = vpack.c.bf16 %v2297_v55, %v2296_v49 }
 0x254   : > { %v6188_v18 = vmax.f32 %v1560_v3, %v1640_v19  ;;  %v1482_v7 = vpop.f32.mrb[116].mxu0  ;;  %v1917_v14 = vrot.slane %v5818_v29, 4 }
 0x255   : > { %v1639_v34 = vsel %vm438_vm0, %v1625_v48, %v1626_v10  ;;  %v1483_v9 = vadd.f32 %v5966_v36, %v1482_v7  ;;  %v1484_v51 = vpop.f32.mrb[117].mxu0  ;;  %4441 = vrot.lane.b32.xlu0 %v4440_v26, %s4573_s17  ;;  %2722 = vmatmul.mubr.bf16.gmra.mrb[44].mxu1 %v2360_v24  ;;  %v1990_v26 = vsel %vm1953_vm3, %v1915_v50, %v1916_v2 }
 0x256   : > { %v6196_v45 = vmax.f32 %v1561_v43, %v1639_v34  ;;  %v1485_v13 = vpop.f32.mrb[118].mxu0  ;;  %4042 = vmatprep.mubr.msk.bf16.mxu1 %vm888_vm2, %v2363_v27  ;;  %v1816_v3 = vrot.slane %v6188_v18, 2  ;;  %v1989_v43 = vsel %vm1953_vm3, %v1916_v2, %v1917_v14 }
 0x257   : > { %v1563_v44 = vmax.f32 %v1483_v9, 0.0  ;;  %v1486_v48 = vadd.f32 %v5966_v36, %v1485_v13  ;;  %v1487_v39 = vpop.f32.mrb[119].mxu0  ;;  %v4372_v20 = vpop.permute.xlu0 %4371  ;;  %v2365_v2 = vpack.c.bf16 %v1989_v43, %v1990_v26 }
 0x258   : > { %v4374_v23 = vunpack.i.h.bf16 %v4372_v20  ;;  %v4373_v37 = vunpack.i.l.bf16 %v4372_v20  ;;  %v1817_v49 = vrot.slane %v6196_v45, 2  ;;  %v1833_v7 = vsel %vm567_vm1, %v1815_v15, %v1816_v3 }
 0x259   : > { %v1627_v55 = vrot.slane %v1563_v44, 1  ;;  %v1564_v19 = vmax.f32 %v1486_v48, 0.0 }
 0x25a   : > { %v1832_v24 = vsel %vm567_vm1, %v1816_v3, %v1817_v49  ;;  %v2298_v27 = vsel %vm888_vm2, %v5784_v41, %v4373_v37  ;;  %v2299_v34 = vsel %vm888_vm2, %v5795_v33, %v4374_v23  ;;  %v1918_v41 = vrot.slane %v5829_v47, 4 }
 0x25b   : > { %v1638_v9 = vsel %vm438_vm0, %v1626_v10, %v1627_v55  ;;  %v1628_v51 = vrot.slane %v1564_v19, 1  ;;  %v4445_v13 = vpack.i.bf16 %v1832_v24, %v1833_v7  ;;  %v2362_v48 = vpack.c.bf16 %v2299_v34, %v2298_v27 }
 0x25c   : > { %v6216_v39 = vmax.f32 %v1562_v56, %v1638_v9  ;;  %v1490_v50 = vpop.f32.mrb[120].mxu0  ;;  %v1919_v33 = vrot.slane %v5835_v30, 4 }
 0x25d   : > { %v1637_v20 = vsel %vm438_vm0, %v1627_v55, %v1628_v51  ;;  %v1491_v15 = vadd.f32 %v5966_v36, %v1490_v50  ;;  %v1492_v3 = vpop.f32.mrb[121].mxu0  ;;  %4446 = vrot.lane.b32.xlu1 %v4445_v13, %s4573_s17  ;;  %2730 = vmatmul.mubr.bf16.gmra.mrb[48].mxu1 %v2362_v48  ;;  %v1988_v13 = vsel %vm1953_vm3, %v1917_v14, %v1918_v41 }
 0x25e   : > { %v6224_v10 = vmax.f32 %v1563_v44, %v1637_v20  ;;  %v1493_v23 = vpop.f32.mrb[122].mxu0  ;;  %4043 = vmatprep.mubr.msk.bf16.mxu1 %vm888_vm2, %v2365_v2  ;;  %v1818_v56 = vrot.slane %v6216_v39, 2  ;;  %v1987_v44 = vsel %vm1953_vm3, %v1918_v41, %v1919_v33 }
 0x25f   : > { %v1565_v37 = vmax.f32 %v1491_v15, 0.0  ;;  %v1494_v55 = vadd.f32 %v5966_v36, %v1493_v23  ;;  %v1495_v43 = vpop.f32.mrb[123].mxu0  ;;  %v4377_v26 = vpop.permute.xlu1 %4376  ;;  %v2367_v41 = vpack.c.bf16 %v1987_v44, %v1988_v13 }
 0x260   : > { %v4379_v24 = vunpack.i.h.bf16 %v4377_v26  ;;  %v4378_v7 = vunpack.i.l.bf16 %v4377_v26  ;;  %v1819_v27 = vrot.slane %v6224_v10, 2  ;;  %v1831_v50 = vsel %vm567_vm1, %v1817_v49, %v1818_v56 }
 0x261   : > { %v1629_v34 = vrot.slane %v1565_v37, 1  ;;  %v1566_v9 = vmax.f32 %v1494_v55, 0.0 }
 0x262   : > { %v1830_v48 = vsel %vm567_vm1, %v1818_v56, %v1819_v27  ;;  %v2300_v2 = vsel %vm888_vm2, %v5801_v58, %v4378_v7  ;;  %v2301_v20 = vsel %vm888_vm2, %v5812_v28, %v4379_v24  ;;  %v1920_v58 = vrot.slane %v5846_v8, 4 }
 0x263   : > { %v1636_v15 = vsel %vm438_vm0, %v1628_v51, %v1629_v34  ;;  %v1630_v3 = vrot.slane %v1566_v9, 1  ;;  %v4450_v23 = vpack.i.bf16 %v1830_v48, %v1831_v50  ;;  %v2364_v55 = vpack.c.bf16 %v2301_v20, %v2300_v2 }
 0x264   : > { %v6244_v43 = vmax.f32 %v1564_v19, %v1636_v15  ;;  %v1498_v14 = vpop.f32.mrb[124].mxu0  ;;  %v1921_v28 = vrot.slane %v5854_v42, 4  ;;  %v4496_v19 = vld [vmem:[%s7017_s6] sm:$0xff]  }
 0x265   : > { %v1635_v26 = vsel %vm438_vm0, %v1629_v34, %v1630_v3  ;;  %v1499_v49 = vadd.f32 %v5966_v36, %v1498_v14  ;;  %v1500_v56 = vpop.f32.mrb[125].mxu0  ;;  %4451 = vrot.lane.b32.xlu0 %v4450_v23, %s4573_s17  ;;  %2738 = vmatmul.mubr.bf16.gmra.mrb[52].mxu1 %v2364_v55  ;;  %v1986_v55 = vsel %vm1953_vm3, %v1919_v33, %v1920_v58 }
 0x266   : > { %v6255_v51 = vmax.f32 %v1565_v37, %v1635_v26  ;;  %v1501_v24 = vpop.f32.mrb[126].mxu0  ;;  %4044 = vmatprep.mubr.msk.bf16.mxu1 %vm888_vm2, %v2367_v41  ;;  %v1820_v7 = vrot.slane %v6244_v43, 2  ;;  %4087 = vmatprep.subr.bf16.mxu0 %v4496_v19  ;;  %v1985_v37 = vsel %vm1953_vm3, %v1920_v58, %v1921_v28 }
 0x267   : > { %v1567_v34 = vmax.f32 %v1499_v49, 0.0  ;;  %v1502_v44 = vadd.f32 %v5966_v36, %v1501_v24  ;;  %v1503_v13 = vpop.f32.mrb[127].mxu0  ;;  %v4382_v48 = vpop.permute.xlu0 %4381  ;;  %4088 = vmatpush3.bf16.msra.mxu0 %v4496_v19  ;;  %v2369_v33 = vpack.c.bf16 %v1985_v37, %v1986_v55 }
 0x268   : > { %v4384_v50 = vunpack.i.h.bf16 %v4382_v48  ;;  %v4383_v2 = vunpack.i.l.bf16 %v4382_v48  ;;  %v1821_v20 = vrot.slane %v6255_v51, 2  ;;  %v1829_v36 = vsel %vm567_vm1, %v1819_v27, %v1820_v7 }
 0x269   : > { %v1631_v15 = vrot.slane %v1567_v34, 1  ;;  %v1568_v23 = vmax.f32 %v1502_v44, 0.0 }
 0x26a   : > { %v1828_v14 = vsel %vm567_vm1, %v1820_v7, %v1821_v20  ;;  %v2302_v41 = vsel %vm888_vm2, %v5818_v29, %v4383_v2  ;;  %v2303_v26 = vsel %vm888_vm2, %v5829_v47, %v4384_v50 }
 0x26b   : > { %v1634_v49 = vsel %vm438_vm0, %v1630_v3, %v1631_v15  ;;  %v1632_v56 = vrot.slane %v1568_v23, 1  ;;  %v4455_v19 = vpack.i.bf16 %v1828_v14, %v1829_v36  ;;  %v2366_v24 = vpack.c.bf16 %v2303_v26, %v2302_v41 }
 0x26c   : > { %v6275_v44 = vmax.f32 %v1566_v9, %v1634_v49  ;;  %v1923_v9 = vrot.slane %v5883_v52, 4  ;;  %v1925_v49 = vrot.slane %v5911_v5, 4 }
 0x26d   : > { %v1633_v58 = vsel %vm438_vm0, %v1631_v15, %v1632_v56  ;;  %v1696_v27 = vsel %vm438_vm0, %v1632_v56, %v5525_v12  ;;  %4456 = vrot.lane.b32.xlu1 %v4455_v19, %s4573_s17  ;;  %2746 = vmatmul.mubr.bf16.gmra.mrb[56].mxu1 %v2366_v24  ;;  %v1922_v12 = vrot.slane %v5875_v22, 4  ;;  %v2954_v19 = vld [vmem:[%s7016_s5] sm:$0xff] }
 0x26e   : > { %v6283_v29 = vmax.f32 %v1567_v34, %v1633_v58  ;;  %v6285_v47 = vmax.f32 %v1568_v23, %v1696_v27  ;;  %4045 = vmatprep.mubr.msk.bf16.mxu1 %vm888_vm2, %v2369_v33  ;;  %v1822_v7 = vrot.slane %v6275_v44, 2  ;;  %v1924_v33 = vrot.slane %v5903_v59, 4 }
 0x26f   : > { %v4387_v3 = vpop.permute.xlu1 %4386  ;;  %v1983_v37 = vsel %vm1953_vm3, %v1922_v12, %v1923_v9 }
 0x270   : > { %v1824_v13 = vrot.slane %v6285_v47, 2  ;;  %v4389_v48 = vunpack.i.h.bf16 %v4387_v3  ;;  %v4388_v50 = vunpack.i.l.bf16 %v4387_v3  ;;  %v1823_v2 = vrot.slane %v6283_v29, 2 }
 0x271   : > { %v1827_v36 = vsel %vm567_vm1, %v1821_v20, %v1822_v7  ;;  %v2955_v20 = vld [vmem:[%s7016_s5 + $0x8] sm:$0xff]  ;;  %v1981_v3 = vsel %vm1953_vm3, %v1924_v33, %v1925_v49 }
 0x272   : > { %v1888_v34 = vsel %vm567_vm1, %v1824_v13, %v1761_v38  ;;  %v2304_v15 = vsel %vm888_vm2, %v5835_v30, %v4388_v50  ;;  %v2305_v23 = vsel %vm888_vm2, %v5846_v8, %v4389_v48  ;;  %v1825_v55 = vsel %vm567_vm1, %v1823_v2, %v1824_v13  ;;  %v2957_v13 = vld [vmem:[%s7016_s5 + $0x18] sm:$0xff] }
 0x273   : > { %v1826_v14 = vsel %vm567_vm1, %v1822_v7, %v1823_v2  ;;  %v2368_v41 = vpack.c.bf16 %v2305_v23, %v2304_v15  ;;  %v4465_v38 = vpack.i.bf16 %v1888_v34, %v1825_v55  ;;  %v1984_v30 = vsel %vm1953_vm3, %v1921_v28, %v1922_v12  ;;  %v2956_v7 = vld [vmem:[%s7016_s5 + $0x10] sm:$0xff]  ;;  %v2970_v2 = vld [vmem:[%s7016_s5 + $0x80] sm:$0xff]  ;;  %v2971_v34 = vld [vmem:[%s7016_s5 + $0x88] sm:$0xff] }
 0x274   : > { %v4460_v26 = vpack.i.bf16 %v1826_v14, %v1827_v36  ;;  %v2371_v8 = vpack.c.bf16 %v1983_v37, %v1984_v30  ;;  %v1982_v50 = vsel %vm1953_vm3, %v1923_v9, %v1924_v33  ;;  %v1926_v9 = vrot.slane %v5931_v57, 4  ;;  %v2972_v36 = vld [vmem:[%s7016_s5 + $0x90] sm:$0xff] }
 0x275   : > { %2754 = vmatmul.mubr.bf16.gmra.mrb[60].mxu1 %v2368_v41  ;;  %4466 = vrot.lane.b32.xlu1 %v4465_v38, %s4573_s17  ;;  %v2973_v41 = vld [vmem:[%s7016_s5 + $0x98] sm:$0xff] }
 0x276   : > { %4461 = vrot.lane.b32.xlu0 %v4460_v26, %s4573_s17  ;;  %4046 = vmatprep.mubr.msk.bf16.mxu1 %vm888_vm2, %v2371_v8  ;;  %v1980_v26 = vsel %vm1953_vm3, %v1925_v49, %v1926_v9  ;;  %v2958_v8 = vld [vmem:[%s7016_s5 + $0x20] sm:$0xff]  ;;  %v1928_v49 = vrot.slane %v5959_v11, 4  ;;  %s3969_s17 = sshll.u32 %s297_s22, 5 }
 0x277   : > { %v4392_v56 = vpop.permute.xlu0 %4391  ;;  %s299_s25 = scalar_lea.vmem [#allocation2], %s3969_s17  ;;  %s4514_s17 = scalar_lea.vmem %s4513_s21, 1024 }
 0x278   : > { %v4394_v28 = vunpack.i.h.bf16 %v4392_v56  ;;  %v4393_v24 = vunpack.i.l.bf16 %v4392_v56  ;;  %v2959_v56 = vld [vmem:[%s7016_s5 + $0x28] sm:$0xff]  ;;  %s3903_s26 = sshll.u32 %s299_s25, 4  ;;  %s6963_s26 = int_to_ptr.vmem [resolvable:$true] %s3903_s26 }
 0x279   : > { %3025 = vperm.xlu1 %4471, %v2955_v20   ;;  %s4508_s19 = scalar_lea.vmem %s6963_s26, 512  ;;  %p4515_p0 = scmp.lt.s32.totalorder %s6963_s26, %s4513_s21 }
 0x27a   : > { %3020 = vperm.xlu0 %4470, %v2954_v19   ;;  %v2306_v58 = vsel %vm888_vm2, %v5854_v42, %v4393_v24  ;;  %v2307_v27 = vsel %vm888_vm2, %v5875_v22, %v4394_v28  ;;  %v2373_v42 = vpack.c.bf16 %v1981_v3, %v1982_v50  ;;  %v1927_v22 = vrot.slane %v5939_v25, 4  ;;  %v2987_v50 = vld [vmem:[%s7016_s5 + $0x108] sm:$0xff]  ;;  %p4509_p11 = scmp.ne.s32.totalorder %s6963_s26, %s4508_s19  ;;  %p4516_p1 = scmp.lt.s32.totalorder %s4514_s17, %s4508_s19 }
 0x27b   : > { %v2370_v48 = vpack.c.bf16 %v2307_v27, %v2306_v58  ;;  %v2974_v58 = vld [vmem:[%s7016_s5 + $0xa0] sm:$0xff]  ;;  %v2975_v27 = vld [vmem:[%s7016_s5 + $0xa8] sm:$0xff] }
 0x27c   : > { %v1979_v14 = vsel %vm1953_vm3, %v1926_v9, %v1927_v22  ;;  %v2988_v9 = vld [vmem:[%s7016_s5 + $0x110] sm:$0xff]  ;;  %p4510_p12 = pnand %p4509_p11, %p4660_p5  ;;  %p4517_p2 = por %p4516_p1, %p4515_p0 }
 0x27d   : > { %2762 = vmatmul.mubr.bf16.gmra.mrb[64].mxu1 %v2370_v48  ;;  %3030 = vperm.xlu1 %4471, %v2956_v7   ;;  %v1978_v7 = vsel %vm1953_vm3, %v1927_v22, %v1928_v49  ;;  %v2986_v48 = vld [vmem:[%s7016_s5 + $0x100] sm:$0xff]  ;;  %v1930_v22 = vrot.slane %v5992_v21, 4 }
 0x27e   : > { %3035 = vperm.xlu0 %4470, %v2957_v13   ;;  %4047 = vmatprep.mubr.msk.bf16.mxu1 %vm888_vm2, %v2373_v42  ;;  %p4511_p13 = pneg %p4510_p12 }
 0x27f   : > { %v4397_v12 = vpop.permute.xlu1 %4396 }
 0x280   : > { %v4399_v15 = vunpack.i.h.bf16 %v4397_v12  ;;  %v4398_v23 = vunpack.i.l.bf16 %v4397_v12  ;;  %p4518_p3 = pnand %p4517_p2, %p4511_p13 }
 0x281   : > { %3100 = vperm.xlu1 %4471, %v2970_v2  }
 0x282   : > { %3105 = vperm.xlu0 %4470, %v2971_v34   ;;  %v2308_v37 = vsel %vm888_vm2, %v5883_v52, %v4398_v23  ;;  %v2309_v55 = vsel %vm888_vm2, %v5903_v59, %v4399_v15  ;;  %v2375_v52 = vpack.c.bf16 %v1979_v14, %v1980_v26  ;;  %v1929_v59 = vrot.slane %v5972_v35, 4  ;;  %v4497_v23 = vld [vmem:[%s7017_s6 + $0x8] sm:$0xff]  }
 0x283   : > { %v2372_v38 = vpack.c.bf16 %v2309_v55, %v2308_v37  ;;  %v2989_v37 = vld [vmem:[%s7016_s5 + $0x118] sm:$0xff]  ;;  %4089 = vmatprep.subr.bf16.mxu0 %v4497_v23  ;;  %v1933_v14 = vrot.slane %v6028_v60, 4 }
 0x284   : > { %v1977_v33 = vsel %vm1953_vm3, %v1928_v49, %v1929_v59  ;;  %4090 = vmatpush3.bf16.msra.mxu0 %v4497_v23 }
 0x285   : > { %2770 = vmatmul.mubr.bf16.gmra.mrb[68].mxu1 %v2372_v38  ;;  %3110 = vperm.xlu1 %4471, %v2972_v36   ;;  %v3003_v38 = vld [vmem:[%s7016_s5 + $0x188] sm:$0xff] }
 0x286   : > { %3115 = vperm.xlu0 %4470, %v2973_v41   ;;  %4048 = vmatprep.mubr.msk.bf16.mxu1 %vm888_vm2, %v2375_v52  ;;  %v3002_v41 = vld [vmem:[%s7016_s5 + $0x180] sm:$0xff] }
 0x287   : > { %v4402_v30 = vpop.permute.xlu0 %4401 }
 0x288   : > { %v4404_v20 = vunpack.i.h.bf16 %v4402_v30  ;;  %v4403_v19 = vunpack.i.l.bf16 %v4402_v30 }
 0x289   : > { %3040 = vperm.xlu1 %4471, %v2958_v8  }
 0x28a   : > { %3045 = vperm.xlu0 %4470, %v2959_v56   ;;  %v2310_v28 = vsel %vm888_vm2, %v5911_v5, %v4403_v19  ;;  %v2311_v24 = vsel %vm888_vm2, %v5931_v57, %v4404_v20  ;;  %v2377_v5 = vpack.c.bf16 %v1977_v33, %v1978_v7  ;;  %v1931_v57 = vrot.slane %v6000_v17, 4  ;;  %v3004_v20 = vld [vmem:[%s7016_s5 + $0x190] sm:$0xff]  ;;  %v3005_v19 = vld [vmem:[%s7016_s5 + $0x198] sm:$0xff] }
 0x28b   : > { %v2374_v3 = vpack.c.bf16 %v2311_v24, %v2310_v28  ;;  %v2960_v33 = vld [vmem:[%s7016_s5 + $0x30] sm:$0xff]  ;;  %v1934_v7 = vrot.slane %v6048_v61, 4 }
 0x28c   : > { %v1975_v15 = vsel %vm1953_vm3, %v1930_v22, %v1931_v57 }
 0x28d   : > { %2778 = vmatmul.mubr.bf16.gmra.mrb[72].mxu1 %v2374_v3  ;;  %3120 = vperm.xlu1 %4471, %v2974_v58   ;;  %v2961_v58 = vld [vmem:[%s7016_s5 + $0x38] sm:$0xff] }
 0x28e   : > { %3125 = vperm.xlu0 %4470, %v2975_v27   ;;  %4049 = vmatprep.mubr.msk.bf16.mxu1 %vm888_vm2, %v2377_v5 }
 0x28f   : > { %v4407_v13 = vpop.permute.xlu1 %4406 }
 0x290   : > { %v4409_v42 = vunpack.i.h.bf16 %v4407_v13  ;;  %v4408_v12 = vunpack.i.l.bf16 %v4407_v13 }
 0x291   : > { %3180 = vperm.xlu1 %4471, %v2986_v48   ;;  %v2976_v48 = vld [vmem:[%s7016_s5 + $0xb0] sm:$0xff] }
 0x292   : > { %3185 = vperm.xlu0 %4470, %v2987_v50   ;;  %v2312_v2 = vsel %vm888_vm2, %v5939_v25, %v4408_v12  ;;  %v2313_v34 = vsel %vm888_vm2, %v5959_v11, %v4409_v42  ;;  %v1976_v25 = vsel %vm1953_vm3, %v1929_v59, %v1930_v22  ;;  %v1932_v59 = vrot.slane %v6020_v32, 4  ;;  %v2977_v50 = vld [vmem:[%s7016_s5 + $0xb8] sm:$0xff] }
 0x293   : > { %v2376_v55 = vpack.c.bf16 %v2313_v34, %v2312_v2  ;;  %v2379_v11 = vpack.c.bf16 %v1975_v15, %v1976_v25  ;;  %v1972_v12 = vsel %vm1953_vm3, %v1933_v14, %v1934_v7  ;;  %v2990_v2 = vld [vmem:[%s7016_s5 + $0x120] sm:$0xff]  ;;  %v2991_v34 = vld [vmem:[%s7016_s5 + $0x128] sm:$0xff] }
 0x294   : > { %v1973_v56 = vsel %vm1953_vm3, %v1932_v59, %v1933_v14  ;;  %v1974_v28 = vsel %vm1953_vm3, %v1931_v57, %v1932_v59  ;;  %v3007_v14 = vld [vmem:[%s7016_s5 + $0x1a8] sm:$0xff] }
 0x295   : > { %2786 = vmatmul.mubr.bf16.gmra.mrb[76].mxu1 %v2376_v55  ;;  %3190 = vperm.xlu1 %4471, %v2988_v9   ;;  %v1936_v9 = vrot.slane %v6076_v40, 4 }
 0x296   : > { %3195 = vperm.xlu0 %4470, %v2989_v37   ;;  %4050 = vmatprep.mubr.msk.bf16.mxu1 %vm888_vm2, %v2379_v11  ;;  %v3006_v11 = vld [vmem:[%s7016_s5 + $0x1a0] sm:$0xff] }
 0x297   : > { %v4412_v36 = vpop.permute.xlu0 %4411 }
 0x298   : > { %v4414_v26 = vunpack.i.h.bf16 %v4412_v36  ;;  %v4413_v52 = vunpack.i.l.bf16 %v4412_v36 }
 0x299   : > { %3260 = vperm.xlu1 %4471, %v3002_v41  }
 0x29a   : > { %3265 = vperm.xlu0 %4470, %v3003_v38   ;;  %v2314_v30 = vsel %vm888_vm2, %v5972_v35, %v4413_v52  ;;  %v2315_v8 = vsel %vm888_vm2, %v5992_v21, %v4414_v26  ;;  %v2381_v35 = vpack.c.bf16 %v1973_v56, %v1974_v28  ;;  %v1935_v21 = vrot.slane %v6056_v53, 4  ;;  %v2962_v26 = vld [vmem:[%s7016_s5 + $0x40] sm:$0xff]  ;;  %v2963_v52 = vld [vmem:[%s7016_s5 + $0x48] sm:$0xff] }
 0x29b   : > { %v2378_v49 = vpack.c.bf16 %v2315_v8, %v2314_v30  ;;  %v1938_v8 = vrot.slane %v6104_v0, 4  ;;  %v2979_v28 = vld [vmem:[%s7016_s5 + $0xc8] sm:$0xff] }
 0x29c   : > { %v1971_v13 = vsel %vm1953_vm3, %v1934_v7, %v1935_v21  ;;  %v1970_v41 = vsel %vm1953_vm3, %v1935_v21, %v1936_v9  ;;  %v1940_v7 = vrot.slane %v6132_v31, 4 }
 0x29d   : > { %2794 = vmatmul.mubr.bf16.gmra.mrb[80].mxu1 %v2378_v49  ;;  %3270 = vperm.xlu1 %4471, %v3004_v20   ;;  %v2978_v49 = vld [vmem:[%s7016_s5 + $0xc0] sm:$0xff] }
 0x29e   : > { %3275 = vperm.xlu0 %4470, %v3005_v19   ;;  %4051 = vmatprep.mubr.msk.bf16.mxu1 %vm888_vm2, %v2381_v35 }
 0x29f   : > { %v4417_v24 = vpop.permute.xlu1 %4416 }
 0x2a0   : > { %v4419_v27 = vunpack.i.h.bf16 %v4417_v24  ;;  %v4418_v3 = vunpack.i.l.bf16 %v4417_v24 }
 0x2a1   : > { %3050 = vperm.xlu1 %4471, %v2960_v33   ;;  %v2992_v33 = vld [vmem:[%s7016_s5 + $0x130] sm:$0xff] }
 0x2a2   : > { %3055 = vperm.xlu0 %4470, %v2961_v58   ;;  %v2316_v5 = vsel %vm888_vm2, %v6000_v17, %v4418_v3  ;;  %v2317_v57 = vsel %vm888_vm2, %v6020_v32, %v4419_v27  ;;  %v2383_v17 = vpack.c.bf16 %v1971_v13, %v1972_v12  ;;  %v1937_v32 = vrot.slane %v6084_v54, 4  ;;  %v2993_v58 = vld [vmem:[%s7016_s5 + $0x138] sm:$0xff] }
 0x2a3   : > { %v2380_v42 = vpack.c.bf16 %v2317_v57, %v2316_v5 }
 0x2a4   : > { %v1969_v25 = vsel %vm1953_vm3, %v1936_v9, %v1937_v32  ;;  %v1968_v21 = vsel %vm1953_vm3, %v1937_v32, %v1938_v8 }
 0x2a5   : > { %2802 = vmatmul.mubr.bf16.gmra.mrb[84].mxu1 %v2380_v42  ;;  %3130 = vperm.xlu1 %4471, %v2976_v48   ;;  %v4498_v48 = vld [vmem:[%s7017_s6 + $0x10] sm:$0xff]   ;;  %v3009_v42 = vld [vmem:[%s7016_s5 + $0x1b8] sm:$0xff] }
 0x2a6   : > { %3135 = vperm.xlu0 %4470, %v2977_v50   ;;  %4052 = vmatprep.mubr.msk.bf16.mxu1 %vm888_vm2, %v2383_v17  ;;  %v3008_v50 = vld [vmem:[%s7016_s5 + $0x1b0] sm:$0xff]  ;;  %v1943_v17 = vrot.slane %v6168_v46, 4 }
 0x2a7   : > { %v4422_v22 = vpop.permute.xlu0 %4421  ;;  %4091 = vmatprep.subr.bf16.mxu0 %v4498_v48 }
 0x2a8   : > { %v4424_v15 = vunpack.i.h.bf16 %v4422_v22  ;;  %v4423_v23 = vunpack.i.l.bf16 %v4422_v22  ;;  %4092 = vmatpush3.bf16.msra.mxu0 %v4498_v48  ;;  %v2964_v22 = vld [vmem:[%s7016_s5 + $0x50] sm:$0xff]  ;;  %v2983_v48 = vld [vmem:[%s7016_s5 + $0xe8] sm:$0xff] }
 0x2a9   : > { %3200 = vperm.xlu1 %4471, %v2990_v2   ;;  %v2965_v2 = vld [vmem:[%s7016_s5 + $0x58] sm:$0xff] }
 0x2aa   : > { %3205 = vperm.xlu0 %4470, %v2991_v34   ;;  %v2318_v37 = vsel %vm888_vm2, %v6028_v60, %v4423_v23  ;;  %v2319_v55 = vsel %vm888_vm2, %v6048_v61, %v4424_v15  ;;  %v2385_v60 = vpack.c.bf16 %v1969_v25, %v1970_v41  ;;  %v1939_v61 = vrot.slane %v6112_v6, 4  ;;  %v2980_v25 = vld [vmem:[%s7016_s5 + $0xd0] sm:$0xff] }
 0x2ab   : > { %v2382_v36 = vpack.c.bf16 %v2319_v55, %v2318_v37  ;;  %v1942_v23 = vrot.slane %v6160_v16, 4 }
 0x2ac   : > { %v1967_v19 = vsel %vm1953_vm3, %v1938_v8, %v1939_v61 }
 0x2ad   : > { %2810 = vmatmul.mubr.bf16.gmra.mrb[88].mxu1 %v2382_v36  ;;  %3280 = vperm.xlu1 %4471, %v3006_v11   ;;  %v1963_v55 = vsel %vm1953_vm3, %v1942_v23, %v1943_v17  ;;  %v2981_v11 = vld [vmem:[%s7016_s5 + $0xd8] sm:$0xff] }
 0x2ae   : > { %3285 = vperm.xlu0 %4470, %v3007_v14   ;;  %4053 = vmatprep.mubr.msk.bf16.mxu1 %vm888_vm2, %v2385_v60  ;;  %v2994_v60 = vld [vmem:[%s7016_s5 + $0x140] sm:$0xff] }
 0x2af   : > { %v4427_v38 = vpop.permute.xlu1 %4426 }
 0x2b0   : > { %v4429_v59 = vunpack.i.h.bf16 %v4427_v38  ;;  %v4428_v30 = vunpack.i.l.bf16 %v4427_v38 }
 0x2b1   : > { %3060 = vperm.xlu1 %4471, %v2962_v26  }
 0x2b2   : > { %3065 = vperm.xlu0 %4470, %v2963_v52   ;;  %v2320_v56 = vsel %vm888_vm2, %v6056_v53, %v4428_v30  ;;  %v2321_v20 = vsel %vm888_vm2, %v6076_v40, %v4429_v59  ;;  %v2387_v53 = vpack.c.bf16 %v1967_v19, %v1968_v21  ;;  %v1941_v40 = vrot.slane %v6140_v62, 4  ;;  %v2967_v21 = vld [vmem:[%s7016_s5 + $0x68] sm:$0xff] }
 0x2b3   : > { %v2384_v35 = vpack.c.bf16 %v2321_v20, %v2320_v56  ;;  %v1944_v52 = vrot.slane %v6188_v18, 4  ;;  %v3010_v56 = vld [vmem:[%s7016_s5 + $0x1c0] sm:$0xff]  ;;  %v3011_v20 = vld [vmem:[%s7016_s5 + $0x1c8] sm:$0xff] }
 0x2b4   : > { %v1965_v13 = vsel %vm1953_vm3, %v1940_v7, %v1941_v40  ;;  %v1964_v36 = vsel %vm1953_vm3, %v1941_v40, %v1942_v23 }
 0x2b5   : > { %2818 = vmatmul.mubr.bf16.gmra.mrb[92].mxu1 %v2384_v35  ;;  %3140 = vperm.xlu1 %4471, %v2978_v49   ;;  %v1962_v49 = vsel %vm1953_vm3, %v1943_v17, %v1944_v52  ;;  %v2966_v35 = vld [vmem:[%s7016_s5 + $0x60] sm:$0xff] }
 0x2b6   : > { %3145 = vperm.xlu0 %4470, %v2979_v28   ;;  %4054 = vmatprep.mubr.msk.bf16.mxu1 %vm888_vm2, %v2387_v53 }
 0x2b7   : > { %v4432_v24 = vpop.permute.xlu0 %4431 }
 0x2b8   : > { %v4434_v27 = vunpack.i.h.bf16 %v4432_v24  ;;  %v4433_v3 = vunpack.i.l.bf16 %v4432_v24 }
 0x2b9   : > { %3210 = vperm.xlu1 %4471, %v2992_v33   ;;  %v1946_v33 = vrot.slane %v6216_v39, 4 }
 0x2ba   : > { %3215 = vperm.xlu0 %4470, %v2993_v58   ;;  %v2322_v5 = vsel %vm888_vm2, %v6084_v54, %v4433_v3  ;;  %v2323_v57 = vsel %vm888_vm2, %v6104_v0, %v4434_v27  ;;  %v1966_v54 = vsel %vm1953_vm3, %v1939_v61, %v1940_v7  ;;  %v2995_v61 = vld [vmem:[%s7016_s5 + $0x148] sm:$0xff] }
 0x2bb   : > { %v2386_v12 = vpack.c.bf16 %v2323_v57, %v2322_v5  ;;  %v2389_v0 = vpack.c.bf16 %v1965_v13, %v1966_v54  ;;  %v2982_v13 = vld [vmem:[%s7016_s5 + $0xe0] sm:$0xff]  ;;  %v2996_v54 = vld [vmem:[%s7016_s5 + $0x150] sm:$0xff] }
 0x2bd   : > { %2826 = vmatmul.mubr.bf16.gmra.mrb[96].mxu1 %v2386_v12  ;;  %3290 = vperm.xlu1 %4471, %v3008_v50  }
 0x2be   : > { %3295 = vperm.xlu0 %4470, %v3009_v42   ;;  %4055 = vmatprep.mubr.msk.bf16.mxu1 %vm888_vm2, %v2389_v0  ;;  %v2997_v0 = vld [vmem:[%s7016_s5 + $0x158] sm:$0xff] }
 0x2bf   : > { %v4437_v32 = vpop.permute.xlu1 %4436 }
 0x2c0   : > { %v4439_v34 = vunpack.i.h.bf16 %v4437_v32  ;;  %v4438_v15 = vunpack.i.l.bf16 %v4437_v32 }
 0x2c1   : > { %3070 = vperm.xlu1 %4471, %v2964_v22  }
 0x2c2   : > { %3075 = vperm.xlu0 %4470, %v2965_v2   ;;  %v2324_v9 = vsel %vm888_vm2, %v6112_v6, %v4438_v15  ;;  %v2325_v37 = vsel %vm888_vm2, %v6132_v31, %v4439_v34  ;;  %v2391_v6 = vpack.c.bf16 %v1963_v55, %v1964_v36  ;;  %v1945_v31 = vrot.slane %v6196_v45, 4  ;;  %v4499_v34 = vld [vmem:[%s7017_s6 + $0x18] sm:$0xff]  }
 0x2c3   : > { %v2388_v14 = vpack.c.bf16 %v2325_v37, %v2324_v9  ;;  %v1948_v2 = vrot.slane %v6244_v43, 4  ;;  %4093 = vmatprep.subr.bf16.mxu0 %v4499_v34 }
 0x2c4   : > { %v1961_v8 = vsel %vm1953_vm3, %v1944_v52, %v1945_v31  ;;  %v1960_v42 = vsel %vm1953_vm3, %v1945_v31, %v1946_v33  ;;  %4094 = vmatpush3.bf16.msra.mxu0 %v4499_v34  ;;  %v1950_v52 = vrot.slane %v6275_v44, 4 }
 0x2c5   : > { %2834 = vmatmul.mubr.bf16.gmra.mrb[100].mxu1 %v2388_v14  ;;  %3150 = vperm.xlu1 %4471, %v2980_v25   ;;  %v3013_v14 = vld [vmem:[%s7016_s5 + $0x1d8] sm:$0xff] }
 0x2c6   : > { %3155 = vperm.xlu0 %4470, %v2981_v11   ;;  %4056 = vmatprep.mubr.msk.bf16.mxu1 %vm888_vm2, %v2391_v6  ;;  %v3012_v11 = vld [vmem:[%s7016_s5 + $0x1d0] sm:$0xff]  ;;  %v1951_v6 = vrot.slane %v6283_v29, 4 }
 0x2c7   : > { %v4442_v41 = vpop.permute.xlu0 %4441 }
 0x2c8   : > { %v4444_v38 = vunpack.i.h.bf16 %v4442_v41  ;;  %v4443_v26 = vunpack.i.l.bf16 %v4442_v41  ;;  %v2968_v41 = vld [vmem:[%s7016_s5 + $0x70] sm:$0xff] }
 0x2c9   : > { %3220 = vperm.xlu1 %4471, %v2994_v60   ;;  %v2969_v60 = vld [vmem:[%s7016_s5 + $0x78] sm:$0xff] }
 0x2ca   : > { %3225 = vperm.xlu0 %4470, %v2995_v61   ;;  %v2326_v59 = vsel %vm888_vm2, %v6140_v62, %v4443_v26  ;;  %v2327_v30 = vsel %vm888_vm2, %v6160_v16, %v4444_v38  ;;  %v2393_v62 = vpack.c.bf16 %v1961_v8, %v1962_v49  ;;  %v1947_v16 = vrot.slane %v6224_v10, 4  ;;  %v2984_v49 = vld [vmem:[%s7016_s5 + $0xf0] sm:$0xff] }
 0x2cb   : > { %v2390_v19 = vpack.c.bf16 %v2327_v30, %v2326_v59 }
 0x2cc   : > { %v1959_v5 = vsel %vm1953_vm3, %v1946_v33, %v1947_v16 }
 0x2cd   : > { %2842 = vmatmul.mubr.bf16.gmra.mrb[104].mxu1 %v2390_v19  ;;  %3300 = vperm.xlu1 %4471, %v3010_v56  }
 0x2ce   : > { %3305 = vperm.xlu0 %4470, %v3011_v20   ;;  %4057 = vmatprep.mubr.msk.bf16.mxu1 %vm888_vm2, %v2393_v62  ;;  %v1955_v20 = vsel %vm1953_vm3, %v1950_v52, %v1951_v6  ;;  %v2985_v62 = vld [vmem:[%s7016_s5 + $0xf8] sm:$0xff] }
 0x2cf   : > { %v4447_v28 = vpop.permute.xlu1 %4446 }
 0x2d0   : > { %v4449_v53 = vunpack.i.h.bf16 %v4447_v28  ;;  %v4448_v40 = vunpack.i.l.bf16 %v4447_v28  ;;  %v6580_v24 = vpop.f32.mrb[0].mxu1 }
 0x2d1   : > { %v2637_v58 = vpop.f32.mrb[1].mxu1  ;;  %3080 = vperm.xlu1 %4471, %v2966_v35   ;;  %v2998_v35 = vld [vmem:[%s7016_s5 + $0x160] sm:$0xff] }
 0x2d2   : > { %3085 = vperm.xlu0 %4470, %v2967_v21   ;;  %v6583_v27 = vpop.f32.mrb[2].mxu1  ;;  %v2328_v3 = vsel %vm888_vm2, %v6168_v46, %v4448_v40  ;;  %v2329_v7 = vsel %vm888_vm2, %v6188_v18, %v4449_v53  ;;  %v2395_v46 = vpack.c.bf16 %v1959_v5, %v1960_v42  ;;  %v1949_v18 = vrot.slane %v6255_v51, 4  ;;  %v2999_v21 = vld [vmem:[%s7016_s5 + $0x168] sm:$0xff] }
 0x2d3   : > { %v2640_v57 = vpop.f32.mrb[3].mxu1  ;;  %v2392_v50 = vpack.c.bf16 %v2329_v7, %v2328_v3 }
 0x2d4   : > { %v1957_v55 = vsel %vm1953_vm3, %v1948_v2, %v1949_v18  ;;  %v1956_v28 = vsel %vm1953_vm3, %v1949_v18, %v1950_v52  ;;  %v3014_v57 = vld [vmem:[%s7016_s5 + $0x1e0] sm:$0xff] }
 0x2d5   : > { %2850 = vmatmul.mubr.bf16.gmra.mrb[108].mxu1 %v2392_v50  ;;  %3160 = vperm.xlu1 %4471, %v2982_v13   ;;  %v3015_v13 = vld [vmem:[%s7016_s5 + $0x1e8] sm:$0xff] }
 0x2d6   : > { %3165 = vperm.xlu0 %4470, %v2983_v48   ;;  %4058 = vmatprep.mubr.msk.bf16.mxu1 %vm888_vm2, %v2395_v46 }
 0x2d7   : > { %v4452_v12 = vpop.permute.xlu0 %4451 }
 0x2d8   : > { %v4454_v17 = vunpack.i.h.bf16 %v4452_v12  ;;  %v4453_v32 = vunpack.i.l.bf16 %v4452_v12  ;;  %v6607_v22 = vpop.f32.mrb[4].mxu1 }
 0x2d9   : > { %v2645_v15 = vpop.f32.mrb[5].mxu1  ;;  %3230 = vperm.xlu1 %4471, %v2996_v54  }
 0x2da   : > { %3235 = vperm.xlu0 %4470, %v2997_v0   ;;  %v6613_v23 = vpop.f32.mrb[6].mxu1  ;;  %v2330_v9 = vsel %vm888_vm2, %v6196_v45, %v4453_v32  ;;  %v2331_v37 = vsel %vm888_vm2, %v6216_v39, %v4454_v17  ;;  %v1958_v45 = vsel %vm1953_vm3, %v1947_v16, %v1948_v2 }
 0x2db   : > { %v2648_v25 = vpop.f32.mrb[7].mxu1  ;;  %v2394_v36 = vpack.c.bf16 %v2331_v37, %v2330_v9  ;;  %v2397_v39 = vpack.c.bf16 %v1957_v55, %v1958_v45  ;;  %v3016_v9 = vld [vmem:[%s7016_s5 + $0x1f0] sm:$0xff]  ;;  %v3017_v37 = vld [vmem:[%s7016_s5 + $0x1f8] sm:$0xff]  ;;  %v2636_v55 = vadd.f32 %v6696_v1, %v6580_v24 }
 0x2dc   : > { %v2639_v25 = vadd.f32 %v6696_v1, %v6583_v27 }
 0x2dd   : > { %2858 = vmatmul.mubr.bf16.gmra.mrb[112].mxu1 %v2394_v36  ;;  %3310 = vperm.xlu1 %4471, %v3012_v11   ;;  %v2647_v36 = vadd.f32 %v6696_v1, %v6613_v23 }
 0x2de   : > { %3315 = vperm.xlu0 %4470, %v3013_v14   ;;  %4059 = vmatprep.mubr.msk.bf16.mxu1 %vm888_vm2, %v2397_v39  ;;  %v2644_v14 = vadd.f32 %v6696_v1, %v6607_v22  ;;  %v4500_v22 = vld [vmem:[%s7017_s6 + $0x20] sm:$0xff]  }
 0x2df   : > { %v4457_v31 = vpop.permute.xlu1 %4456  ;;  %4095 = vmatprep.subr.bf16.mxu0 %v4500_v22 }
 0x2e0   : > { %v4459_v61 = vunpack.i.h.bf16 %v4457_v31  ;;  %v4458_v38 = vunpack.i.l.bf16 %v4457_v31  ;;  %v6637_v26 = vpop.f32.mrb[8].mxu1  ;;  %4096 = vmatpush3.bf16.msra.mxu0 %v4500_v22 }
 0x2e1   : > { %v2653_v59 = vpop.f32.mrb[9].mxu1  ;;  %3090 = vperm.xlu1 %4471, %v2968_v41  }
 0x2e2   : > { %3095 = vperm.xlu0 %4470, %v2969_v60   ;;  %v6640_v30 = vpop.f32.mrb[10].mxu1  ;;  %v2332_v8 = vsel %vm888_vm2, %v6224_v10, %v4458_v38  ;;  %v2333_v56 = vsel %vm888_vm2, %v6244_v43, %v4459_v61  ;;  %v2399_v10 = vpack.c.bf16 %v1955_v20, %v1956_v28  ;;  %v1952_v43 = vrot.slane %v6285_v47, 4 }
 0x2e3   : > { %v2656_v19 = vpop.f32.mrb[11].mxu1  ;;  %v2396_v16 = vpack.c.bf16 %v2333_v56, %v2332_v8  ;;  %v2892_v60 = vmax.f32 %v2644_v14, 0.0  ;;  %v2893_v61 = vmax.f32 %v2647_v36, 0.0 }
 0x2e4   : > { %v1954_v42 = vsel %vm1953_vm3, %v1951_v6, %v1952_v43  ;;  %v2017_v46 = vsel %vm1953_vm3, %v1952_v43, %v1889_v63 }
 0x2e5   : > { %2866 = vmatmul.mubr.bf16.gmra.mrb[116].mxu1 %v2396_v16  ;;  %3170 = vperm.xlu1 %4471, %v2984_v49   ;;  %v2401_v17 = vpack.c.bf16 %v2017_v46, %v1954_v42 }
 0x2e6   : > { %3175 = vperm.xlu0 %4470, %v2985_v62   ;;  %4060 = vmatprep.mubr.msk.bf16.mxu1 %vm888_vm2, %v2399_v10 }
 0x2e7   : > { %v4467_v7 = vpop.permute.xlu1 %4466 }
 0x2e8   : > { %v4462_v53 = vpop.permute.xlu0 %4461  ;;  %v6664_v58 = vpop.f32.mrb[12].mxu1  ;;  %v4469_v54 = vunpack.i.h.bf16 %v4467_v7  ;;  %v4468_v0 = vunpack.i.l.bf16 %v4467_v7 }
 0x2e9   : > { %v4464_v40 = vunpack.i.h.bf16 %v4462_v53  ;;  %v4463_v33 = vunpack.i.l.bf16 %v4462_v53  ;;  %3240 = vperm.xlu1 %4471, %v2998_v35   ;;  %v2661_v3 = vpop.f32.mrb[13].mxu1  ;;  %v2652_v53 = vadd.f32 %v6696_v1, %v6637_v26 }
 0x2ea   : > { %3245 = vperm.xlu0 %4470, %v2999_v21   ;;  %v6666_v5 = vpop.f32.mrb[14].mxu1  ;;  %v2336_v2 = vsel %vm888_vm2, %v6283_v29, %v4468_v0  ;;  %v2337_v34 = vsel %vm888_vm2, %v6285_v47, %v4469_v54  ;;  %v2890_v29 = vmax.f32 %v2636_v55, 0.0  ;;  %v2891_v47 = vmax.f32 %v2639_v25, 0.0 }
 0x2eb   : > { %v2334_v48 = vsel %vm888_vm2, %v6255_v51, %v4463_v33  ;;  %v2335_v50 = vsel %vm888_vm2, %v6275_v44, %v4464_v40  ;;  %v2664_v18 = vpop.f32.mrb[15].mxu1  ;;  %v3000_v51 = vld [vmem:[%s7016_s5 + $0x170] sm:$0xff]  ;;  %v3001_v44 = vld [vmem:[%s7016_s5 + $0x178] sm:$0xff]  ;;  %v2400_v11 = vpack.c.bf16 %v2337_v34, %v2336_v2  ;;  %v2655_v40 = vadd.f32 %v6696_v1, %v6640_v30 }
 0x2ec   : > { %v2398_v12 = vpack.c.bf16 %v2335_v50, %v2334_v48  ;;  %v2894_v42 = vmax.f32 %v2652_v53, 0.0 }
 0x2ed   : > { %3320 = vperm.xlu1 %4471, %v3014_v57   ;;  %v2895_v46 = vmax.f32 %v2655_v40, 0.0 }
 0x2ee   : > { %3325 = vperm.xlu0 %4470, %v3015_v13   ;;  %2874 = vmatmul.mubr.bf16.gmra.mrb[120].mxu1 %v2398_v12 }
 0x2ef   : > { %4061 = vmatprep.mubr.msk.bf16.mxu1 %vm888_vm2, %v2401_v17 }
 0x2f0   : > { %v6691_v4 = vpop.f32.mrb[16].mxu1 }
 0x2f1   : > { %v2669_v63 = vpop.f32.mrb[17].mxu1  ;;  %3250 = vperm.xlu1 %4471, %v3000_v51  }
 0x2f2   : > { %3255 = vperm.xlu0 %4470, %v3001_v44   ;;  %v6698_v32 = vpop.f32.mrb[18].mxu1 }
 0x2f3   : > { %v2672_v15 = vpop.f32.mrb[19].mxu1 }
 0x2f5   : > { %3330 = vperm.xlu1 %4471, %v3016_v9  }
 0x2f6   : > { %3335 = vperm.xlu0 %4470, %v3017_v37   ;;  %2882 = vmatmul.mubr.bf16.gmra.mrb[124].mxu1 %v2400_v11 }
 0x2f8   : > { %v6718_v45 = vpop.f32.mrb[20].mxu1  ;;  %v3026_v39 = vpop.permute.xlu1 %3025 }
 0x2f9   : > { %v3021_v6 = vpop.permute.xlu0 %3020  ;;  %v3339_v24 = vmul.f32 %v3026_v39, %v2891_v47  ;;  %v2677_v41 = vpop.f32.mrb[21].mxu1 }
 0x2fa   : > { %v3338_v31 = vmul.f32 %v3021_v6, %v2890_v29  ;;  %v6720_v27 = vpop.f32.mrb[22].mxu1 }
 0x2fb   : > { %v2680_v52 = vpop.f32.mrb[23].mxu1 }
 0x2fc   : > { %v3402_v38 = vadd.f32 %v3339_v24, %v3338_v31  ;;  %v3031_v59 = vpop.permute.xlu1 %3030 }
 0x2fd   : > { %v3036_v8 = vpop.permute.xlu0 %3035  ;;  %v3340_v56 = vmul.f32 %v3031_v59, %v2892_v60 }
 0x2fe   : > { %v3403_v23 = vrot.slane %v3402_v38, 4  ;;  %v3341_v20 = vmul.f32 %v3036_v8, %v2893_v61 }
 0x300   : > { %v3404_v19 = vadd.f32 %v3403_v23, %v3402_v38  ;;  %v3409_v49 = vadd.f32 %v3341_v20, %v3340_v56  ;;  %v6725_v62 = vpop.f32.mrb[24].mxu1  ;;  %v3101_v16 = vpop.permute.xlu1 %3100 }
 0x301   : > { %v3106_v28 = vpop.permute.xlu0 %3105  ;;  %v2685_v35 = vpop.f32.mrb[25].mxu1 }
 0x302   : > { %v3405_v10 = vrot.slane %v3404_v19, 2  ;;  %v3410_v43 = vrot.slane %v3409_v49, 4  ;;  %v6727_v21 = vpop.f32.mrb[26].mxu1 }
 0x303   : > { %v2688_v7 = vpop.f32.mrb[27].mxu1 }
 0x304   : > { %v3406_v33 = vadd.f32 %v3405_v10, %v3404_v19  ;;  %v3411_v3 = vadd.f32 %v3410_v43, %v3409_v49  ;;  %v6733_v57 = vpop.permute.xlu1 %3110 }
 0x305   : > { %v6735_v13 = vpop.permute.xlu0 %3115 }
 0x306   : > { %v3407_v48 = vrot.slane %v3406_v33, 1  ;;  %v3412_v50 = vrot.slane %v3411_v3, 2 }
 0x308   : > { %v3408_v18 = vadd.f32 %v3407_v48, %v3406_v33  ;;  %v3413_v12 = vadd.f32 %v3412_v50, %v3411_v3  ;;  %v6737_v54 = vpop.f32.mrb[28].mxu1  ;;  %v3041_v0 = vpop.permute.xlu1 %3040  ;;  %v4501_v33 = vld [vmem:[%s7017_s6 + $0x28] sm:$0xff]   ;;  %v2660_v48 = vadd.f32 %v6696_v1, %v6664_v58 }
 0x309   : > { %v3046_v26 = vpop.permute.xlu0 %3045  ;;  %v3342_v51 = vmul.f32 %v3041_v0, %v2894_v42  ;;  %v2693_v44 = vpop.f32.mrb[29].mxu1  ;;  %4097 = vmatprep.subr.bf16.mxu0 %v4501_v33  ;;  %v2663_v42 = vadd.f32 %v6696_v1, %v6666_v5 }
 0x30a   : > { %v3414_v17 = vrot.slane %v3413_v12, 1  ;;  %v3343_v30 = vmul.f32 %v3046_v26, %v2895_v46  ;;  %v6739_v63 = vpop.f32.mrb[30].mxu1  ;;  %v3626_v2 = vpack.c.bf16 %v3408_v18, %v3408_v18  ;;  %4098 = vmatpush3.bf16.msra.mxu0 %v4501_v33 }
 0x30b   : > { %v2696_v9 = vpop.f32.mrb[31].mxu1 }
 0x30c   : > { %v3415_v34 = vadd.f32 %v3414_v17, %v3413_v12  ;;  %v3416_v15 = vadd.f32 %v3343_v30, %v3342_v51  ;;  %v6741_v37 = vpop.permute.xlu1 %3120  ;;  %v3713_v29 = vunpack.c.l.b16 %v3626_v2  ;;  %v2896_v2 = vmax.f32 %v2660_v48, 0.0 }
 0x30d   : > { %v6743_v55 = vpop.permute.xlu0 %3125 }
 0x30e   : > { %v3627_v25 = vpack.c.bf16 %v3415_v34, %v3415_v34  ;;  %v3417_v11 = vrot.slane %v3416_v15, 4  ;;  %v2897_v34 = vmax.f32 %v2663_v42, 0.0 }
 0x310   : > { %v3714_v47 = vunpack.c.l.b16 %v3627_v25  ;;  %v3418_v14 = vadd.f32 %v3417_v11, %v3416_v15  ;;  %v2699_v36 = vpop.f32.mrb[32].mxu1  ;;  %v6745_v39 = vpop.permute.xlu1 %3180 }
 0x311   : > { %v6747_v6 = vpop.permute.xlu0 %3185  ;;  %v2700_v24 = vadd.f32 %v6696_v1, %v2699_v36  ;;  %v2701_v60 = vpop.f32.mrb[33].mxu1 }
 0x312   : > { %v3746_v31 = vsel %vm3745_vm4, %v3714_v47, %v3713_v29  ;;  %v3419_v41 = vrot.slane %v3418_v14, 2  ;;  %v2702_v38 = vpop.f32.mrb[34].mxu1 }
 0x313   : > { %v2906_v61 = vmax.f32 %v2700_v24, 0.0  ;;  %v2703_v22 = vadd.f32 %v6696_v1, %v2702_v38  ;;  %v2704_v59 = vpop.f32.mrb[35].mxu1 }
 0x314   : > { %v3420_v52 = vadd.f32 %v3419_v41, %v3418_v14  ;;  %v6752_v23 = vpop.permute.xlu1 %3190 }
 0x315   : > { %v3354_v8 = vmul.f32 %v3101_v16, %v2906_v61  ;;  %v6754_v56 = vpop.permute.xlu0 %3195  ;;  %v2907_v19 = vmax.f32 %v2703_v22, 0.0 }
 0x316   : > { %v3421_v20 = vrot.slane %v3420_v52, 1 }
 0x317   : > { %v3355_v10 = vmul.f32 %v3106_v28, %v2907_v19 }
 0x318   : > { %v3422_v49 = vadd.f32 %v3421_v20, %v3420_v52  ;;  %v2707_v43 = vpop.f32.mrb[36].mxu1  ;;  %v6756_v35 = vpop.permute.xlu1 %3260 }
 0x319   : > { %v6758_v53 = vpop.permute.xlu0 %3265  ;;  %v2708_v40 = vadd.f32 %v6696_v1, %v2707_v43  ;;  %v3458_v3 = vadd.f32 %v3355_v10, %v3354_v8  ;;  %v2709_v7 = vpop.f32.mrb[37].mxu1 }
 0x31a   : > { %v3628_v16 = vpack.c.bf16 %v3422_v49, %v3422_v49  ;;  %v2710_v28 = vpop.f32.mrb[38].mxu1 }
 0x31b   : > { %v2908_v50 = vmax.f32 %v2708_v40, 0.0  ;;  %v3459_v18 = vrot.slane %v3458_v3, 4  ;;  %v2711_v12 = vadd.f32 %v6696_v1, %v2710_v28  ;;  %v2712_v0 = vpop.f32.mrb[39].mxu1 }
 0x31c   : > { %v3715_v46 = vunpack.c.l.b16 %v3628_v16  ;;  %v6770_v17 = vpop.permute.xlu1 %3270 }
 0x31d   : > { %v3356_v26 = vmul.f32 %v6733_v57, %v2908_v50  ;;  %v6772_v51 = vpop.permute.xlu0 %3275  ;;  %v3460_v30 = vadd.f32 %v3459_v18, %v3458_v3  ;;  %v2909_v44 = vmax.f32 %v2711_v12, 0.0 }
 0x31e   : > { %v6775_v58 = vsel %vm3747_vm5, %v3715_v46, %v3746_v31 }
 0x31f   : > { %v3461_v5 = vrot.slane %v3460_v30, 2  ;;  %v3357_v15 = vmul.f32 %v6735_v13, %v2909_v44  ;;  %v2668_v44 = vadd.f32 %v6696_v1, %v6691_v4 }
 0x320   : > { %v2715_v9 = vpop.f32.mrb[40].mxu1  ;;  %v3051_v25 = vpop.permute.xlu1 %3050 }
 0x321   : > { %v3056_v11 = vpop.permute.xlu0 %3055  ;;  %v2716_v29 = vadd.f32 %v6696_v1, %v2715_v9  ;;  %v3462_v57 = vadd.f32 %v3461_v5, %v3460_v30  ;;  %v3465_v47 = vadd.f32 %v3357_v15, %v3356_v26  ;;  %v3344_v14 = vmul.f32 %v3051_v25, %v2896_v2  ;;  %v2717_v24 = vpop.f32.mrb[41].mxu1 }
 0x322   : > { %v3345_v36 = vmul.f32 %v3056_v11, %v2897_v34  ;;  %v2718_v31 = vpop.f32.mrb[42].mxu1  ;;  %v2671_v2 = vadd.f32 %v6696_v1, %v6698_v32 }
 0x323   : > { %v2910_v41 = vmax.f32 %v2716_v29, 0.0  ;;  %v3466_v60 = vrot.slane %v3465_v47, 4  ;;  %v2719_v38 = vadd.f32 %v6696_v1, %v2718_v31  ;;  %v2720_v52 = vpop.f32.mrb[43].mxu1  ;;  %v3463_v22 = vrot.slane %v3462_v57, 1 }
 0x324   : > { %v3423_v61 = vadd.f32 %v3345_v36, %v3344_v14  ;;  %v3131_v59 = vpop.permute.xlu1 %3130  ;;  %v2898_v31 = vmax.f32 %v2668_v44, 0.0  ;;  %v2899_v4 = vmax.f32 %v2671_v2, 0.0 }
 0x325   : > { %v3358_v13 = vmul.f32 %v6741_v37, %v2910_v41  ;;  %v3136_v8 = vpop.permute.xlu0 %3135  ;;  %v3467_v20 = vadd.f32 %v3466_v60, %v3465_v47  ;;  %v2911_v49 = vmax.f32 %v2719_v38, 0.0  ;;  %v3464_v16 = vadd.f32 %v3463_v22, %v3462_v57 }
 0x326   : > { %v3424_v19 = vrot.slane %v3423_v61, 4 }
 0x327   : > { %v3468_v10 = vrot.slane %v3467_v20, 2  ;;  %v3359_v40 = vmul.f32 %v6743_v55, %v2911_v49  ;;  %v3634_v34 = vpack.c.bf16 %v3464_v16, %v3464_v16 }
 0x328   : > { %v3425_v43 = vadd.f32 %v3424_v19, %v3423_v61  ;;  %v2723_v33 = vpop.f32.mrb[44].mxu1  ;;  %v6782_v3 = vpop.permute.xlu1 %3200 }
 0x329   : > { %v6784_v7 = vpop.permute.xlu0 %3205  ;;  %v2724_v48 = vadd.f32 %v6696_v1, %v2723_v33  ;;  %v3469_v50 = vadd.f32 %v3468_v10, %v3467_v20  ;;  %v3472_v37 = vadd.f32 %v3359_v40, %v3358_v13  ;;  %v2725_v42 = vpop.f32.mrb[45].mxu1  ;;  %v3721_v60 = vunpack.c.l.b16 %v3634_v34 }
 0x32a   : > { %v3426_v28 = vrot.slane %v3425_v43, 2  ;;  %v2726_v18 = vpop.f32.mrb[46].mxu1 }
 0x32b   : > { %v2912_v46 = vmax.f32 %v2724_v48, 0.0  ;;  %v3470_v12 = vrot.slane %v3469_v50, 1  ;;  %v3473_v26 = vrot.slane %v3472_v37, 4  ;;  %v2727_v30 = vadd.f32 %v6696_v1, %v2726_v18  ;;  %v2728_v55 = vpop.f32.mrb[47].mxu1 }
 0x32c   : > { %v3427_v0 = vadd.f32 %v3426_v28, %v3425_v43  ;;  %v6792_v5 = vpop.permute.xlu1 %3280 }
 0x32d   : > { %v6794_v15 = vpop.permute.xlu0 %3285  ;;  %v3471_v9 = vadd.f32 %v3470_v12, %v3469_v50  ;;  %v3474_v11 = vadd.f32 %v3473_v26, %v3472_v37  ;;  %v2913_v29 = vmax.f32 %v2727_v30, 0.0  ;;  %v3360_v57 = vmul.f32 %v3131_v59, %v2912_v46 }
 0x32e   : > { %v3428_v25 = vrot.slane %v3427_v0, 1 }
 0x32f   : > { %v3635_v47 = vpack.c.bf16 %v3471_v9, %v3471_v9  ;;  %v3475_v36 = vrot.slane %v3474_v11, 2  ;;  %v3361_v24 = vmul.f32 %v3136_v8, %v2913_v29 }
 0x330   : > { %v3429_v14 = vadd.f32 %v3428_v25, %v3427_v0  ;;  %v2731_v41 = vpop.f32.mrb[48].mxu1  ;;  %v3061_v61 = vpop.permute.xlu1 %3060 }
 0x331   : > { %v3066_v32 = vpop.permute.xlu0 %3065  ;;  %v2732_v38 = vadd.f32 %v6696_v1, %v2731_v41  ;;  %v3722_v52 = vunpack.c.l.b16 %v3635_v47  ;;  %v3476_v13 = vadd.f32 %v3475_v36, %v3474_v11  ;;  %v3479_v20 = vadd.f32 %v3361_v24, %v3360_v57  ;;  %v2733_v19 = vpop.f32.mrb[49].mxu1  ;;  %v4502_v41 = vld [vmem:[%s7017_s6 + $0x30] sm:$0xff]  }
 0x332   : > { %v3629_v22 = vpack.c.bf16 %v3429_v14, %v3429_v14  ;;  %v3346_v49 = vmul.f32 %v3061_v61, %v2898_v31  ;;  %v3347_v10 = vmul.f32 %v3066_v32, %v2899_v4  ;;  %v2734_v59 = vpop.f32.mrb[50].mxu1  ;;  %v2676_v14 = vadd.f32 %v6696_v1, %v6718_v45  ;;  %4099 = vmatprep.subr.bf16.mxu0 %v4502_v41 }
 0x333   : > { %v3759_v43 = vsel %vm3745_vm4, %v3722_v52, %v3721_v60  ;;  %v3477_v40 = vrot.slane %v3476_v13, 1  ;;  %v3480_v33 = vrot.slane %v3479_v20, 4  ;;  %v2736_v16 = vpop.f32.mrb[51].mxu1  ;;  %v2914_v50 = vmax.f32 %v2732_v38, 0.0  ;;  %4100 = vmatpush3.bf16.msra.mxu0 %v4502_v41 }
 0x334   : > { %v3716_v8 = vunpack.c.l.b16 %v3629_v22  ;;  %v3430_v48 = vadd.f32 %v3347_v10, %v3346_v49  ;;  %v2735_v28 = vadd.f32 %v6696_v1, %v2734_v59  ;;  %v3141_v37 = vpop.permute.xlu1 %3140  ;;  %v2679_v31 = vadd.f32 %v6696_v1, %v6720_v27 }
 0x335   : > { %v3146_v42 = vpop.permute.xlu0 %3145  ;;  %v3478_v46 = vadd.f32 %v3477_v40, %v3476_v13  ;;  %v3481_v18 = vadd.f32 %v3480_v33, %v3479_v20  ;;  %v3362_v34 = vmul.f32 %v3141_v37, %v2914_v50  ;;  %v2900_v13 = vmax.f32 %v2676_v14, 0.0 }
 0x336   : > { %v6801_v12 = vsel %vm3749_vm6, %v3716_v8, %v6775_v58  ;;  %v3431_v0 = vrot.slane %v3430_v48, 4  ;;  %v2915_v26 = vmax.f32 %v2735_v28, 0.0  ;;  %v2901_v49 = vmax.f32 %v2679_v31, 0.0 }
 0x337   : > { %v3636_v30 = vpack.c.bf16 %v3478_v46, %v3478_v46  ;;  %v3482_v55 = vrot.slane %v3481_v18, 2 }
 0x338   : > { %v2739_v44 = vpop.f32.mrb[52].mxu1  ;;  %v3432_v2 = vadd.f32 %v3431_v0, %v3430_v48  ;;  %v3363_v9 = vmul.f32 %v3146_v42, %v2915_v26  ;;  %v6803_v25 = vpop.permute.xlu1 %3210 }
 0x339   : > { %v6805_v11 = vpop.permute.xlu0 %3215  ;;  %v3723_v29 = vunpack.c.l.b16 %v3636_v30  ;;  %v3483_v57 = vadd.f32 %v3482_v55, %v3481_v18  ;;  %v2741_v47 = vpop.f32.mrb[53].mxu1  ;;  %v2740_v27 = vadd.f32 %v6696_v1, %v2739_v44 }
 0x33a   : > { %v3433_v58 = vrot.slane %v3432_v2, 2  ;;  %v3486_v36 = vadd.f32 %v3363_v9, %v3362_v34  ;;  %v2742_v24 = vpop.f32.mrb[54].mxu1 }
 0x33b   : > { %v3484_v4 = vrot.slane %v3483_v57, 1  ;;  %v2744_v60 = vpop.f32.mrb[55].mxu1  ;;  %v3760_v61 = vsel %vm3747_vm5, %v3723_v29, %v3759_v43  ;;  %v2743_v59 = vadd.f32 %v6696_v1, %v2742_v24  ;;  %v2916_v0 = vmax.f32 %v2740_v27, 0.0 }
 0x33c   : > { %v3434_v32 = vadd.f32 %v3433_v58, %v3432_v2  ;;  %v3487_v38 = vrot.slane %v3486_v36, 4  ;;  %v6815_v52 = vpop.permute.xlu1 %3290 }
 0x33d   : > { %v6817_v22 = vpop.permute.xlu0 %3295  ;;  %v3485_v45 = vadd.f32 %v3484_v4, %v3483_v57  ;;  %v2917_v26 = vmax.f32 %v2743_v59, 0.0 }
 0x33e   : > { %v3435_v20 = vrot.slane %v3434_v32, 1  ;;  %v3488_v19 = vadd.f32 %v3487_v38, %v3486_v36 }
 0x33f   : > { %v3637_v10 = vpack.c.bf16 %v3485_v45, %v3485_v45 }
 0x340   : > { %v2747_v8 = vpop.f32.mrb[56].mxu1  ;;  %v3436_v43 = vadd.f32 %v3435_v20, %v3434_v32  ;;  %v3489_v40 = vrot.slane %v3488_v19, 2  ;;  %v3071_v33 = vpop.permute.xlu1 %3070 }
 0x341   : > { %v3076_v16 = vpop.permute.xlu0 %3075  ;;  %v3724_v48 = vunpack.c.l.b16 %v3637_v10  ;;  %v3348_v50 = vmul.f32 %v3071_v33, %v2900_v13  ;;  %v2749_v37 = vpop.f32.mrb[57].mxu1 }
 0x342   : > { %v3349_v28 = vmul.f32 %v3076_v16, %v2901_v49  ;;  %v3630_v42 = vpack.c.bf16 %v3436_v43, %v3436_v43  ;;  %v3490_v46 = vadd.f32 %v3489_v40, %v3488_v19  ;;  %v2750_v18 = vpop.f32.mrb[58].mxu1  ;;  %v2684_v19 = vadd.f32 %v6696_v1, %v6725_v62 }
 0x343   : > { %v2752_v55 = vpop.f32.mrb[59].mxu1  ;;  %v3761_v44 = vsel %vm3749_vm6, %v3724_v48, %v3760_v61  ;;  %v2748_v48 = vadd.f32 %v6696_v1, %v2747_v8 }
 0x344   : > { %v3437_v30 = vadd.f32 %v3349_v28, %v3348_v50  ;;  %v3717_v2 = vunpack.c.l.b16 %v3630_v42  ;;  %v3491_v34 = vrot.slane %v3490_v46, 1  ;;  %v3151_v9 = vpop.permute.xlu1 %3150  ;;  %v2902_v50 = vmax.f32 %v2684_v19, 0.0 }
 0x345   : > { %v3156_v29 = vpop.permute.xlu0 %3155  ;;  %v3364_v47 = vmul.f32 %v3151_v9, %v2916_v0  ;;  %v2918_v9 = vmax.f32 %v2748_v48, 0.0 }
 0x346   : > { %v3438_v57 = vrot.slane %v3437_v30, 4  ;;  %v3365_v14 = vmul.f32 %v3156_v29, %v2917_v26  ;;  %v3492_v58 = vadd.f32 %v3491_v34, %v3490_v46  ;;  %v3752_v36 = vsel %vm3751_vm7, %v3717_v2, %v6801_v12 }
 0x347   : > { %v2687_v12 = vadd.f32 %v6696_v1, %v6727_v21  ;;  %v2751_v21 = vadd.f32 %v6696_v1, %v2750_v18 }
 0x348   : > { %v3439_v24 = vadd.f32 %v3438_v57, %v3437_v30  ;;  %v3493_v41 = vadd.f32 %v3365_v14, %v3364_v47  ;;  %v6824_v31 = vpop.f32.mrb[60].mxu1  ;;  %v3638_v4 = vpack.c.bf16 %v3492_v58, %v3492_v58  ;;  %v6826_v60 = vpop.permute.xlu1 %3220 }
 0x349   : > { %v6828_v32 = vpop.permute.xlu0 %3225  ;;  %v2757_v45 = vpop.f32.mrb[61].mxu1  ;;  %v2903_v28 = vmax.f32 %v2687_v12, 0.0  ;;  %v2919_v18 = vmax.f32 %v2751_v21, 0.0 }
 0x34a   : > { %v3440_v61 = vrot.slane %v3439_v24, 2  ;;  %v3494_v38 = vrot.slane %v3493_v41, 4  ;;  %v3725_v13 = vunpack.c.l.b16 %v3638_v4  ;;  %v6830_v20 = vpop.f32.mrb[62].mxu1 }
 0x34b   : > { %v2760_v27 = vpop.f32.mrb[63].mxu1 }
 0x34c   : > { %v3441_v49 = vadd.f32 %v3440_v61, %v3439_v24  ;;  %v3495_v10 = vadd.f32 %v3494_v38, %v3493_v41  ;;  %v6836_v59 = vpop.permute.xlu1 %3300  ;;  %v3762_v40 = vsel %vm3751_vm7, %v3725_v13, %v3761_v44 }
 0x34d   : > { %v6838_v43 = vpop.permute.xlu0 %3305 }
 0x34e   : > { %v3442_v33 = vrot.slane %v3441_v49, 1  ;;  %v3496_v16 = vrot.slane %v3495_v10, 2 }
 0x350   : > { %v3443_v37 = vadd.f32 %v3442_v33, %v3441_v49  ;;  %v3497_v62 = vadd.f32 %v3496_v16, %v3495_v10  ;;  %v2763_v42 = vpop.f32.mrb[64].mxu1  ;;  %v3081_v46 = vpop.permute.xlu1 %3080 }
 0x351   : > { %v3086_v0 = vpop.permute.xlu0 %3085  ;;  %v2764_v26 = vadd.f32 %v6696_v1, %v2763_v42  ;;  %v3350_v2 = vmul.f32 %v3081_v46, %v2902_v50  ;;  %v2765_v44 = vpop.f32.mrb[65].mxu1 }
 0x352   : > { %v3631_v30 = vpack.c.bf16 %v3443_v37, %v3443_v37  ;;  %v3498_v55 = vrot.slane %v3497_v62, 1  ;;  %v3351_v34 = vmul.f32 %v3086_v0, %v2903_v28  ;;  %v2766_v57 = vpop.f32.mrb[66].mxu1  ;;  %v2695_v44 = vadd.f32 %v6696_v1, %v6739_v63 }
 0x353   : > { %v2922_v29 = vmax.f32 %v2764_v26, 0.0  ;;  %v2767_v58 = vadd.f32 %v6696_v1, %v2766_v57  ;;  %v2768_v24 = vpop.f32.mrb[67].mxu1 }
 0x354   : > { %v3718_v8 = vunpack.c.l.b16 %v3631_v30  ;;  %v3499_v47 = vadd.f32 %v3498_v55, %v3497_v62  ;;  %v3444_v14 = vadd.f32 %v3351_v34, %v3350_v2  ;;  %v3161_v4 = vpop.permute.xlu1 %3160 }
 0x355   : > { %v3370_v41 = vmul.f32 %v6745_v39, %v2922_v29  ;;  %v3166_v61 = vpop.permute.xlu0 %3165  ;;  %v2923_v13 = vmax.f32 %v2767_v58, 0.0  ;;  %v3366_v19 = vmul.f32 %v3161_v4, %v2918_v9 }
 0x356   : > { %v3639_v38 = vpack.c.bf16 %v3499_v47, %v3499_v47  ;;  %v3445_v45 = vrot.slane %v3444_v14, 4  ;;  %v3367_v12 = vmul.f32 %v3166_v61, %v2919_v18  ;;  %v6847_v49 = vsel %vm3753_vm8, %v3718_v8, %v3752_v36 }
 0x357   : > { %v3371_v33 = vmul.f32 %v6747_v6, %v2923_v13  ;;  %v2692_v36 = vadd.f32 %v6696_v1, %v6737_v54  ;;  %v4503_v6 = vld [vmem:[%s7017_s6 + $0x38] sm:$0xff]   ;;  %v2905_v61 = vmax.f32 %v2695_v44, 0.0 }
 0x358   : > { %v3726_v10 = vunpack.c.l.b16 %v3639_v38  ;;  %v3446_v27 = vadd.f32 %v3445_v45, %v3444_v14  ;;  %v2771_v16 = vpop.f32.mrb[68].mxu1  ;;  %v3500_v48 = vadd.f32 %v3367_v12, %v3366_v19  ;;  %v6850_v50 = vpop.permute.xlu1 %3230  ;;  %4101 = vmatprep.subr.bf16.mxu0 %v4503_v6  ;;  %v2756_v14 = vadd.f32 %v6696_v1, %v6824_v31 }
 0x359   : > { %v6852_v28 = vpop.permute.xlu0 %3235  ;;  %v2772_v39 = vadd.f32 %v6696_v1, %v2771_v16  ;;  %v3514_v62 = vadd.f32 %v3371_v33, %v3370_v41  ;;  %v2773_v42 = vpop.f32.mrb[69].mxu1  ;;  %4102 = vmatpush3.bf16.msra.mxu0 %v4503_v6  ;;  %v2904_v47 = vmax.f32 %v2692_v36, 0.0  ;;  %v2759_v38 = vadd.f32 %v6696_v1, %v6830_v20 }
 0x35a   : > { %v3447_v37 = vrot.slane %v3446_v27, 2  ;;  %v6856_v21 = vsel %vm3753_vm8, %v3726_v10, %v3762_v40  ;;  %v3501_v46 = vrot.slane %v3500_v48, 4  ;;  %v2774_v0 = vpop.f32.mrb[70].mxu1 }
 0x35b   : > { %v3515_v30 = vrot.slane %v3514_v62, 4  ;;  %v2924_v55 = vmax.f32 %v2772_v39, 0.0  ;;  %v2775_v2 = vadd.f32 %v6696_v1, %v2774_v0  ;;  %v2776_v34 = vpop.f32.mrb[71].mxu1 }
 0x35c   : > { %v3448_v26 = vadd.f32 %v3447_v37, %v3446_v27  ;;  %v3502_v40 = vadd.f32 %v3501_v46, %v3500_v48  ;;  %v6866_v9 = vpop.permute.xlu1 %3310  ;;  %v2921_v46 = vmax.f32 %v2759_v38, 0.0 }
 0x35d   : > { %v6868_v29 = vpop.permute.xlu0 %3315  ;;  %v3516_v57 = vadd.f32 %v3515_v30, %v3514_v62  ;;  %v2925_v8 = vmax.f32 %v2775_v2, 0.0  ;;  %v3372_v41 = vmul.f32 %v6752_v23, %v2924_v55 }
 0x35e   : > { %v3449_v54 = vrot.slane %v3448_v26, 1  ;;  %v3503_v58 = vrot.slane %v3502_v40, 2 }
 0x35f   : > { %v3517_v18 = vrot.slane %v3516_v57, 2  ;;  %v3373_v63 = vmul.f32 %v6754_v56, %v2925_v8  ;;  %v2920_v56 = vmax.f32 %v2756_v14, 0.0 }
 0x360   : > { %v3450_v24 = vadd.f32 %v3449_v54, %v3448_v26  ;;  %v2779_v4 = vpop.f32.mrb[72].mxu1  ;;  %v3504_v45 = vadd.f32 %v3503_v58, %v3502_v40  ;;  %v3091_v13 = vpop.permute.xlu1 %3090 }
 0x361   : > { %v3096_v19 = vpop.permute.xlu0 %3095  ;;  %v2780_v12 = vadd.f32 %v6696_v1, %v2779_v4  ;;  %v3518_v27 = vadd.f32 %v3517_v18, %v3516_v57  ;;  %v3521_v31 = vadd.f32 %v3373_v63, %v3372_v41  ;;  %v3352_v33 = vmul.f32 %v3091_v13, %v2904_v47  ;;  %v2781_v16 = vpop.f32.mrb[73].mxu1 }
 0x362   : > { %v3632_v10 = vpack.c.bf16 %v3450_v24, %v3450_v24  ;;  %v3505_v48 = vrot.slane %v3504_v45, 1  ;;  %v3353_v39 = vmul.f32 %v3096_v19, %v2905_v61  ;;  %v2782_v37 = vpop.f32.mrb[74].mxu1 }
 0x363   : > { %v2926_v23 = vmax.f32 %v2780_v12, 0.0  ;;  %v3522_v42 = vrot.slane %v3521_v31, 4  ;;  %v2783_v20 = vadd.f32 %v6696_v1, %v2782_v37  ;;  %v2784_v36 = vpop.f32.mrb[75].mxu1  ;;  %v3519_v2 = vrot.slane %v3518_v27, 1 }
 0x364   : > { %v3719_v62 = vunpack.c.l.b16 %v3632_v10  ;;  %v3506_v0 = vadd.f32 %v3505_v48, %v3504_v45  ;;  %v3451_v6 = vadd.f32 %v3353_v39, %v3352_v33  ;;  %v3171_v30 = vpop.permute.xlu1 %3170 }
 0x365   : > { %v3374_v26 = vmul.f32 %v6782_v3, %v2926_v23  ;;  %v3176_v55 = vpop.permute.xlu0 %3175  ;;  %v3523_v34 = vadd.f32 %v3522_v42, %v3521_v31  ;;  %v2927_v44 = vmax.f32 %v2783_v20, 0.0  ;;  %v3368_v40 = vmul.f32 %v3171_v30, %v2920_v56 }
 0x366   : > { %v3640_v54 = vpack.c.bf16 %v3506_v0, %v3506_v0  ;;  %v3452_v57 = vrot.slane %v3451_v6, 4  ;;  %v3369_v8 = vmul.f32 %v3176_v55, %v2921_v46  ;;  %v3756_v47 = vsel %vm3755_vm9, %v3719_v62, %v6847_v49 }
 0x367   : > { %v3524_v14 = vrot.slane %v3523_v34, 2  ;;  %v3375_v58 = vmul.f32 %v6784_v7, %v2927_v44  ;;  %v3520_v4 = vadd.f32 %v3519_v2, %v3518_v27 }
 0x368   : > { %v2787_v24 = vpop.f32.mrb[76].mxu1  ;;  %v3727_v18 = vunpack.c.l.b16 %v3640_v54  ;;  %v3453_v41 = vadd.f32 %v3452_v57, %v3451_v6  ;;  %v3507_v63 = vadd.f32 %v3369_v8, %v3368_v40 }
 0x369   : > { %v2788_v3 = vadd.f32 %v6696_v1, %v2787_v24  ;;  %v3525_v61 = vadd.f32 %v3524_v14, %v3523_v34  ;;  %v3528_v38 = vadd.f32 %v3375_v58, %v3374_v26  ;;  %v2789_v45 = vpop.f32.mrb[77].mxu1  ;;  %v3642_v27 = vpack.c.bf16 %v3520_v4, %v3520_v4 }
 0x36a   : > { %v3454_v13 = vrot.slane %v3453_v41, 2  ;;  %v3508_v19 = vrot.slane %v3507_v63, 4  ;;  %v2790_v10 = vpop.f32.mrb[78].mxu1  ;;  %v3764_v49 = vsel %vm3755_vm9, %v3727_v18, %v6856_v21 }
 0x36b   : > { %v2928_v12 = vmax.f32 %v2788_v3, 0.0  ;;  %v3526_v31 = vrot.slane %v3525_v61, 1  ;;  %v3529_v33 = vrot.slane %v3528_v38, 4  ;;  %v2791_v7 = vadd.f32 %v6696_v1, %v2790_v10  ;;  %v2792_v16 = vpop.f32.mrb[79].mxu1 }
 0x36c   : > { %v3455_v48 = vadd.f32 %v3454_v13, %v3453_v41  ;;  %v3509_v39 = vadd.f32 %v3508_v19, %v3507_v63  ;;  %v3729_v55 = vunpack.c.l.b16 %v3642_v27 }
 0x36d   : > { %v3376_v23 = vmul.f32 %v6803_v25, %v2928_v12  ;;  %v3527_v37 = vadd.f32 %v3526_v31, %v3525_v61  ;;  %v3530_v56 = vadd.f32 %v3529_v33, %v3528_v38  ;;  %v2929_v62 = vmax.f32 %v2791_v7, 0.0 }
 0x36e   : > { %v3456_v42 = vrot.slane %v3455_v48, 1  ;;  %v3510_v20 = vrot.slane %v3509_v39, 2 }
 0x36f   : > { %v3643_v36 = vpack.c.bf16 %v3527_v37, %v3527_v37  ;;  %v3531_v46 = vrot.slane %v3530_v56, 2  ;;  %v3377_v0 = vmul.f32 %v6805_v11, %v2929_v62 }
 0x370   : > { %v2795_v21 = vpop.f32.mrb[80].mxu1  ;;  %v3457_v6 = vadd.f32 %v3456_v42, %v3455_v48  ;;  %v3511_v26 = vadd.f32 %v3510_v20, %v3509_v39 }
 0x371   : > { %v2796_v30 = vadd.f32 %v6696_v1, %v2795_v21  ;;  %v3730_v2 = vunpack.c.l.b16 %v3643_v36  ;;  %v3532_v34 = vadd.f32 %v3531_v46, %v3530_v56  ;;  %v3535_v44 = vadd.f32 %v3377_v0, %v3376_v23  ;;  %v2797_v25 = vpop.f32.mrb[81].mxu1 }
 0x372   : > { %v3633_v40 = vpack.c.bf16 %v3457_v6, %v3457_v6  ;;  %v3512_v54 = vrot.slane %v3511_v26, 1  ;;  %v2798_v8 = vpop.f32.mrb[82].mxu1  ;;  %v3246_v25 = vpop.permute.xlu0 %3245 }
 0x373   : > { %v2930_v57 = vmax.f32 %v2796_v30, 0.0  ;;  %v3766_v14 = vsel %vm3745_vm4, %v3730_v2, %v3729_v55  ;;  %v3533_v58 = vrot.slane %v3532_v34, 1  ;;  %v3536_v24 = vrot.slane %v3535_v44, 4  ;;  %v2800_v18 = vpop.f32.mrb[83].mxu1  ;;  %v3241_v2 = vpop.permute.xlu1 %3240 }
 0x374   : > { %v2799_v11 = vadd.f32 %v6696_v1, %v2798_v8  ;;  %v3513_v41 = vadd.f32 %v3512_v54, %v3511_v26  ;;  %v3720_v3 = vunpack.c.l.b16 %v3633_v40 }
 0x375   : > { %v3378_v63 = vmul.f32 %v6826_v60, %v2930_v57  ;;  %v3534_v4 = vadd.f32 %v3533_v58, %v3532_v34  ;;  %v3537_v61 = vadd.f32 %v3536_v24, %v3535_v44 }
 0x376   : > { %v2931_v38 = vmax.f32 %v2799_v11, 0.0  ;;  %v3641_v45 = vpack.c.bf16 %v3513_v41, %v3513_v41  ;;  %v3758_v13 = vsel %vm3757_vm10, %v3720_v3, %v3756_v47 }
 0x377   : > { %v3644_v19 = vpack.c.bf16 %v3534_v4, %v3534_v4  ;;  %v3538_v12 = vrot.slane %v3537_v61, 2 }
 0x378   : > { %v3379_v10 = vmul.f32 %v6828_v32, %v2931_v38  ;;  %v2803_v31 = vpop.f32.mrb[84].mxu1  ;;  %v3728_v16 = vunpack.c.l.b16 %v3641_v45  ;;  %v6905_v38 = vpop.permute.xlu0 %3325 }
 0x379   : > { %v2804_v33 = vadd.f32 %v6696_v1, %v2803_v31  ;;  %v2805_v7 = vpop.f32.mrb[85].mxu1  ;;  %v3731_v48 = vunpack.c.l.b16 %v3644_v19  ;;  %v3539_v39 = vadd.f32 %v3538_v12, %v3537_v61 }
 0x37a   : > { %v3542_v23 = vadd.f32 %v3379_v10, %v3378_v63  ;;  %v2806_v60 = vpop.f32.mrb[86].mxu1  ;;  %v3765_v62 = vsel %vm3757_vm10, %v3728_v16, %v3764_v49  ;;  %v6903_v63 = vpop.permute.xlu1 %3320 }
 0x37b   : > { %v2932_v27 = vmax.f32 %v2804_v33, 0.0  ;;  %v2807_v37 = vadd.f32 %v6696_v1, %v2806_v60  ;;  %v2808_v56 = vpop.f32.mrb[87].mxu1  ;;  %v3767_v47 = vsel %vm3747_vm5, %v3731_v48, %v3766_v14  ;;  %v3540_v42 = vrot.slane %v3539_v39, 1 }
 0x37c   : > { %v3543_v20 = vrot.slane %v3542_v23, 4  ;;  %v3780_v32 = vpack.c.b16 %v3765_v62, %v3758_v13 }
 0x37d   : > { %v3380_v36 = vmul.f32 %v6850_v50, %v2932_v27  ;;  %v2933_v46 = vmax.f32 %v2807_v37, 0.0  ;;  %v3541_v0 = vadd.f32 %v3540_v42, %v3539_v39  ;;  %v3256_v42 = vpop.permute.xlu0 %3255 }
 0x37e   : > { %v3544_v21 = vadd.f32 %v3543_v20, %v3542_v23  ;;  %4103 = vmatprep.mubr.bf16.mxu0 %v3780_v32 }
 0x37f   : > { %v3381_v6 = vmul.f32 %v6852_v28, %v2933_v46  ;;  %v3645_v26 = vpack.c.bf16 %v3541_v0, %v3541_v0 }
 0x380   : > { %v3545_v30 = vrot.slane %v3544_v21, 2  ;;  %v2811_v55 = vpop.f32.mrb[88].mxu1 }
 0x381   : > { %v3549_v34 = vadd.f32 %v3381_v6, %v3380_v36  ;;  %v2812_v49 = vadd.f32 %v6696_v1, %v2811_v55  ;;  %v2813_v44 = vpop.f32.mrb[89].mxu1  ;;  %v3732_v40 = vunpack.c.l.b16 %v3645_v26 }
 0x382   : > { %v3546_v54 = vadd.f32 %v3545_v30, %v3544_v21  ;;  %v2814_v57 = vpop.f32.mrb[90].mxu1 }
 0x383   : > { %v3550_v8 = vrot.slane %v3549_v34, 4  ;;  %v2934_v50 = vmax.f32 %v2812_v49, 0.0  ;;  %v2815_v14 = vadd.f32 %v6696_v1, %v2814_v57  ;;  %v2816_v58 = vpop.f32.mrb[91].mxu1  ;;  %v3768_v24 = vsel %vm3749_vm6, %v3732_v40, %v3767_v47  ;;  %v6910_v1 = vld [vmem:[%s7015_s4] ss:$0 sm:$0xff]  ;;  %v3251_v47 = vpop.permute.xlu1 %3250 }
 0x384   : > { %v3547_v28 = vrot.slane %v3546_v54, 1 }
 0x385   : > { %v3551_v11 = vadd.f32 %v3550_v8, %v3549_v34  ;;  %v2935_v18 = vmax.f32 %v2815_v14, 0.0  ;;  %v3382_v4 = vmul.f32 %v3241_v2, %v2934_v50 }
 0x386   : > { %v3548_v41 = vadd.f32 %v3547_v28, %v3546_v54 }
 0x387   : > { %v3552_v3 = vrot.slane %v3551_v11, 2  ;;  %v3383_v61 = vmul.f32 %v3246_v25, %v2935_v18 }
 0x388   : > { %v3646_v45 = vpack.c.bf16 %v3548_v41, %v3548_v41  ;;  %v2819_v13 = vpop.f32.mrb[92].mxu1 }
 0x389   : > { %v3553_v19 = vadd.f32 %v3552_v3, %v3551_v11  ;;  %v3556_v12 = vadd.f32 %v3383_v61, %v3382_v4  ;;  %v2820_v10 = vadd.f32 %v6910_v1, %v2819_v13  ;;  %v2821_v31 = vpop.f32.mrb[93].mxu1 }
 0x38a   : > { %v3733_v33 = vunpack.c.l.b16 %v3646_v45  ;;  %v2822_v7 = vpop.f32.mrb[94].mxu1 }
 0x38b   : > { %v3554_v16 = vrot.slane %v3553_v19, 1  ;;  %v3557_v48 = vrot.slane %v3556_v12, 4  ;;  %v2936_v39 = vmax.f32 %v2820_v10, 0.0  ;;  %v2823_v23 = vadd.f32 %v6910_v1, %v2822_v7  ;;  %v2824_v60 = vpop.f32.mrb[95].mxu1 }
 0x38c   : > { %v3769_v27 = vsel %vm3751_vm7, %v3733_v33, %v3768_v24 }
 0x38d   : > { %v3555_v37 = vadd.f32 %v3554_v16, %v3553_v19  ;;  %v3558_v56 = vadd.f32 %v3557_v48, %v3556_v12  ;;  %v2937_v62 = vmax.f32 %v2823_v23, 0.0  ;;  %v3384_v36 = vmul.f32 %v3251_v47, %v2936_v39 }
 0x38f   : > { %v3647_v20 = vpack.c.bf16 %v3555_v37, %v3555_v37  ;;  %v3559_v32 = vrot.slane %v3558_v56, 2  ;;  %v3385_v46 = vmul.f32 %v3256_v42, %v2937_v62 }
 0x390   : > { %v2827_v0 = vpop.f32.mrb[96].mxu1 }
 0x391   : > { %v3734_v21 = vunpack.c.l.b16 %v3647_v20  ;;  %v3560_v6 = vadd.f32 %v3559_v32, %v3558_v56  ;;  %v3563_v26 = vadd.f32 %v3385_v46, %v3384_v36  ;;  %v2828_v30 = vadd.f32 %v6910_v1, %v2827_v0  ;;  %v2829_v55 = vpop.f32.mrb[97].mxu1 }
 0x392   : > { %v2830_v2 = vpop.f32.mrb[98].mxu1 }
 0x393   : > { %v3561_v34 = vrot.slane %v3560_v6, 1  ;;  %v3564_v49 = vrot.slane %v3563_v26, 4  ;;  %v2938_v44 = vmax.f32 %v2828_v30, 0.0  ;;  %v2831_v25 = vadd.f32 %v6910_v1, %v2830_v2  ;;  %v2832_v40 = vpop.f32.mrb[99].mxu1 }
 0x394   : > { %v3770_v54 = vsel %vm3753_vm8, %v3734_v21, %v3769_v27 }
 0x395   : > { %v3562_v57 = vadd.f32 %v3561_v34, %v3560_v6  ;;  %v3565_v8 = vadd.f32 %v3564_v49, %v3563_v26  ;;  %v2939_v50 = vmax.f32 %v2831_v25, 0.0  ;;  %v3386_v24 = vmul.f32 %v6756_v35, %v2938_v44 }
 0x397   : > { %v3648_v14 = vpack.c.bf16 %v3562_v57, %v3562_v57  ;;  %v3566_v58 = vrot.slane %v3565_v8, 2  ;;  %v3387_v28 = vmul.f32 %v6758_v53, %v2939_v50 }
 0x398   : > { %v2835_v11 = vpop.f32.mrb[100].mxu1 }
 0x399   : > { %v3735_v18 = vunpack.c.l.b16 %v3648_v14  ;;  %v3567_v41 = vadd.f32 %v3566_v58, %v3565_v8  ;;  %v3570_v3 = vadd.f32 %v3387_v28, %v3386_v24  ;;  %v2836_v4 = vadd.f32 %v6910_v1, %v2835_v11  ;;  %v2837_v61 = vpop.f32.mrb[101].mxu1 }
 0x39a   : > { %v2838_v45 = vpop.f32.mrb[102].mxu1 }
 0x39b   : > { %v3568_v13 = vrot.slane %v3567_v41, 1  ;;  %v3571_v19 = vrot.slane %v3570_v3, 4  ;;  %v2940_v12 = vmax.f32 %v2836_v4, 0.0  ;;  %v2839_v10 = vadd.f32 %v6910_v1, %v2838_v45  ;;  %v2840_v31 = vpop.f32.mrb[103].mxu1 }
 0x39c   : > { %v3771_v33 = vsel %vm3755_vm9, %v3735_v18, %v3770_v54 }
 0x39d   : > { %v3569_v7 = vadd.f32 %v3568_v13, %v3567_v41  ;;  %v3572_v35 = vadd.f32 %v3571_v19, %v3570_v3  ;;  %v2941_v16 = vmax.f32 %v2839_v10, 0.0  ;;  %v3388_v39 = vmul.f32 %v6770_v17, %v2940_v12 }
 0x39f   : > { %v3649_v53 = vpack.c.bf16 %v3569_v7, %v3569_v7  ;;  %v3573_v48 = vrot.slane %v3572_v35, 2  ;;  %v3389_v23 = vmul.f32 %v6772_v51, %v2941_v16 }
 0x3a0   : > { %v2843_v60 = vpop.f32.mrb[104].mxu1 }
 0x3a1   : > { %v3736_v27 = vunpack.c.l.b16 %v3649_v53  ;;  %v3574_v37 = vadd.f32 %v3573_v48, %v3572_v35  ;;  %v3577_v56 = vadd.f32 %v3389_v23, %v3388_v39  ;;  %v2844_v62 = vadd.f32 %v6910_v1, %v2843_v60  ;;  %v2845_v47 = vpop.f32.mrb[105].mxu1 }
 0x3a2   : > { %v2846_v42 = vpop.f32.mrb[106].mxu1 }
 0x3a3   : > { %v3578_v20 = vrot.slane %v3577_v56, 4  ;;  %v2942_v32 = vmax.f32 %v2844_v62, 0.0  ;;  %v2847_v36 = vadd.f32 %v6910_v1, %v2846_v42  ;;  %v2848_v46 = vpop.f32.mrb[107].mxu1  ;;  %v3575_v0 = vrot.slane %v3574_v37, 1 }
 0x3a4   : > { %v6928_v21 = vsel %vm3757_vm10, %v3736_v27, %v3771_v33 }
 0x3a5   : > { %v3579_v17 = vadd.f32 %v3578_v20, %v3577_v56  ;;  %v2943_v6 = vmax.f32 %v2847_v36, 0.0  ;;  %v3390_v26 = vmul.f32 %v6792_v5, %v2942_v32  ;;  %v3576_v55 = vadd.f32 %v3575_v0, %v3574_v37 }
 0x3a7   : > { %v3580_v51 = vrot.slane %v3579_v17, 2  ;;  %v3391_v30 = vmul.f32 %v6794_v15, %v2943_v6  ;;  %v3650_v58 = vpack.c.bf16 %v3576_v55, %v3576_v55 }
 0x3a8   : > { %v2851_v2 = vpop.f32.mrb[108].mxu1 }
 0x3a9   : > { %v3581_v34 = vadd.f32 %v3580_v51, %v3579_v17  ;;  %v3584_v49 = vadd.f32 %v3391_v30, %v3390_v26  ;;  %v2852_v44 = vadd.f32 %v6910_v1, %v2851_v2  ;;  %v2853_v25 = vpop.f32.mrb[109].mxu1  ;;  %v3737_v3 = vunpack.c.l.b16 %v3650_v58 }
 0x3aa   : > { %v2854_v40 = vpop.f32.mrb[110].mxu1 }
 0x3ab   : > { %v3582_v54 = vrot.slane %v3581_v34, 1  ;;  %v3585_v57 = vrot.slane %v3584_v49, 4  ;;  %v2944_v8 = vmax.f32 %v2852_v44, 0.0  ;;  %v2855_v50 = vadd.f32 %v6910_v1, %v2854_v40  ;;  %v2856_v14 = vpop.f32.mrb[111].mxu1 }
 0x3ad   : > { %v3583_v24 = vadd.f32 %v3582_v54, %v3581_v34  ;;  %v3586_v28 = vadd.f32 %v3585_v57, %v3584_v49  ;;  %v2945_v5 = vmax.f32 %v2855_v50, 0.0  ;;  %v3392_v18 = vmul.f32 %v6815_v52, %v2944_v8 }
 0x3af   : > { %v3651_v11 = vpack.c.bf16 %v3583_v24, %v3583_v24  ;;  %v3587_v15 = vrot.slane %v3586_v28, 2  ;;  %v3393_v41 = vmul.f32 %v6817_v22, %v2945_v5 }
 0x3b0   : > { %v2859_v4 = vpop.f32.mrb[112].mxu1 }
 0x3b1   : > { %v3738_v61 = vunpack.c.l.b16 %v3651_v11  ;;  %v3588_v45 = vadd.f32 %v3587_v15, %v3586_v28  ;;  %v3591_v13 = vadd.f32 %v3393_v41, %v3392_v18  ;;  %v2860_v19 = vadd.f32 %v6910_v1, %v2859_v4  ;;  %v2861_v12 = vpop.f32.mrb[113].mxu1 }
 0x3b2   : > { %v2862_v10 = vpop.f32.mrb[114].mxu1 }
 0x3b3   : > { %v3773_v31 = vsel %vm3745_vm4, %v3738_v61, %v3737_v3  ;;  %v3589_v33 = vrot.slane %v3588_v45, 1  ;;  %v3592_v7 = vrot.slane %v3591_v13, 4  ;;  %v2864_v35 = vpop.f32.mrb[115].mxu1  ;;  %v2946_v16 = vmax.f32 %v2860_v19, 0.0 }
 0x3b4   : > { %v2863_v53 = vadd.f32 %v6910_v1, %v2862_v10 }
 0x3b5   : > { %v3590_v52 = vadd.f32 %v3589_v33, %v3588_v45  ;;  %v3593_v48 = vadd.f32 %v3592_v7, %v3591_v13  ;;  %v3394_v60 = vmul.f32 %v6836_v59, %v2946_v16 }
 0x3b6   : > { %v2947_v22 = vmax.f32 %v2863_v53, 0.0 }
 0x3b7   : > { %v3652_v39 = vpack.c.bf16 %v3590_v52, %v3590_v52  ;;  %v3594_v23 = vrot.slane %v3593_v48, 2 }
 0x3b8   : > { %v3395_v27 = vmul.f32 %v6838_v43, %v2947_v22  ;;  %v2867_v37 = vpop.f32.mrb[116].mxu1 }
 0x3b9   : > { %v3739_v56 = vunpack.c.l.b16 %v3652_v39  ;;  %v3595_v62 = vadd.f32 %v3594_v23, %v3593_v48  ;;  %v2868_v47 = vadd.f32 %v6910_v1, %v2867_v37  ;;  %v2869_v42 = vpop.f32.mrb[117].mxu1  ;;  %v3336_v39 = vpop.permute.xlu0 %3335 }
 0x3ba   : > { %v3598_v20 = vadd.f32 %v3395_v27, %v3394_v60  ;;  %v2870_v32 = vpop.f32.mrb[118].mxu1 }
 0x3bb   : > { %v3774_v36 = vsel %vm3747_vm5, %v3739_v56, %v3773_v31  ;;  %v3596_v46 = vrot.slane %v3595_v62, 1  ;;  %v2948_v0 = vmax.f32 %v2868_v47, 0.0  ;;  %v2871_v17 = vadd.f32 %v6910_v1, %v2870_v32  ;;  %v2872_v6 = vpop.f32.mrb[119].mxu1 }
 0x3bc   : > { %v3599_v51 = vrot.slane %v3598_v20, 4 }
 0x3bd   : > { %v3597_v26 = vadd.f32 %v3596_v46, %v3595_v62  ;;  %v2949_v59 = vmax.f32 %v2871_v17, 0.0  ;;  %v3396_v55 = vmul.f32 %v6866_v9, %v2948_v0 }
 0x3be   : > { %v3600_v30 = vadd.f32 %v3599_v51, %v3598_v20 }
 0x3bf   : > { %v3653_v43 = vpack.c.bf16 %v3597_v26, %v3597_v26  ;;  %v3397_v2 = vmul.f32 %v6868_v29, %v2949_v59 }
 0x3c0   : > { %v3601_v34 = vrot.slane %v3600_v30, 2 }
 0x3c1   : > { %v3740_v49 = vunpack.c.l.b16 %v3653_v43  ;;  %v3605_v44 = vadd.f32 %v3397_v2, %v3396_v55  ;;  %v2875_v40 = vpop.f32.mrb[120].mxu1  ;;  %v4062_v2 = vld [vmem:[%s7018_s7] ss:$0 sm:$0xff] }
 0x3c2   : > { %v3602_v25 = vadd.f32 %v3601_v34, %v3600_v30  ;;  %v2876_v8 = vadd.f32 %v6910_v1, %v2875_v40  ;;  %v2877_v50 = vpop.f32.mrb[121].mxu1 }
 0x3c3   : > { %v3775_v54 = vsel %vm3749_vm6, %v3740_v49, %v3774_v36  ;;  %v3606_v57 = vrot.slane %v3605_v44, 4  ;;  %v2878_v58 = vpop.f32.mrb[122].mxu1 }
 0x3c4   : > { %v3603_v14 = vrot.slane %v3602_v25, 1  ;;  %v2950_v28 = vmax.f32 %v2876_v8, 0.0  ;;  %v2879_v5 = vadd.f32 %v6910_v1, %v2878_v58  ;;  %v2880_v9 = vpop.f32.mrb[123].mxu1 }
 0x3c5   : > { %v3607_v24 = vadd.f32 %v3606_v57, %v3605_v44 }
 0x3c6   : > { %v3604_v11 = vadd.f32 %v3603_v14, %v3602_v25  ;;  %v2951_v15 = vmax.f32 %v2879_v5, 0.0  ;;  %v3398_v3 = vmul.f32 %v6903_v63, %v2950_v28 }
 0x3c7   : > { %v3608_v29 = vrot.slane %v3607_v24, 2 }
 0x3c8   : > { %v3654_v18 = vpack.c.bf16 %v3604_v11, %v3604_v11  ;;  %v3399_v4 = vmul.f32 %v6905_v38, %v2951_v15  ;;  %v3331_v38 = vpop.permute.xlu1 %3330 }
 0x3c9   : > { %v3609_v41 = vadd.f32 %v3608_v29, %v3607_v24  ;;  %v2883_v45 = vpop.f32.mrb[124].mxu1 }
 0x3ca   : > { %v3741_v61 = vunpack.c.l.b16 %v3654_v18  ;;  %v3612_v19 = vadd.f32 %v3399_v4, %v3398_v3  ;;  %v2884_v12 = vadd.f32 %v6910_v1, %v2883_v45  ;;  %v2885_v10 = vpop.f32.mrb[125].mxu1 }
 0x3cb   : > { %v3610_v13 = vrot.slane %v3609_v41, 1  ;;  %v2886_v33 = vpop.f32.mrb[126].mxu1 }
 0x3cc   : > { %v3776_v31 = vsel %vm3751_vm7, %v3741_v61, %v3775_v54  ;;  %v3613_v35 = vrot.slane %v3612_v19, 4  ;;  %v2952_v16 = vmax.f32 %v2884_v12, 0.0  ;;  %v2887_v53 = vadd.f32 %v6910_v1, %v2886_v33  ;;  %v2888_v52 = vpop.f32.mrb[127].mxu1 }
 0x3cd   : > { %v3611_v7 = vadd.f32 %v3610_v13, %v3609_v41 }
 0x3ce   : > { %v3614_v63 = vadd.f32 %v3613_v35, %v3612_v19  ;;  %v2953_v22 = vmax.f32 %v2887_v53, 0.0  ;;  %v3400_v27 = vmul.f32 %v3331_v38, %v2952_v16 }
 0x3cf   : > { %v3655_v48 = vpack.c.bf16 %v3611_v7, %v3611_v7 }
 0x3d0   : > { %v3615_v60 = vrot.slane %v3614_v63, 2  ;;  %v3401_v37 = vmul.f32 %v3336_v39, %v2953_v22 }
 0x3d1   : > { %v3742_v23 = vunpack.c.l.b16 %v3655_v48 }
 0x3d2   : > { %v3616_v62 = vadd.f32 %v3615_v60, %v3614_v63  ;;  %v3619_v47 = vadd.f32 %v3401_v37, %v3400_v27 }
 0x3d3   : > { %v3777_v56 = vsel %vm3753_vm8, %v3742_v23, %v3776_v31 }
 0x3d4   : > { %v3617_v42 = vrot.slane %v3616_v62, 1  ;;  %v3620_v20 = vrot.slane %v3619_v47, 4 }
 0x3d6   : > { %v3618_v32 = vadd.f32 %v3617_v42, %v3616_v62  ;;  %v3621_v36 = vadd.f32 %v3620_v20, %v3619_v47 }
 0x3d8   : > { %v3656_v1 = vpack.c.bf16 %v3618_v32, %v3618_v32  ;;  %v3622_v46 = vrot.slane %v3621_v36, 2 }
 0x3da   : > { %v3743_v0 = vunpack.c.l.b16 %v3656_v1  ;;  %v3623_v17 = vadd.f32 %v3622_v46, %v3621_v36 }
 0x3dc   : > { %v3624_v6 = vrot.slane %v3623_v17, 1  ;;  %v3778_v51 = vsel %vm3755_vm9, %v3743_v0, %v3777_v56 }
 0x3de   : > { %v3625_v26 = vadd.f32 %v3624_v6, %v3623_v17 }
 0x3e0   : > { %v3657_v59 = vpack.c.bf16 %v3625_v26, %v3625_v26 }
 0x3e2   : > { %v3744_v30 = vunpack.c.l.b16 %v3657_v59 }
 0x3e4   : > { %v3779_v43 = vsel %vm3757_vm10, %v3744_v30, %v3778_v51 }
 0x3e5   : > { %v3781_v55 = vpack.c.b16 %v3779_v43, %v6928_v21 }
 0x3e7   : > { %4104 = vmatmul.mubr.bf16.vlgmr.msra.gmra.mrb[128].mxu0 %v3781_v55 }
 0x4ba   : > { %v4105_v34 = vpop.f32.mrb[128].mxu0 }
 0x4bb   : > { %v3875_v49 = vadd.f32 %v4105_v34, %v4062_v2  ;;  %v3866_v44 = vpop.f32.mrb[129].mxu0 }
 0x4bc   : > { %v3867_v25 = vadd.f32 %v4062_v2, %v3866_v44  ;;  %v4106_v40 = vpop.f32.mrb[130].mxu0 }
 0x4bd   : > { %v3883_v54 = vmax.f32 %v3875_v49, 0.0  ;;  %v3878_v57 = vadd.f32 %v4106_v40, %v4062_v2  ;;  %v3869_v8 = vpop.f32.mrb[131].mxu0 }
 0x4be   : > { %v3881_v21 = vmax.f32 %v3867_v25, 0.0  ;;  %v3870_v50 = vadd.f32 %v4062_v2, %v3869_v8 }
 0x4bf   : > { %3887 = vst [vmem:[%s299_s25 + $0x10] sm:$0xff] %v3883_v54  ;;  %v3884_v14 = vmax.f32 %v3878_v57, 0.0 }
 0x4c0   : > { %3885 = vst [vmem:[%s299_s25] sm:$0xff] %v3881_v21  ;;  %v3882_v58 = vmax.f32 %v3870_v50, 0.0 }
 0x4c1   : > { %3888 = vst [vmem:[%s299_s25 + $0x18] sm:$0xff] %v3884_v14 }
 0x4c2   : > { %3886 = vst [vmem:[%s299_s25 + $0x8] sm:$0xff] %v3882_v58 }
 0x4c3   : > { %4521 = shalt.err (!%p4518_p3)
}
 0x4c4   : > { %s4522_s22 = scalar_lea.hbm %s6968_s18, 512  ;;  %s4526_s25 = scalar_lea.hbm %s7019_s8, 1024 }
 0x4c5   : > { %p4523_p4 = scmp.ne.s32.totalorder %s6968_s18, %s4522_s22  ;;  %p4527_p9 = scmp.lt.u32.totalorder %s6968_s18, %s7019_s8 }
 0x4c6   : > { %p4528_p10 = scmp.lt.u32.totalorder %s4526_s25, %s4522_s22  ;;  %p4530_p12 = scmp.lt.u32.totalorder %s4522_s22, %s6968_s18 }
 0x4c7   : > { %p4524_p7 = pnand %p4523_p4, %p4660_p5 }
 0x4c8   : > { %p4529_p11 = por %p4528_p10, %p4527_p9 }
 0x4c9   : > { %p4525_p8 = pneg %p4524_p7 }
 0x4ca   : > { %p4531_p13 = por %p4530_p12, %p4529_p11 }
 0x4cc   : > { %p4532_p0 = pnand %p4531_p13, %p4525_p8 }
 0x4ce   : > { %4535 = shalt.err (!%p4532_p0)
}
 0x4cf   : > { %s4575_s13 = smov 128   ;;  %s4576_s19 = smov 8  }
 0x4d0   : > { %4107 = dma.vmem_to_hbm [thread:$0]  (%p4660_p5), %s6963_s26, 512, %s6968_s18, %s6970_s9, %s4575_s13, %s4575_s13, %s4576_s19  }
 0x4d1 PF: > { %p4113_p1 = scmp.ge.s32.totalorder %s4570_s30, 2  ;;  %s3918_s20 = sand.u32 1, %s4558_s27  }
 0x4d2   : > { %s3919_s21 = scalar_lea.sflag [#allocation3], %s3918_s20 }
 0x4d3   : > { %p4110_p2 = pnand %p4113_p1, %p4664_p6 }
 0x4d5   : > { %4553 = dma.done.wait (!%p4110_p2), %s3919_s21, 512  }
 0x4d6   : > { %4555 = vsyncadd (!%p4110_p2), %s3919_s21, 4294966784  ;;  %p18_p3 = scmp.ge.s32.totalorder %s4647_s11, 4   ;;  %s7109_s27 = smov %s4562_s28 }
 0x4d7   : > { %s7110_s28 = smov %s4566_s29  ;;  %s7111_s29 = smov %s4658_s14 }
 0x4d8   : > { %s7112_s30 = smov %s4647_s11  ;;  %20 = sbr.rel (!%p18_p3) target bundleno = 3 (0x3), region = 87 }
 0x4df   :  { %3924 = vsyncpa [#allocation3], 1 }
 0x4e0   :  { %3926 = vsyncpa [#allocation3 + $0x1], 1 }

</bundles_post_ra>
